<compile_context>
chip_gen: v5e
topology: v5e:2x2
jax: 0.10.0
libtpu: 0.0.40
codegen_flags: <defaults>
</compile_context>

<pallas_src>
import functools

import jax
import jax.numpy as jnp
from jax.experimental import pallas as pl
from jax.experimental.pallas import tpu as pltpu


# ------------------------------------------------------------------ module config helper

def get_scaling_factor(upsampling_rate, nr_layer, layer=0):
    # mirrors getScalingFactor (without the print)
    sf = upsampling_rate ** (1.0 / nr_layer)
    factors = nr_layer * [int(round(sf))]
    return factors[layer]


# ------------------------------------------------------------------ Pallas kernel

def _adaptive_deconv_kernel(p_ref, f_ref, rep_ref, w1_ref, b1_ref, wd_ref, bd_ref,
                            wf_ref, bf_ref, bns_ref, bnt_ref,
                            pnew_ref, fnew_ref, *, feat_dim, slope, radius):
    f = f_ref[...]                                                   # (TM, Cin)

    # Fused first Linear of BOTH branches: one lane-dense (TM, 2*feat_dim) MXU matmul.
    h = jnp.dot(f, w1_ref[...], preferred_element_type=jnp.float32) + b1_ref[...]
    h = jnp.maximum(h, slope * h)                                    # LeakyReLU (slope < 1)
    h_t = h[:, :feat_dim]                                            # transl branch hidden
    h_f = h[:, feat_dim:]                                            # feature branch hidden

    # Translation head: Linear -> Tanh, scale by kernel_radius, add broadcast points.
    # The up-fold broadcast of p is a tiny (TM,3)x(3,3*up) matmul with a stacked-identity
    # matrix -> no HBM tiling of p and no in-kernel concat/reshape.
    d = jnp.tanh(jnp.dot(h_t, wd_ref[...], preferred_element_type=jnp.float32)
                 + bd_ref[...])
    p_rep = jnp.dot(p_ref[...], rep_ref[...], preferred_element_type=jnp.float32)
    pnew_ref[...] = p_rep + d * radius                               # (TM, 3*up)

    # Feature head: Linear -> LeakyReLU -> eval-mode BatchNorm1d (per-channel affine).
    g = jnp.dot(h_f, wf_ref[...], preferred_element_type=jnp.float32) + bf_ref[...]
    g = jnp.maximum(g, slope * g)
    fnew_ref[...] = g * bns_ref[...] + bnt_ref[...]                  # (TM, out_fdim*up)


def adaptive_deconv_pallas(packed, p, f, *, up, out_fdim, kernel_radius, tile_m=512):
    """Returns (p_new [N*up, 3], f_new [N*up, out_fdim])."""
    p = p.astype(jnp.float32)
    f = f.astype(jnp.float32)
    n, cin = f.shape
    feat2 = packed['w1'].shape[1]       # 2 * feature_space
    feat_dim = feat2 // 2
    cout = packed['wf'].shape[1]        # out_fdim * up
    d3 = 3 * up

    # Single full-array block when everything fits in one tile, otherwise tile the rows;
    # Pallas masks the partial last block, so no host-side padding / slicing copies.
    tm = n if n <= tile_m else tile_m
    grid = (pl.cdiv(n, tm),)

    pnew, fnew = pl.pallas_call(
        functools.partial(_adaptive_deconv_kernel,
                          feat_dim=feat_dim, slope=0.01, radius=float(kernel_radius)),
        out_shape=(jax.ShapeDtypeStruct((n, d3), jnp.float32),
                   jax.ShapeDtypeStruct((n, cout), jnp.float32)),
        grid=grid,
        in_specs=[
            pl.BlockSpec((tm, 3),          lambda i: (i, 0)),   # points
            pl.BlockSpec((tm, cin),        lambda i: (i, 0)),   # features
            pl.BlockSpec((3, d3),          lambda i: (0, 0)),   # stacked identity (p up-fold)
            pl.BlockSpec((cin, feat2),     lambda i: (0, 0)),   # fused first-layer weight
            pl.BlockSpec((1, feat2),       lambda i: (0, 0)),   # fused first-layer bias
            pl.BlockSpec((feat_dim, d3),   lambda i: (0, 0)),   # transl second-layer weight
            pl.BlockSpec((1, d3),          lambda i: (0, 0)),   # transl second-layer bias
            pl.BlockSpec((feat_dim, cout), lambda i: (0, 0)),   # feature second-layer weight
            pl.BlockSpec((1, cout),        lambda i: (0, 0)),   # feature second-layer bias
            pl.BlockSpec((1, cout),        lambda i: (0, 0)),   # BN scale (eval mode)
            pl.BlockSpec((1, cout),        lambda i: (0, 0)),   # BN shift (eval mode)
        ],
        out_specs=(pl.BlockSpec((tm, d3),   lambda i: (i, 0)),
                   pl.BlockSpec((tm, cout), lambda i: (i, 0))),
        compiler_params=pltpu.CompilerParams(dimension_semantics=("parallel",)),
    )(p, f, packed['rep'], packed['w1'], packed['b1'], packed['wd'], packed['bd'],
      packed['wf'], packed['bf'], packed['bn_scale'], packed['bn_shift'])

    # (N, 3*up) -> (N*up, 3) and (N, out_fdim*up) -> (N*up, out_fdim) are row-major
    # layout-preserving reshapes (free under jit).
    return pnew.reshape(n * up, 3), fnew.reshape(n * up, out_fdim)


def adaptive_deconv_forward(packed, input_dict, cfg, up, tile_m=512):
    """Functional equivalent of AdaptiveDeconv.forward (eval mode)."""
    # TODO(synk): estimate_radius=True (learnable kernel_radius nn.Parameter) is treated as a
    # constant scalar; self.tmp_i / self.points bookkeeping has no array semantics -> dropped.
    p_new, f_new = adaptive_deconv_pallas(
        packed, input_dict['points'], input_dict['features'],
        up=up, out_fdim=cfg['out_fdim'], kernel_radius=float(cfg['kernel_radius']),
        tile_m=tile_m)
    out = dict(input_dict)
    out['points'] = p_new
    out['features'] = f_new
    return out


# ------------------------------------------------------------------ params (torch layout) + packing

def init_params(key, cfg, up):
    feat = cfg.get('inter_fdim', 128)
    in_f = cfg['in_fdim']
    out_f = cfg['out_fdim']
    ks = jax.random.split(key, 8)

    def lin(kw, kb, cout, cin, scale=0.1):
        w = jax.random.normal(kw, (cout, cin), jnp.float32) * scale   # torch layout [out, in]
        b = jax.random.normal(kb, (cout,), jnp.float32) * scale
        return w, b

    params = {
        'transl':  [lin(ks[0], ks[1], feat, in_f), lin(ks[2], ks[3], 3 * up, feat)],
        'feature': [lin(ks[4], ks[5], feat, in_f), lin(ks[6], ks[7], out_f * up, feat)],
    }
    if cfg['use_batch_norm']:
        n = out_f * up
        # TODO(synk): BatchNorm1d is evaluated in eval mode with running stats (training-mode
        # batch statistics are not implemented).
        params['bn'] = dict(gamma=jnp.ones((n,), jnp.float32),
                            beta=jnp.zeros((n,), jnp.float32),
                            running_mean=jnp.zeros((n,), jnp.float32),
                            running_var=jnp.ones((n,), jnp.float32),
                            eps=1e-5)
    return params


def pack_params(params, cfg, up):
    """One-time packing: transpose to (Cin, Cout), concat the two first layers, BN->affine,
    build the stacked-identity matrix used to broadcast points over the upsampling factor."""
    (wt1, bt1), (wt2, bt2) = params['transl']
    (wf1, bf1), (wf2, bf2) = params['feature']
    w1 = jnp.concatenate([wt1.T, wf1.T], axis=1)            # (in_fdim, 2*feature_space)
    b1 = jnp.concatenate([bt1, bf1])[None, :]               # (1, 2*feature_space)
    wd = wt2.T                                              # (feature_space, 3*up)
    bd = bt2[None, :]
    wf = wf2.T                                              # (feature_space, out_fdim*up)
    bf = bf2[None, :]
    cout = wf2.shape[0]
    if cfg['use_batch_norm']:
        bn = params['bn']
        s = bn['gamma'] / jnp.sqrt(bn['running_var'] + bn['eps'])
        t = bn['beta'] - bn['running_mean'] * s
    else:
        s = jnp.ones((cout,), jnp.float32)
        t = jnp.zeros((cout,), jnp.float32)
    rep = jnp.tile(jnp.eye(3, dtype=jnp.float32), (1, up))  # (3, 3*up): p -> [p, p, ...]
    return dict(rep=rep, w1=w1, b1=b1, wd=wd, bd=bd, wf=wf, bf=bf,
                bn_scale=s[None, :], bn_shift=t[None, :])


# ------------------------------------------------------------------ pure-JAX reference

def reference_forward(params, p, f, cfg, up):
    def leaky(x):
        return jnp.where(x >= 0.0, x, 0.01 * x)

    (wt1, bt1), (wt2, bt2) = params['transl']
    (wf1, bf1), (wf2, bf2) = params['feature']
    n = f.shape[0]
    ht = leaky(f @ wt1.T + bt1)
    delta = jnp.tanh(ht @ wt2.T + bt2)
    delta = delta.reshape(n, up, 3) * cfg['kernel_radius']
    p_new = (p[:, None, :] + delta).reshape(n * up, 3)
    hf = leaky(f @ wf1.T + bf1)
    g = leaky(hf @ wf2.T + bf2)
    if cfg['use_batch_norm']:
        bn = params['bn']
        g = (g - bn['running_mean']) / jnp.sqrt(bn['running_var'] + bn['eps']) \
            * bn['gamma'] + bn['beta']
    f_new = g.reshape(n * up, cfg['out_fdim'])
    return p_new, f_new


# ------------------------------------------------------------------ main

if __name__ == "__main__":
    cfg = dict(
        estimate_radius=False,
        kernel_radius=0.05,
        inter_fdim=128,              # feature_space
        in_fdim=32,
        out_fdim=64,                 # -> out_fdim * up = 128 lanes (lane-dense store)
        subsampling_fct_p1=0.5,
        subsampling_dist=1.0,
        subsampling_fct_p2=1.0,
        number_blocks=1,
        block_id=0,
        use_batch_norm=True,
    )
    sub_rate = cfg['subsampling_fct_p1'] * cfg['subsampling_dist'] ** (-cfg['subsampling_fct_p2'])
    up = get_scaling_factor(1.0 / sub_rate, cfg['number_blocks'], cfg['block_id'])   # = 2

    key = jax.random.PRNGKey(0)
    k_param, k_p, k_f = jax.random.split(key, 3)
    params = init_params(k_param, cfg, up)
    packed = pack_params(params, cfg, up)

    # ---- primary run: N divisible by the tile
    N = 512
    p = jax.random.normal(k_p, (N, 3), jnp.float32)
    f = jax.random.normal(k_f, (N, cfg['in_fdim']), jnp.float32)

    fwd = jax.jit(functools.partial(
        adaptive_deconv_pallas, up=up, out_fdim=cfg['out_fdim'],
        kernel_radius=float(cfg['kernel_radius']), tile_m=512))
    p_new, f_new = fwd(packed, p, f)
    p_new = jax.block_until_ready(p_new)
    f_new = jax.block_until_ready(f_new)
    assert p_new.shape == (N * up, 3)
    assert f_new.shape == (N * up, cfg['out_fdim'])

    p_ref, f_ref = reference_forward(params, p, f, cfg, up)
    err_p = float(jnp.max(jnp.abs(p_new - p_ref)))
    err_f = float(jnp.max(jnp.abs(f_new - f_ref)))
    assert err_p < 1e-2 and err_f < 1e-2, (err_p, err_f)

    # ---- secondary run: N not a multiple of the tile (exercises Pallas partial-block
    #      masking — no host-side pad/slice copies)
    N2 = 300
    p2 = jax.random.normal(jax.random.PRNGKey(1), (N2, 3), jnp.float32)
    f2 = jax.random.normal(jax.random.PRNGKey(2), (N2, cfg['in_fdim']), jnp.float32)
    fwd2 = jax.jit(functools.partial(
        adaptive_deconv_pallas, up=up, out_fdim=cfg['out_fdim'],
        kernel_radius=float(cfg['kernel_radius']), tile_m=128))
    p2_new, f2_new = fwd2(packed, p2, f2)
    jax.block_until_ready((p2_new, f2_new))
    p2_ref, f2_ref = reference_forward(params, p2, f2, cfg, up)
    err_p2 = float(jnp.max(jnp.abs(p2_new - p2_ref)))
    err_f2 = float(jnp.max(jnp.abs(f2_new - f2_ref)))
    assert err_p2 < 1e-2 and err_f2 < 1e-2, (err_p2, err_f2)

    print("KERNEL_OK")
</pallas_src>

<mosaic_0001>
module attributes {stable_mosaic.version = 11 : i64} {
  func.func @_adaptive_deconv_kernel(%arg0: i32, %arg1: memref<512x3xf32, #tpu.memory_space<vmem>>, %arg2: memref<512x32xf32, #tpu.memory_space<vmem>>, %arg3: memref<3x6xf32, #tpu.memory_space<vmem>>, %arg4: memref<32x256xf32, #tpu.memory_space<vmem>>, %arg5: memref<1x256xf32, #tpu.memory_space<vmem>>, %arg6: memref<128x6xf32, #tpu.memory_space<vmem>>, %arg7: memref<1x6xf32, #tpu.memory_space<vmem>>, %arg8: memref<128x128xf32, #tpu.memory_space<vmem>>, %arg9: memref<1x128xf32, #tpu.memory_space<vmem>>, %arg10: memref<1x128xf32, #tpu.memory_space<vmem>>, %arg11: memref<1x128xf32, #tpu.memory_space<vmem>>, %arg12: memref<512x6xf32, #tpu.memory_space<vmem>>, %arg13: memref<512x128xf32, #tpu.memory_space<vmem>>) attributes {dimension_semantics = [#tpu.dimension_semantics<parallel>], iteration_bounds = array<i64: 1>, scalar_prefetch = 0 : i64, scratch_operands = 0 : i64, tpu.core_type = #tpu.core_type<tc>, window_params = [{transform_indices = @transform_0, window_bounds = array<i64: 512, 3>}, {transform_indices = @transform_1, window_bounds = array<i64: 512, 32>}, {pipeline_mode = #tpu.pipeline_mode<synchronous>, transform_indices = @transform_2, window_bounds = array<i64: 3, 6>}, {pipeline_mode = #tpu.pipeline_mode<synchronous>, transform_indices = @transform_3, window_bounds = array<i64: 32, 256>}, {pipeline_mode = #tpu.pipeline_mode<synchronous>, transform_indices = @transform_4, window_bounds = array<i64: 1, 256>}, {pipeline_mode = #tpu.pipeline_mode<synchronous>, transform_indices = @transform_5, window_bounds = array<i64: 128, 6>}, {pipeline_mode = #tpu.pipeline_mode<synchronous>, transform_indices = @transform_6, window_bounds = array<i64: 1, 6>}, {pipeline_mode = #tpu.pipeline_mode<synchronous>, transform_indices = @transform_7, window_bounds = array<i64: 128, 128>}, {pipeline_mode = #tpu.pipeline_mode<synchronous>, transform_indices = @transform_8, window_bounds = array<i64: 1, 128>}, {pipeline_mode = #tpu.pipeline_mode<synchronous>, transform_indices = @transform_9, window_bounds = array<i64: 1, 128>}, {pipeline_mode = #tpu.pipeline_mode<synchronous>, transform_indices = @transform_10, window_bounds = array<i64: 1, 128>}, {transform_indices = @transform_11, window_bounds = array<i64: 512, 6>}, {transform_indices = @transform_12, window_bounds = array<i64: 512, 128>}]} {
    %c0 = arith.constant 0 : index
    %c0_0 = arith.constant 0 : index
    %0 = vector.load %arg2[%c0, %c0_0] : memref<512x32xf32, #tpu.memory_space<vmem>>, vector<512x32xf32>
    %c0_1 = arith.constant 0 : index
    %c0_2 = arith.constant 0 : index
    %1 = vector.load %arg4[%c0_1, %c0_2] : memref<32x256xf32, #tpu.memory_space<vmem>>, vector<32x256xf32>
    %cst = arith.constant dense<0.000000e+00> : vector<512x256xf32>
    %2 = tpu.matmul %0, %1, %cst {dimension_numbers = #tpu.dot_dimension_numbers<[1], [0], [0], [1], [0, 0, 1, 1], [], []>} : vector<512x32xf32>, vector<32x256xf32>, vector<512x256xf32> -> vector<512x256xf32>
    %c0_3 = arith.constant 0 : index
    %c0_4 = arith.constant 0 : index
    %3 = vector.load %arg5[%c0_3, %c0_4] : memref<1x256xf32, #tpu.memory_space<vmem>>, vector<1x256xf32>
    %4 = vector.broadcast %3 : vector<1x256xf32> to vector<512x256xf32>
    %5 = arith.addf %2, %4 : vector<512x256xf32>
    %cst_5 = arith.constant 0.00999999977 : f32
    %6 = vector.broadcast %cst_5 : f32 to vector<512x256xf32>
    %7 = arith.mulf %6, %5 : vector<512x256xf32>
    %8 = arith.maximumf %5, %7 : vector<512x256xf32>
    %9 = vector.extract_strided_slice %8 {offsets = [0, 0], sizes = [512, 128], strides = [1, 1]} : vector<512x256xf32> to vector<512x128xf32>
    %10 = vector.extract_strided_slice %8 {offsets = [0, 128], sizes = [512, 128], strides = [1, 1]} : vector<512x256xf32> to vector<512x128xf32>
    %c0_6 = arith.constant 0 : index
    %c0_7 = arith.constant 0 : index
    %11 = vector.load %arg6[%c0_6, %c0_7] : memref<128x6xf32, #tpu.memory_space<vmem>>, vector<128x6xf32>
    %cst_8 = arith.constant dense<0.000000e+00> : vector<512x6xf32>
    %12 = tpu.matmul %9, %11, %cst_8 {dimension_numbers = #tpu.dot_dimension_numbers<[1], [0], [0], [1], [0, 0, 1, 1], [], []>} : vector<512x128xf32>, vector<128x6xf32>, vector<512x6xf32> -> vector<512x6xf32>
    %c0_9 = arith.constant 0 : index
    %c0_10 = arith.constant 0 : index
    %13 = vector.load %arg7[%c0_9, %c0_10] : memref<1x6xf32, #tpu.memory_space<vmem>>, vector<1x6xf32>
    %14 = vector.broadcast %13 : vector<1x6xf32> to vector<512x6xf32>
    %15 = arith.addf %12, %14 : vector<512x6xf32>
    %16 = math.tanh %15 : vector<512x6xf32>
    %c0_11 = arith.constant 0 : index
    %c0_12 = arith.constant 0 : index
    %17 = vector.load %arg1[%c0_11, %c0_12] : memref<512x3xf32, #tpu.memory_space<vmem>>, vector<512x3xf32>
    %c0_13 = arith.constant 0 : index
    %c0_14 = arith.constant 0 : index
    %18 = vector.load %arg3[%c0_13, %c0_14] : memref<3x6xf32, #tpu.memory_space<vmem>>, vector<3x6xf32>
    %cst_15 = arith.constant dense<0.000000e+00> : vector<512x6xf32>
    %19 = tpu.matmul %17, %18, %cst_15 {dimension_numbers = #tpu.dot_dimension_numbers<[1], [0], [0], [1], [0, 0, 1, 1], [], []>} : vector<512x3xf32>, vector<3x6xf32>, vector<512x6xf32> -> vector<512x6xf32>
    %cst_16 = arith.constant 5.000000e-02 : f32
    %20 = vector.broadcast %cst_16 : f32 to vector<512x6xf32>
    %21 = arith.mulf %16, %20 : vector<512x6xf32>
    %22 = arith.addf %19, %21 : vector<512x6xf32>
    %c0_17 = arith.constant 0 : index
    %c0_18 = arith.constant 0 : index
    %23 = vector.load %arg12[%c0_17, %c0_18] : memref<512x6xf32, #tpu.memory_space<vmem>>, vector<512x6xf32>
    tpu.vector_store %arg12[%c0_17, %c0_18], %22 {strides = array<i32>} : memref<512x6xf32, #tpu.memory_space<vmem>>, vector<512x6xf32>,
    %c0_19 = arith.constant 0 : index
    %c0_20 = arith.constant 0 : index
    %24 = vector.load %arg8[%c0_19, %c0_20] : memref<128x128xf32, #tpu.memory_space<vmem>>, vector<128x128xf32>
    %cst_21 = arith.constant dense<0.000000e+00> : vector<512x128xf32>
    %25 = tpu.matmul %10, %24, %cst_21 {dimension_numbers = #tpu.dot_dimension_numbers<[1], [0], [0], [1], [0, 0, 1, 1], [], []>} : vector<512x128xf32>, vector<128x128xf32>, vector<512x128xf32> -> vector<512x128xf32>
    %c0_22 = arith.constant 0 : index
    %c0_23 = arith.constant 0 : index
    %26 = vector.load %arg9[%c0_22, %c0_23] : memref<1x128xf32, #tpu.memory_space<vmem>>, vector<1x128xf32>
    %27 = vector.broadcast %26 : vector<1x128xf32> to vector<512x128xf32>
    %28 = arith.addf %25, %27 : vector<512x128xf32>
    %cst_24 = arith.constant 0.00999999977 : f32
    %29 = vector.broadcast %cst_24 : f32 to vector<512x128xf32>
    %30 = arith.mulf %29, %28 : vector<512x128xf32>
    %31 = arith.maximumf %28, %30 : vector<512x128xf32>
    %c0_25 = arith.constant 0 : index
    %c0_26 = arith.constant 0 : index
    %32 = vector.load %arg10[%c0_25, %c0_26] : memref<1x128xf32, #tpu.memory_space<vmem>>, vector<1x128xf32>
    %33 = vector.broadcast %32 : vector<1x128xf32> to vector<512x128xf32>
    %34 = arith.mulf %31, %33 : vector<512x128xf32>
    %c0_27 = arith.constant 0 : index
    %c0_28 = arith.constant 0 : index
    %35 = vector.load %arg11[%c0_27, %c0_28] : memref<1x128xf32, #tpu.memory_space<vmem>>, vector<1x128xf32>
    %36 = vector.broadcast %35 : vector<1x128xf32> to vector<512x128xf32>
    %37 = arith.addf %34, %36 : vector<512x128xf32>
    %c0_29 = arith.constant 0 : index
    %c0_30 = arith.constant 0 : index
    %38 = vector.load %arg13[%c0_29, %c0_30] : memref<512x128xf32, #tpu.memory_space<vmem>>, vector<512x128xf32>
    tpu.vector_store %arg13[%c0_29, %c0_30], %37 {strides = array<i32>} : memref<512x128xf32, #tpu.memory_space<vmem>>, vector<512x128xf32>,
    return
  }
  func.func @transform_0(%arg0: i32) -> (i32, i32) {
    %c0_i32 = arith.constant 0 : i32
    %c0_i32_0 = arith.constant 0 : i32
    return %arg0, %c0_i32 : i32, i32
  }
  func.func @transform_1(%arg0: i32) -> (i32, i32) {
    %c0_i32 = arith.constant 0 : i32
    %c0_i32_0 = arith.constant 0 : i32
    return %arg0, %c0_i32 : i32, i32
  }
  func.func @transform_2(%arg0: i32) -> (i32, i32) {
    %c0_i32 = arith.constant 0 : i32
    %c0_i32_0 = arith.constant 0 : i32
    %c0_i32_1 = arith.constant 0 : i32
    return %c0_i32, %c0_i32_0 : i32, i32
  }
  func.func @transform_3(%arg0: i32) -> (i32, i32) {
    %c0_i32 = arith.constant 0 : i32
    %c0_i32_0 = arith.constant 0 : i32
    %c0_i32_1 = arith.constant 0 : i32
    return %c0_i32, %c0_i32_0 : i32, i32
  }
  func.func @transform_4(%arg0: i32) -> (i32, i32) {
    %c0_i32 = arith.constant 0 : i32
    %c0_i32_0 = arith.constant 0 : i32
    %c0_i32_1 = arith.constant 0 : i32
    return %c0_i32, %c0_i32_0 : i32, i32
  }
  func.func @transform_5(%arg0: i32) -> (i32, i32) {
    %c0_i32 = arith.constant 0 : i32
    %c0_i32_0 = arith.constant 0 : i32
    %c0_i32_1 = arith.constant 0 : i32
    return %c0_i32, %c0_i32_0 : i32, i32
  }
  func.func @transform_6(%arg0: i32) -> (i32, i32) {
    %c0_i32 = arith.constant 0 : i32
    %c0_i32_0 = arith.constant 0 : i32
    %c0_i32_1 = arith.constant 0 : i32
    return %c0_i32, %c0_i32_0 : i32, i32
  }
  func.func @transform_7(%arg0: i32) -> (i32, i32) {
    %c0_i32 = arith.constant 0 : i32
    %c0_i32_0 = arith.constant 0 : i32
    %c0_i32_1 = arith.constant 0 : i32
    return %c0_i32, %c0_i32_0 : i32, i32
  }
  func.func @transform_8(%arg0: i32) -> (i32, i32) {
    %c0_i32 = arith.constant 0 : i32
    %c0_i32_0 = arith.constant 0 : i32
    %c0_i32_1 = arith.constant 0 : i32
    return %c0_i32, %c0_i32_0 : i32, i32
  }
  func.func @transform_9(%arg0: i32) -> (i32, i32) {
    %c0_i32 = arith.constant 0 : i32
    %c0_i32_0 = arith.constant 0 : i32
    %c0_i32_1 = arith.constant 0 : i32
    return %c0_i32, %c0_i32_0 : i32, i32
  }
  func.func @transform_10(%arg0: i32) -> (i32, i32) {
    %c0_i32 = arith.constant 0 : i32
    %c0_i32_0 = arith.constant 0 : i32
    %c0_i32_1 = arith.constant 0 : i32
    return %c0_i32, %c0_i32_0 : i32, i32
  }
  func.func @transform_11(%arg0: i32) -> (i32, i32) {
    %c0_i32 = arith.constant 0 : i32
    %c0_i32_0 = arith.constant 0 : i32
    return %arg0, %c0_i32 : i32, i32
  }
  func.func @transform_12(%arg0: i32) -> (i32, i32) {
    %c0_i32 = arith.constant 0 : i32
    %c0_i32_0 = arith.constant 0 : i32
    return %arg0, %c0_i32 : i32, i32
  }
}

</mosaic_0001>

<bundles_post_ra>
// kernel: adaptive_deconv_pallas.1
= control target key start
LH: loop header
LB: loop body
LE: loop exit
PB: predicated region body
PF: predicated region fallthrough
CT: control target
= control target key end

     0   :  { %vm118_vm0 = vcmask 261120   ;;  %vm1600_vm1 = vcmask 1042432   ;;  %vm1407_vm2 = vcmask 23552   ;;  %vm1813_vm3 = vcmask 48128   ;;  %s4991_s3 = inlined_call_operand.vmem [shape: f32[32,256], index: 3, kind: input, shape index: {}]   ;;  %s4992_s1 = inlined_call_operand.vmem [shape: f32[512,32], index: 1, kind: input, shape index: {}]   ;;  %s4993_s5 = inlined_call_operand.vmem [shape: f32[128,6], index: 5, kind: input, shape index: {}]   ;;  %s4994_s2 = inlined_call_operand.vmem [shape: f32[3,6], index: 2, kind: input, shape index: {}]   ;;  %s4995_s0 = inlined_call_operand.vmem [shape: f32[512,3], index: 0, kind: input, shape index: {}]   ;;  %s4996_s7 = inlined_call_operand.vmem [shape: f32[128,128], index: 7, kind: input, shape index: {}]   ;;  %s4997_s4 = inlined_call_operand.vmem [shape: f32[1,256], index: 4, kind: input, shape index: {}]   ;;  %s4998_s6 = inlined_call_operand.vmem [shape: f32[1,6], index: 6, kind: input, shape index: {}]   ;;  %s4999_s8 = inlined_call_operand.vmem [shape: f32[1,128], index: 8, kind: input, shape index: {}]   ;;  %s5000_s9 = inlined_call_operand.vmem [shape: f32[1,128], index: 9, kind: input, shape index: {}]   ;;  %s5001_s10 = inlined_call_operand.vmem [shape: f32[1,128], index: 10, kind: input, shape index: {}]   ;;  %s5002_s12 = inlined_call_operand.vmem [shape: f32[512,128], index: 12, kind: output, shape index: {1}]   ;;  %s5003_s11 = inlined_call_operand.vmem [shape: f32[512,6], index: 11, kind: output, shape index: {0}]  }
   0x1   :  { %v110_v0 = vld [vmem:[%s4991_s3 + $0x30] sm:$0xff]  ;;  %v108_v1 = vld [vmem:[%s4991_s3 + $0x20] sm:$0xff]  ;;  %v75_v5 = vld [vmem:[%s4992_s1 + $0x118] sm:$0xff] }
   0x2   :  { %323 = vmatpush.msra.mxu0 %v110_v0  ;;  %2636 = vmatpush.msra.mxu1 %v110_v0  ;;  %v106_v2 = vld [vmem:[%s4991_s3 + $0x10] sm:$0xff]  ;;  %v104_v3 = vld [vmem:[%s4991_s3] sm:$0xff]  ;;  %v111_v6 = vld [vmem:[%s4991_s3 + $0x38] sm:$0xff] }
   0x3   :  { %2637 = vmatpush.msra.mxu2 %v110_v0  ;;  %v2895_v4 = vld [vmem:[%s4992_s1] sm:$0xff]  ;;  %v91_v7 = vld [vmem:[%s4992_s1 + $0x198] sm:$0xff]  ;;  %v109_v8 = vld [vmem:[%s4991_s3 + $0x28] sm:$0xff] }
   0x4   :  { %324 = vmatpush.msra.mxu0 %v108_v1  ;;  %2638 = vmatpush.msra.mxu1 %v108_v1  ;;  %v2916_v9 = vld [vmem:[%s4992_s1 + $0x8] sm:$0xff]  ;;  %v76_v10 = vld [vmem:[%s4992_s1 + $0x120] sm:$0xff]  ;;  %v2931_v12 = vld [vmem:[%s4992_s1 + $0x10] sm:$0xff] }
   0x5   :  { %2639 = vmatpush.msra.mxu2 %v108_v1  ;;  %v92_v11 = vld [vmem:[%s4992_s1 + $0x1a0] sm:$0xff]  ;;  %v77_v13 = vld [vmem:[%s4992_s1 + $0x128] sm:$0xff]  ;;  %v2946_v15 = vld [vmem:[%s4992_s1 + $0x18] sm:$0xff] }
   0x6   :  { %325 = vmatpush.msra.mxu0 %v106_v2  ;;  %2640 = vmatpush.msra.mxu1 %v106_v2  ;;  %v93_v14 = vld [vmem:[%s4992_s1 + $0x1a8] sm:$0xff]  ;;  %v78_v16 = vld [vmem:[%s4992_s1 + $0x130] sm:$0xff]  ;;  %v2961_v18 = vld [vmem:[%s4992_s1 + $0x20] sm:$0xff] }
   0x7   :  { %2641 = vmatpush.msra.mxu2 %v106_v2  ;;  %v94_v17 = vld [vmem:[%s4992_s1 + $0x1b0] sm:$0xff]  ;;  %v79_v19 = vld [vmem:[%s4992_s1 + $0x138] sm:$0xff]  ;;  %v2979_v22 = vld [vmem:[%s4992_s1 + $0x28] sm:$0xff] }
   0x8   :  { %326 = vmatpush.msra.mxu0 %v104_v3  ;;  %2642 = vmatpush.msra.mxu1 %v104_v3  ;;  %v95_v20 = vld [vmem:[%s4992_s1 + $0x1b8] sm:$0xff]  ;;  %v80_v23 = vld [vmem:[%s4992_s1 + $0x140] sm:$0xff]  ;;  %v2994_v25 = vld [vmem:[%s4992_s1 + $0x30] sm:$0xff] }
   0x9   :  { %2443 = vmatmul.msk.f32.vlgmr.msra.gmra.mxu0 %vm118_vm0, %v2895_v4  ;;  %2478 = vmatmul.msk.f32.vlgmr.msra.gmra.mxu1 %vm118_vm0, %v75_v5  ;;  %v107_v21 = vld [vmem:[%s4991_s3 + $0x18] sm:$0xff]  ;;  %v96_v24 = vld [vmem:[%s4992_s1 + $0x1c0] sm:$0xff]  ;;  %v81_v26 = vld [vmem:[%s4992_s1 + $0x148] sm:$0xff] }
   0xa   :  { %532 = vmatpush.msrb.mxu1 %v111_v6  ;;  %2643 = vmatpush.msra.mxu2 %v104_v3  ;;  %v97_v27 = vld [vmem:[%s4992_s1 + $0x1c8] sm:$0xff]  ;;  %v3009_v28 = vld [vmem:[%s4992_s1 + $0x38] sm:$0xff]  ;;  %v82_v29 = vld [vmem:[%s4992_s1 + $0x150] sm:$0xff] }
   0xb   :  { %2494 = vmatmul.msk.f32.vlgmr.msra.gmra.mxu2 %vm118_vm0, %v91_v7  ;;  %v98_v30 = vld [vmem:[%s4992_s1 + $0x1d0] sm:$0xff]  ;;  %v3024_v31 = vld [vmem:[%s4992_s1 + $0x40] sm:$0xff]  ;;  %v83_v32 = vld [vmem:[%s4992_s1 + $0x158] sm:$0xff] }
   0xc   :  { %533 = vmatpush.msrb.mxu1 %v109_v8  ;;  %v99_v33 = vld [vmem:[%s4992_s1 + $0x1d8] sm:$0xff]  ;;  %v105_v34 = vld [vmem:[%s4991_s3 + $0x8] sm:$0xff]  ;;  %v999_v36 = vld [vmem:[%s4993_s5 + $0x70] sm:$0xff] }
   0xd   :  { %v1000_v35 = vld [vmem:[%s4993_s5 + $0x78] sm:$0xff]  ;;  %v3048_v37 = vld [vmem:[%s4992_s1 + $0x48] sm:$0xff]  ;;  %v84_v38 = vld [vmem:[%s4992_s1 + $0x160] sm:$0xff] }
   0xe   :  { %534 = vmatpush.msrb.mxu1 %v107_v21  ;;  %1005 = vmatpush.msrb.mxu2 %v1000_v35  ;;  %v100_v39 = vld [vmem:[%s4992_s1 + $0x1e0] sm:$0xff]  ;;  %v998_v40 = vld [vmem:[%s4993_s5 + $0x68] sm:$0xff]  ;;  %v996_v42 = vld [vmem:[%s4993_s5 + $0x58] sm:$0xff] }
   0xf   :  { %v997_v41 = vld [vmem:[%s4993_s5 + $0x60] sm:$0xff]  ;;  %v995_v43 = vld [vmem:[%s4993_s5 + $0x50] sm:$0xff]  ;;  %v85_v45 = vld [vmem:[%s4992_s1 + $0x168] sm:$0xff] }
  0x10   :  { %535 = vmatpush.msrb.mxu1 %v105_v34  ;;  %1006 = vmatpush.msrb.mxu2 %v999_v36  ;;  %v3075_v44 = vld [vmem:[%s4992_s1 + $0x50] sm:$0xff]  ;;  %v101_v46 = vld [vmem:[%s4992_s1 + $0x1e8] sm:$0xff]  ;;  %v993_v48 = vld [vmem:[%s4993_s5 + $0x40] sm:$0xff] }
  0x11   :  { %2444 = vmatmul.msk.f32.gmra.mxu0 %vm118_vm0, %v2916_v9  ;;  %2479 = vmatmul.msk.f32.gmra.mxu1 %vm118_vm0, %v76_v10  ;;  %v994_v47 = vld [vmem:[%s4993_s5 + $0x48] sm:$0xff]  ;;  %v992_v49 = vld [vmem:[%s4993_s5 + $0x38] sm:$0xff]  ;;  %v991_v50 = vld [vmem:[%s4993_s5 + $0x30] sm:$0xff] }
  0x12   :  { %1007 = vmatpush.msrb.mxu2 %v998_v40  ;;  %v3102_v51 = vld [vmem:[%s4992_s1 + $0x58] sm:$0xff]  ;;  %v86_v52 = vld [vmem:[%s4992_s1 + $0x170] sm:$0xff]  ;;  %v990_v54 = vld [vmem:[%s4993_s5 + $0x28] sm:$0xff] }
  0x13   :  { %2495 = vmatmul.msk.f32.gmra.mxu2 %vm118_vm0, %v92_v11  ;;  %v102_v53 = vld [vmem:[%s4992_s1 + $0x1f0] sm:$0xff]  ;;  %v989_v55 = vld [vmem:[%s4993_s5 + $0x20] sm:$0xff]  ;;  %v1325_v57 = vld [vmem:[%s4995_s0 + $0x178] sm:$0xff] }
  0x14   :  { %1008 = vmatpush.msrb.mxu2 %v997_v41  ;;  %v1342_v56 = vld [vmem:[%s4994_s2] sm:$0x7]  ;;  %v1893_v58 = vld [vmem:[%s4996_s7 + $0x78] sm:$0xff]  ;;  %v987_v62 = vld [vmem:[%s4993_s5 + $0x10] sm:$0xff] }
  0x15   :  { %2645 = vmatpush.msk.msra.mxu3 %vm1600_vm1, %v1342_v56  ;;  %v988_v59 = vld [vmem:[%s4993_s5 + $0x18] sm:$0xff]  ;;  %2571 = vmatpush.msk.msrb.mxu0 %vm1600_vm1, %v1342_v56  ;;  %v3138_v60 = vld [vmem:[%s4992_s1 + $0x60] sm:$0xff]  ;;  %v986_v0 = vld [vmem:[%s4993_s5 + $0x8] sm:$0xff] }
  0x16   :  { %1009 = vmatpush.msrb.mxu2 %v996_v42  ;;  %2619 = vmatmul.msk.f32.vlgmr.msra.gmra.mxu3 %vm1407_vm2, %v1325_v57  ;;  %v87_v61 = vld [vmem:[%s4992_s1 + $0x178] sm:$0xff]  ;;  %v985_v1 = vld [vmem:[%s4993_s5] sm:$0xff]  ;;  %v3167_v3 = vld [vmem:[%s4992_s1 + $0x68] sm:$0xff] }
  0x17   :  { %1898 = vmatpush.msrb.mxu3 %v1893_v58  ;;  %v103_v63 = vld [vmem:[%s4992_s1 + $0x1f8] sm:$0xff]  ;;  %v1326_v2 = vld [vmem:[%s4995_s0 + $0x180] sm:$0xff]  ;;  %v1892_v6 = vld [vmem:[%s4996_s7 + $0x70] sm:$0xff] }
  0x18   :  { %1010 = vmatpush.msrb.mxu2 %v995_v43  ;;  %v88_v5 = vld [vmem:[%s4992_s1 + $0x180] sm:$0xff]  ;;  %v1327_v7 = vld [vmem:[%s4995_s0 + $0x188] sm:$0xff]  ;;  %v3185_v8 = vld [vmem:[%s4992_s1 + $0x70] sm:$0xff] }
  0x19   :  { %2445 = vmatmul.msk.f32.gmra.mxu0 %vm118_vm0, %v2931_v12  ;;  %2480 = vmatmul.msk.f32.gmra.mxu1 %vm118_vm0, %v77_v13  ;;  %v89_v10 = vld [vmem:[%s4992_s1 + $0x188] sm:$0xff]  ;;  %v1328_v13 = vld [vmem:[%s4995_s0 + $0x190] sm:$0xff]  ;;  %v1329_v21 = vld [vmem:[%s4995_s0 + $0x198] sm:$0xff] }
  0x1a   :  { %1011 = vmatpush.msrb.mxu2 %v994_v47  ;;  %1899 = vmatpush.msrb.mxu3 %v1892_v6  ;;  %v1891_v11 = vld [vmem:[%s4996_s7 + $0x68] sm:$0xff]  ;;  %v1888_v41 = vld [vmem:[%s4996_s7 + $0x50] sm:$0xff]  ;;  %v1885_v6 = vld [vmem:[%s4996_s7 + $0x38] sm:$0xff] }
  0x1b   :  { %2496 = vmatmul.msk.f32.gmra.mxu2 %vm118_vm0, %v93_v14  ;;  %v3203_v14 = vld [vmem:[%s4992_s1 + $0x78] sm:$0xff]  ;;  %v1331_v42 = vld [vmem:[%s4995_s0 + $0x1a8] sm:$0xff] }
  0x1c   :  { %1012 = vmatpush.msrb.mxu2 %v993_v48  ;;  %1900 = vmatpush.msrb.mxu3 %v1891_v11 }
  0x1e   :  { %1013 = vmatpush.msrb.mxu2 %v992_v49  ;;  %2620 = vmatmul.msk.f32.gmra.mxu3 %vm1407_vm2, %v1326_v2 }
  0x20   :  { %1014 = vmatpush.msrb.mxu2 %v991_v50  ;;  %v1887_v50 = vld [vmem:[%s4996_s7 + $0x48] sm:$0xff] }
  0x21   :  { %2446 = vmatmul.msk.f32.gmra.mxu0 %vm118_vm0, %v2946_v15  ;;  %2481 = vmatmul.msk.f32.gmra.mxu1 %vm118_vm0, %v78_v16  ;;  %v90_v16 = vld [vmem:[%s4992_s1 + $0x190] sm:$0xff] }
  0x22   :  { %1015 = vmatpush.msrb.mxu2 %v990_v54 }
  0x23   :  { %2497 = vmatmul.msk.f32.gmra.mxu2 %vm118_vm0, %v94_v17  ;;  %v3211_v17 = vld [vmem:[%s4997_s4] sm:$0x3] }
  0x24   :  { %1016 = vmatpush.msrb.mxu2 %v989_v55 }
  0x26   :  { %1017 = vmatpush.msrb.mxu2 %v988_v59  ;;  %2621 = vmatmul.msk.f32.gmra.mxu3 %vm1407_vm2, %v1327_v7  ;;  %v1886_v59 = vld [vmem:[%s4996_s7 + $0x40] sm:$0xff] }
  0x27   :  { %v1334_v7 = vld [vmem:[%s4995_s0 + $0x1c0] sm:$0xff] }
  0x28   :  { %1018 = vmatpush.msrb.mxu2 %v987_v62 }
  0x29   :  { %2447 = vmatmul.msk.f32.gmra.mxu0 %vm118_vm0, %v2961_v18  ;;  %2482 = vmatmul.msk.f32.gmra.mxu1 %vm118_vm0, %v79_v19  ;;  %v3217_v19 = vperm.slane %v3211_v17, 0 }
  0x2a   :  { %1019 = vmatpush.msrb.mxu2 %v986_v0 }
  0x2b   :  { %2498 = vmatmul.msk.f32.gmra.mxu2 %vm118_vm0, %v95_v20  ;;  %v1890_v20 = vld [vmem:[%s4996_s7 + $0x60] sm:$0xff] }
  0x2c   :  { %1020 = vmatpush.msrb.mxu2 %v985_v1  ;;  %1901 = vmatpush.msrb.mxu3 %v1890_v20 }
  0x2e   :  { %2644 = vmatpush.msk.msra.mxu2 %vm1600_vm1, %v1342_v56  ;;  %2622 = vmatmul.msk.f32.gmra.mxu3 %vm1407_vm2, %v1328_v13 }
  0x31   :  { %2448 = vmatmul.msk.f32.gmra.mxu0 %vm118_vm0, %v2979_v22  ;;  %2483 = vmatmul.msk.f32.gmra.mxu1 %vm118_vm0, %v80_v23 }
  0x33   :  { %2499 = vmatmul.msk.f32.gmra.mxu2 %vm118_vm0, %v96_v24 }
  0x36   :  { %2623 = vmatmul.msk.f32.gmra.mxu3 %vm1407_vm2, %v1329_v21  ;;  %v1884_v21 = vld [vmem:[%s4996_s7 + $0x30] sm:$0xff] }
  0x39   :  { %2449 = vmatmul.msk.f32.gmra.mxu0 %vm118_vm0, %v2994_v25  ;;  %2484 = vmatmul.msk.f32.gmra.mxu1 %vm118_vm0, %v81_v26  ;;  %v3231_v26 = vld [vmem:[%s4992_s1 + $0x80] sm:$0xff] }
  0x3b   :  { %2500 = vmatmul.msk.f32.gmra.mxu2 %vm118_vm0, %v97_v27 }
  0x41   :  { %2450 = vmatmul.msk.f32.gmra.mxu0 %vm118_vm0, %v3009_v28  ;;  %2485 = vmatmul.msk.f32.gmra.mxu1 %vm118_vm0, %v82_v29 }
  0x43   :  { %2501 = vmatmul.msk.f32.gmra.mxu2 %vm118_vm0, %v98_v30 }
  0x49   :  { %2451 = vmatmul.msk.f32.gmra.mxu0 %vm118_vm0, %v3024_v31  ;;  %2486 = vmatmul.msk.f32.gmra.mxu1 %vm118_vm0, %v83_v32  ;;  %v1889_v32 = vld [vmem:[%s4996_s7 + $0x58] sm:$0xff] }
  0x4a   :  { %1902 = vmatpush.msrb.mxu3 %v1889_v32 }
  0x4b   :  { %2502 = vmatmul.msk.f32.gmra.mxu2 %vm118_vm0, %v99_v33  ;;  %v1330_v33 = vld [vmem:[%s4995_s0 + $0x1a0] sm:$0xff] }
  0x4c   :  { %2624 = vmatmul.msk.f32.gmra.mxu3 %vm1407_vm2, %v1330_v33 }
  0x4d   :  { %1903 = vmatpush.msrb.mxu3 %v1888_v41 }
  0x4f   :  { %1904 = vmatpush.msrb.mxu3 %v1887_v50  ;;  %v1337_v50 = vld [vmem:[%s4995_s0 + $0x1d8] sm:$0xff] }
  0x51   :  { %2452 = vmatmul.msk.f32.gmra.mxu0 %vm118_vm0, %v3048_v37  ;;  %2487 = vmatmul.msk.f32.gmra.mxu1 %vm118_vm0, %v84_v38 }
  0x52   :  { %1905 = vmatpush.msrb.mxu3 %v1886_v59 }
  0x53   :  { %2503 = vmatmul.msk.f32.gmra.mxu2 %vm118_vm0, %v100_v39 }
  0x54   :  { %2625 = vmatmul.msk.f32.gmra.mxu3 %vm1407_vm2, %v1331_v42 }
  0x55   :  { %1906 = vmatpush.msrb.mxu3 %v1885_v6 }
  0x57   :  { %1907 = vmatpush.msrb.mxu3 %v1884_v21 }
  0x59   :  { %2453 = vmatmul.msk.f32.gmra.mxu0 %vm118_vm0, %v3075_v44  ;;  %2488 = vmatmul.msk.f32.gmra.mxu1 %vm118_vm0, %v85_v45 }
  0x5b   :  { %2504 = vmatmul.msk.f32.gmra.mxu2 %vm118_vm0, %v101_v46 }
  0x61   :  { %2454 = vmatmul.msk.f32.gmra.mxu0 %vm118_vm0, %v3102_v51  ;;  %2489 = vmatmul.msk.f32.gmra.mxu1 %vm118_vm0, %v86_v52  ;;  %v1332_v52 = vld [vmem:[%s4995_s0 + $0x1b0] sm:$0xff] }
  0x62   :  { %2626 = vmatmul.msk.f32.gmra.mxu3 %vm1407_vm2, %v1332_v52 }
  0x63   :  { %2505 = vmatmul.msk.f32.gmra.mxu2 %vm118_vm0, %v102_v53 }
  0x69   :  { %2455 = vmatmul.msk.f32.gmra.mxu0 %vm118_vm0, %v3138_v60  ;;  %2490 = vmatmul.msk.f32.gmra.mxu1 %vm118_vm0, %v87_v61  ;;  %v1333_v61 = vld [vmem:[%s4995_s0 + $0x1b8] sm:$0xff] }
  0x6a   :  { %2627 = vmatmul.msk.f32.gmra.mxu3 %vm1407_vm2, %v1333_v61  ;;  %v1881_v61 = vld [vmem:[%s4996_s7 + $0x18] sm:$0xff] }
  0x6b   :  { %2506 = vmatmul.msk.f32.gmra.mxu2 %vm118_vm0, %v103_v63 }
  0x71   :  { %2456 = vmatmul.msk.f32.gmra.mxu0 %vm118_vm0, %v3167_v3  ;;  %2491 = vmatmul.msk.f32.gmra.mxu1 %vm118_vm0, %v88_v5 }
  0x72   :  { %2628 = vmatmul.msk.f32.gmra.mxu3 %vm1407_vm2, %v1334_v7 }
  0x79   :  { %2457 = vmatmul.msk.f32.gmra.mxu0 %vm118_vm0, %v3185_v8  ;;  %2492 = vmatmul.msk.f32.gmra.mxu1 %vm118_vm0, %v89_v10 }
  0x81   :  { %2458 = vmatmul.msk.f32.gmra.mxu0 %vm118_vm0, %v3203_v14  ;;  %2493 = vmatmul.msk.f32.gmra.mxu1 %vm118_vm0, %v90_v16 }
  0x86   :  { %v328_v23 = vpop.f32.mrf.mxu0  ;;  %v3226_v24 = vpop.f32.mrf.mxu1 }
  0x87   :  { %v329_v27 = vadd.f32 %v328_v23, %v3217_v19  ;;  %v1335_v23 = vld [vmem:[%s4995_s0 + $0x1c8] sm:$0xff] }
  0x88   :  { %2629 = vmatmul.msk.f32.gmra.mxu3 %vm1407_vm2, %v1335_v23 }
  0x89   :  { %v729_v29 = vmul.f32 0.01, %v329_v27  ;;  %2459 = vmatmul.msk.f32.gmra.mxu0 %vm118_vm0, %v3231_v26  ;;  %2507 = vmatmul.msk.f32.vlgmr.msrb.gmra.mxu1 %vm118_vm0, %v2895_v4  ;;  %v3250_v4 = vld [vmem:[%s4992_s1 + $0x88] sm:$0xff] }
  0x8b   :  { %v857_v30 = vmax.f32 %v329_v27, %v729_v29 }
  0x8d   :  { %1021 = vmatmul.f32.vlgmr.msrb.gmra.mxu2 %v857_v30 }
  0x8e   :  { %v331_v34 = vpop.f32.mrf.mxu0  ;;  %v3245_v35 = vpop.f32.mrf.mxu1 }
  0x8f   :  { %v332_v36 = vadd.f32 %v331_v34, %v3217_v19  ;;  %v3253_v38 = vpop.f32.mrf.mxu2 }
  0x91   :  { %2460 = vmatmul.msk.f32.gmra.mxu0 %vm118_vm0, %v3250_v4  ;;  %2508 = vmatmul.msk.f32.gmra.mxu1 %vm118_vm0, %v2916_v9  ;;  %v731_v39 = vmul.f32 0.01, %v332_v36  ;;  %v3271_v9 = vld [vmem:[%s4992_s1 + $0x90] sm:$0xff] }
  0x93   :  { %v859_v40 = vmax.f32 %v332_v36, %v731_v39  ;;  %v1883_v36 = vld [vmem:[%s4996_s7 + $0x28] sm:$0xff]  ;;  %v1336_v39 = vld [vmem:[%s4995_s0 + $0x1d0] sm:$0xff] }
  0x94   :  { %1908 = vmatpush.msrb.mxu3 %v1883_v36 }
  0x95   :  { %1024 = vmatmul.f32.gmra.mxu2 %v859_v40  ;;  %2630 = vmatmul.msk.f32.gmra.mxu3 %vm1407_vm2, %v1336_v39 }
  0x96   :  { %v334_v43 = vpop.f32.mrf.mxu0  ;;  %v3266_v45 = vpop.f32.mrf.mxu1 }
  0x97   :  { %v335_v46 = vadd.f32 %v334_v43, %v3217_v19  ;;  %v3274_v47 = vpop.f32.mrf.mxu2 }
  0x99   :  { %2461 = vmatmul.msk.f32.gmra.mxu0 %vm118_vm0, %v3271_v9  ;;  %2509 = vmatmul.msk.f32.gmra.mxu1 %vm118_vm0, %v2931_v12  ;;  %v733_v48 = vmul.f32 0.01, %v335_v46  ;;  %v3292_v12 = vld [vmem:[%s4992_s1 + $0x98] sm:$0xff] }
  0x9b   :  { %v861_v49 = vmax.f32 %v335_v46, %v733_v48 }
  0x9d   :  { %1027 = vmatmul.f32.gmra.mxu2 %v861_v49  ;;  %v1882_v49 = vld [vmem:[%s4996_s7 + $0x20] sm:$0xff]  ;;  %2631 = vmatmul.msk.f32.gmra.mxu3 %vm1407_vm2, %v1337_v50 }
  0x9e   :  { %v337_v53 = vpop.f32.mrf.mxu0  ;;  %v3287_v54 = vpop.f32.mrf.mxu1  ;;  %1909 = vmatpush.msrb.mxu3 %v1882_v49  ;;  %v1341_v49 = vld [vmem:[%s4995_s0 + $0x1f8] sm:$0xff]  ;;  %v1878_v50 = vld [vmem:[%s4996_s7] sm:$0xff] }
  0x9f   :  { %v338_v55 = vadd.f32 %v337_v53, %v3217_v19  ;;  %v3299_v57 = vpop.f32.mrf.mxu2 }
  0xa0   :  { %1910 = vmatpush.msrb.mxu3 %v1881_v61  ;;  %v3482_v61 = vpop.f32.mrf.mxu3 }
  0xa1   :  { %2462 = vmatmul.msk.f32.gmra.mxu0 %vm118_vm0, %v3292_v12  ;;  %2510 = vmatmul.msk.f32.gmra.mxu1 %vm118_vm0, %v2946_v15  ;;  %v735_v56 = vmul.f32 0.01, %v338_v55  ;;  %v3313_v15 = vld [vmem:[%s4992_s1 + $0xa0] sm:$0xff]  ;;  %5007 = vst [vmem:[#allocation5_spill] sm:$0xff] %v3482_v61 }
  0xa3   :  { %v863_v58 = vmax.f32 %v338_v55, %v735_v56 }
  0xa5   :  { %1030 = vmatmul.f32.gmra.mxu2 %v863_v58 }
  0xa6   :  { %v340_v62 = vpop.f32.mrf.mxu0  ;;  %v3308_v63 = vpop.f32.mrf.mxu1 }
  0xa7   :  { %v341_v0 = vadd.f32 %v340_v62, %v3217_v19  ;;  %v3320_v5 = vpop.f32.mrf.mxu2  ;;  %v1338_v62 = vld [vmem:[%s4995_s0 + $0x1e0] sm:$0xff] }
  0xa8   :  { %2632 = vmatmul.msk.f32.gmra.mxu3 %vm1407_vm2, %v1338_v62 }
  0xa9   :  { %2463 = vmatmul.msk.f32.gmra.mxu0 %vm118_vm0, %v3313_v15  ;;  %2511 = vmatmul.msk.f32.gmra.mxu1 %vm118_vm0, %v2961_v18  ;;  %v737_v1 = vmul.f32 0.01, %v341_v0  ;;  %v3334_v18 = vld [vmem:[%s4992_s1 + $0xa8] sm:$0xff] }
  0xab   :  { %v865_v2 = vmax.f32 %v341_v0, %v737_v1 }
  0xad   :  { %1033 = vmatmul.f32.gmra.mxu2 %v865_v2 }
  0xae   :  { %v343_v10 = vpop.f32.mrf.mxu0  ;;  %v3329_v11 = vpop.f32.mrf.mxu1 }
  0xaf   :  { %v344_v13 = vadd.f32 %v343_v10, %v3217_v19  ;;  %v3347_v27 = vpop.f32.mrf.mxu2 }
  0xb1   :  { %2464 = vmatmul.msk.f32.gmra.mxu0 %vm118_vm0, %v3334_v18  ;;  %2512 = vmatmul.msk.f32.gmra.mxu1 %vm118_vm0, %v2979_v22  ;;  %v739_v16 = vmul.f32 0.01, %v344_v13  ;;  %v3355_v22 = vld [vmem:[%s4992_s1 + $0xb0] sm:$0xff] }
  0xb3   :  { %v867_v20 = vmax.f32 %v344_v13, %v739_v16  ;;  %v1880_v13 = vld [vmem:[%s4996_s7 + $0x10] sm:$0xff]  ;;  %v1339_v16 = vld [vmem:[%s4995_s0 + $0x1e8] sm:$0xff] }
  0xb4   :  { %1911 = vmatpush.msrb.mxu3 %v1880_v13 }
  0xb5   :  { %1036 = vmatmul.f32.gmra.mxu2 %v867_v20  ;;  %2633 = vmatmul.msk.f32.gmra.mxu3 %vm1407_vm2, %v1339_v16  ;;  %v3496_v16 = vpop.f32.mrf.mxu3 }
  0xb6   :  { %v346_v29 = vpop.f32.mrf.mxu0  ;;  %v3350_v30 = vpop.f32.mrf.mxu1  ;;  %5008 = vst [vmem:[#allocation6_spill] sm:$0xff] %v3496_v16 }
  0xb7   :  { %v347_v32 = vadd.f32 %v346_v29, %v3217_v19  ;;  %v3377_v43 = vpop.f32.mrf.mxu2 }
  0xb9   :  { %2465 = vmatmul.msk.f32.gmra.mxu0 %vm118_vm0, %v3355_v22  ;;  %2513 = vmatmul.msk.f32.gmra.mxu1 %vm118_vm0, %v2994_v25  ;;  %v741_v33 = vmul.f32 0.01, %v347_v32  ;;  %v3374_v25 = vld [vmem:[%s4992_s1 + $0xb8] sm:$0xff] }
  0xbb   :  { %v869_v34 = vmax.f32 %v347_v32, %v741_v33  ;;  %v1879_v33 = vld [vmem:[%s4996_s7 + $0x8] sm:$0xff] }
  0xbc   :  { %1912 = vmatpush.msrb.mxu3 %v1879_v33  ;;  %v3509_v33 = vld [vmem:[%s4992_s1 + $0xf0] sm:$0xff] }
  0xbd   :  { %1039 = vmatmul.f32.gmra.mxu2 %v869_v34  ;;  %v1340_v34 = vld [vmem:[%s4995_s0 + $0x1f0] sm:$0xff] }
  0xbe   :  { %v349_v40 = vpop.f32.mrf.mxu0  ;;  %v3369_v41 = vpop.f32.mrf.mxu1  ;;  %2634 = vmatmul.msk.f32.gmra.mxu3 %vm1407_vm2, %v1340_v34 }
  0xbf   :  { %v350_v42 = vadd.f32 %v349_v40, %v3217_v19  ;;  %v3402_v58 = vpop.f32.mrf.mxu2  ;;  %1913 = vmatpush.msrb.mxu3 %v1878_v50  ;;  %v3525_v50 = vld [vmem:[%s4992_s1 + $0xf8] sm:$0xff] }
  0xc1   :  { %2466 = vmatmul.msk.f32.gmra.mxu0 %vm118_vm0, %v3374_v25  ;;  %2514 = vmatmul.msk.f32.gmra.mxu1 %vm118_vm0, %v3009_v28  ;;  %v743_v46 = vmul.f32 0.01, %v350_v42  ;;  %v3395_v28 = vld [vmem:[%s4992_s1 + $0xc0] sm:$0xff] }
  0xc3   :  { %v871_v48 = vmax.f32 %v350_v42, %v743_v46 }
  0xc5   :  { %1042 = vmatmul.f32.gmra.mxu2 %v871_v48 }
  0xc6   :  { %v352_v52 = vpop.f32.mrf.mxu0  ;;  %v3390_v53 = vpop.f32.mrf.mxu1  ;;  %2635 = vmatmul.msk.f32.gmra.mxu3 %vm1407_vm2, %v1341_v49 }
  0xc7   :  { %v353_v55 = vadd.f32 %v352_v52, %v3217_v19  ;;  %v3423_v10 = vpop.f32.mrf.mxu2 }
  0xc8   :  { %5004 = vst [vmem:[#allocation2_spill] sm:$0xff] %v3423_v10 }
  0xc9   :  { %2467 = vmatmul.msk.f32.gmra.mxu0 %vm118_vm0, %v3395_v28  ;;  %2515 = vmatmul.msk.f32.gmra.mxu1 %vm118_vm0, %v3024_v31  ;;  %v745_v56 = vmul.f32 0.01, %v353_v55  ;;  %v3416_v31 = vld [vmem:[%s4992_s1 + $0xc8] sm:$0xff] }
  0xcb   :  { %v873_v59 = vmax.f32 %v353_v55, %v745_v56  ;;  %v3477_v56 = vld [vmem:[%s4992_s1 + $0xe0] sm:$0xff] }
  0xcd   :  { %1045 = vmatmul.f32.gmra.mxu2 %v873_v59 }
  0xce   :  { %v355_v0 = vpop.f32.mrf.mxu0  ;;  %v3411_v1 = vpop.f32.mrf.mxu1 }
  0xcf   :  { %v356_v2 = vadd.f32 %v355_v0, %v3217_v19  ;;  %v3450_v36 = vpop.f32.mrf.mxu2 }
  0xd0   :  { %5005 = vst [vmem:[#allocation3_spill] sm:$0xff] %v3450_v36 }
  0xd1   :  { %2468 = vmatmul.msk.f32.gmra.mxu0 %vm118_vm0, %v3416_v31  ;;  %2516 = vmatmul.msk.f32.gmra.mxu1 %vm118_vm0, %v3048_v37  ;;  %v747_v6 = vmul.f32 0.01, %v356_v2  ;;  %v3437_v37 = vld [vmem:[%s4992_s1 + $0xd0] sm:$0xff] }
  0xd3   :  { %v875_v7 = vmax.f32 %v356_v2, %v747_v6 }
  0xd5   :  { %1048 = vmatmul.f32.gmra.mxu2 %v875_v7  ;;  %v3493_v7 = vld [vmem:[%s4992_s1 + $0xe8] sm:$0xff] }
  0xd6   :  { %v358_v20 = vpop.f32.mrf.mxu0  ;;  %v3432_v21 = vpop.f32.mrf.mxu1 }
  0xd7   :  { %v359_v23 = vadd.f32 %v358_v20, %v3217_v19  ;;  %v3480_v59 = vpop.f32.mrf.mxu2 }
  0xd8   :  { %5006 = vst [vmem:[#allocation4_spill] sm:$0xff] %v3480_v59 }
  0xd9   :  { %2469 = vmatmul.msk.f32.gmra.mxu0 %vm118_vm0, %v3437_v37  ;;  %2517 = vmatmul.msk.f32.gmra.mxu1 %vm118_vm0, %v3075_v44  ;;  %v749_v29 = vmul.f32 0.01, %v359_v23  ;;  %v3458_v44 = vld [vmem:[%s4992_s1 + $0xd8] sm:$0xff] }
  0xdb   :  { %v877_v32 = vmax.f32 %v359_v23, %v749_v29 }
  0xdd   :  { %1051 = vmatmul.f32.gmra.mxu2 %v877_v32 }
  0xde   :  { %v361_v39 = vpop.f32.mrf.mxu0  ;;  %v3453_v40 = vpop.f32.mrf.mxu1 }
  0xdf   :  { %v362_v42 = vadd.f32 %v361_v39, %v3217_v19 }
  0xe1   :  { %v751_v46 = vmul.f32 0.01, %v362_v42  ;;  %2470 = vmatmul.msk.f32.gmra.mxu0 %vm118_vm0, %v3458_v44  ;;  %2518 = vmatmul.msk.f32.gmra.mxu1 %vm118_vm0, %v3102_v51 }
  0xe3   :  { %v879_v48 = vmax.f32 %v362_v42, %v751_v46 }
  0xe5   :  { %1054 = vmatmul.f32.gmra.mxu2 %v879_v48 }
  0xe6   :  { %v364_v52 = vpop.f32.mrf.mxu0  ;;  %v3472_v55 = vpop.f32.mrf.mxu1 }
  0xe7   :  { %v365_v51 = vadd.f32 %v364_v52, %v3217_v19 }
  0xe9   :  { %v753_v62 = vmul.f32 0.01, %v365_v51  ;;  %2471 = vmatmul.msk.f32.gmra.mxu0 %vm118_vm0, %v3477_v56  ;;  %2519 = vmatmul.msk.f32.gmra.mxu1 %vm118_vm0, %v3138_v60  ;;  %v3502_v60 = vpop.f32.mrf.mxu2 }
  0xea   :  { %5009 = vst [vmem:[#allocation7_spill] sm:$0xff] %v3502_v60 }
  0xeb   :  { %v881_v0 = vmax.f32 %v365_v51, %v753_v62  ;;  %v3533_v62 = vperm.slane %v3211_v17, 1 }
  0xed   :  { %1057 = vmatmul.f32.gmra.mxu2 %v881_v0 }
  0xee   :  { %v367_v2 = vpop.f32.mrf.mxu0  ;;  %v3488_v6 = vpop.f32.mrf.mxu1 }
  0xef   :  { %v368_v13 = vadd.f32 %v367_v2, %v3217_v19 }
  0xf1   :  { %v755_v20 = vmul.f32 0.01, %v368_v13  ;;  %2472 = vmatmul.msk.f32.gmra.mxu0 %vm118_vm0, %v3493_v7  ;;  %2520 = vmatmul.msk.f32.gmra.mxu1 %vm118_vm0, %v3167_v3  ;;  %v3516_v3 = vpop.f32.mrf.mxu3  ;;  %v3518_v46 = vpop.f32.mrf.mxu2 }
  0xf2   :  { %5010 = vst [vmem:[#allocation8_spill] sm:$0xff] %v3516_v3 }
  0xf3   :  { %v883_v23 = vmax.f32 %v368_v13, %v755_v20  ;;  %5011 = vst [vmem:[#allocation9_spill] sm:$0xff] %v3518_v46 }
  0xf5   :  { %1060 = vmatmul.f32.gmra.mxu2 %v883_v23  ;;  %v3542_v23 = vld [vmem:[%s4992_s1 + $0x100] sm:$0xff] }
  0xf6   :  { %v370_v29 = vpop.f32.mrf.mxu0  ;;  %v3504_v32 = vpop.f32.mrf.mxu1 }
  0xf7   :  { %v371_v34 = vadd.f32 %v370_v29, %v3217_v19 }
  0xf9   :  { %v757_v39 = vmul.f32 0.01, %v371_v34  ;;  %2473 = vmatmul.msk.f32.gmra.mxu0 %vm118_vm0, %v3509_v33  ;;  %2521 = vmatmul.msk.f32.gmra.mxu1 %vm118_vm0, %v3185_v8  ;;  %v3535_v0 = vpop.f32.mrf.mxu3  ;;  %v3537_v2 = vpop.f32.mrf.mxu2 }
  0xfa   :  { %5012 = vst [vmem:[#allocation10_spill] sm:$0xff] %v3535_v0 }
  0xfb   :  { %v885_v42 = vmax.f32 %v371_v34, %v757_v39  ;;  %5013 = vst [vmem:[#allocation11_spill] sm:$0xff] %v3537_v2  ;;  %v3773_v2 = vld [vmem:[%s5001_s10] ss:$0 sm:$0xff] }
  0xfd   :  { %1063 = vmatmul.f32.gmra.mxu2 %v885_v42 }
  0xfe   :  { %v373_v48 = vpop.f32.mrf.mxu0  ;;  %v3520_v49 = vpop.f32.mrf.mxu1 }
  0xff   :  { %v374_v52 = vadd.f32 %v373_v48, %v3217_v19 }
 0x101   :  { %v759_v51 = vmul.f32 0.01, %v374_v52  ;;  %2474 = vmatmul.msk.f32.gmra.mxu0 %vm118_vm0, %v3525_v50  ;;  %2522 = vmatmul.msk.f32.gmra.mxu1 %vm118_vm0, %v3203_v14  ;;  %v3550_v48 = vpop.f32.mrf.mxu3 }
 0x102   :  { %5014 = vst [vmem:[#allocation12_spill] sm:$0xff] %v3550_v48 }
 0x103   :  { %v887_v8 = vmax.f32 %v374_v52, %v759_v51 }
 0x105   :  { %1066 = vmatmul.f32.gmra.mxu2 %v887_v8  ;;  %v3555_v8 = vld [vmem:[%s4992_s1 + $0x108] sm:$0xff] }
 0x106   :  { %v376_v13 = vpop.f32.mrf.mxu0  ;;  %v537_v20 = vpop.f32.mrf.mxu1 }
 0x107   :  { %v377_v29 = vadd.f32 %v376_v13, %v3217_v19  ;;  %v538_v14 = vadd.f32 %v537_v20, %v3533_v62 }
 0x109   :  { %v761_v34 = vmul.f32 0.01, %v377_v29  ;;  %v730_v39 = vmul.f32 0.01, %v538_v14  ;;  %2475 = vmatmul.msk.f32.gmra.mxu0 %vm118_vm0, %v3542_v23  ;;  %2523 = vmatmul.msk.f32.gmra.mxu1 %vm118_vm0, %v3231_v26  ;;  %v3572_v48 = vpop.f32.mrf.mxu3 }
 0x10a   :  { %5015 = vst [vmem:[#allocation13_spill] sm:$0xff] %v3572_v48 }
 0x10b   :  { %v889_v17 = vmax.f32 %v377_v29, %v761_v34  ;;  %v858_v42 = vmax.f32 %v538_v14, %v730_v39 }
 0x10d   :  { %1069 = vmatmul.f32.gmra.mxu2 %v889_v17  ;;  %1914 = vmatmul.f32.vlgmr.msrb.gmra.mxu3 %v858_v42  ;;  %v3568_v42 = vld [vmem:[%s4992_s1 + $0x110] sm:$0xff] }
 0x10e   :  { %v379_v52 = vpop.f32.mrf.mxu0  ;;  %v540_v51 = vpop.f32.mrf.mxu1 }
 0x10f   :  { %v380_v13 = vadd.f32 %v379_v52, %v3217_v19  ;;  %v541_v20 = vadd.f32 %v540_v51, %v3533_v62 }
 0x110   :  { %v3559_v0 = vpop.f32.mrf.mxu2 }
 0x111   :  { %v763_v26 = vmul.f32 0.01, %v380_v13  ;;  %2476 = vmatmul.msk.f32.gmra.mxu0 %vm118_vm0, %v3555_v8  ;;  %2524 = vmatmul.msk.f32.gmra.mxu1 %vm118_vm0, %v3250_v4  ;;  %v732_v29 = vmul.f32 0.01, %v541_v20 }
 0x113   :  { %v891_v14 = vmax.f32 %v380_v13, %v763_v26  ;;  %v860_v34 = vmax.f32 %v541_v20, %v732_v29 }
 0x115   :  { %1072 = vmatmul.f32.gmra.mxu2 %v891_v14  ;;  %1917 = vmatmul.f32.gmra.mxu3 %v860_v34  ;;  %v1278_v34 = vld [vmem:[%s4995_s0] sm:$0xff] }
 0x116   :  { %v382_v39 = vpop.f32.mrf.mxu0  ;;  %v543_v17 = vpop.f32.mrf.mxu1 }
 0x117   :  { %v383_v52 = vadd.f32 %v382_v39, %v3217_v19  ;;  %v544_v51 = vadd.f32 %v543_v17, %v3533_v62 }
 0x118   :  { %v3574_v3 = vpop.f32.mrf.mxu2 }
 0x119   :  { %v765_v4 = vmul.f32 0.01, %v383_v52  ;;  %2477 = vmatmul.msk.f32.gmra.mxu0 %vm118_vm0, %v3568_v42  ;;  %2525 = vmatmul.msk.f32.gmra.mxu1 %vm118_vm0, %v3271_v9  ;;  %v734_v13 = vmul.f32 0.01, %v544_v51 }
 0x11b   :  { %v893_v20 = vmax.f32 %v383_v52, %v765_v4  ;;  %v862_v26 = vmax.f32 %v544_v51, %v734_v13  ;;  %v3590_v52 = vpop.f32.mrf.mxu3 }
 0x11c   :  { %5016 = vst [vmem:[#allocation14_spill] sm:$0xff] %v3590_v52 }
 0x11d   :  { %1075 = vmatmul.f32.gmra.mxu2 %v893_v20  ;;  %1920 = vmatmul.f32.gmra.mxu3 %v862_v26  ;;  %v1279_v26 = vld [vmem:[%s4995_s0 + $0x8] sm:$0xff] }
 0x11e   :  { %v385_v29 = vpop.f32.mrf.mxu0  ;;  %v546_v14 = vpop.f32.mrf.mxu1 }
 0x11f   :  { %v386_v39 = vadd.f32 %v385_v29, %v3217_v19  ;;  %v547_v17 = vadd.f32 %v546_v14, %v3533_v62 }
 0x120   :  { %v3585_v48 = vpop.f32.mrf.mxu2 }
 0x121   :  { %v767_v16 = vmul.f32 0.01, %v386_v39  ;;  %2526 = vmatmul.msk.f32.gmra.mxu1 %vm118_vm0, %v3292_v12  ;;  %2572 = vmatmul.msk.f32.vlgmr.msrb.gmra.mxu0 %vm1407_vm2, %v1278_v34  ;;  %v736_v9 = vmul.f32 0.01, %v547_v17 }
 0x123   :  { %v895_v51 = vmax.f32 %v386_v39, %v767_v16  ;;  %v864_v4 = vmax.f32 %v547_v17, %v736_v9  ;;  %v3602_v9 = vpop.f32.mrf.mxu3 }
 0x124   :  { %5017 = vst [vmem:[#allocation15_spill] sm:$0xff] %v3602_v9 }
 0x125   :  { %1078 = vmatmul.f32.gmra.mxu2 %v895_v51  ;;  %1923 = vmatmul.f32.gmra.mxu3 %v864_v4 }
 0x126   :  { %v388_v13 = vpop.f32.mrf.mxu0  ;;  %v549_v20 = vpop.f32.mrf.mxu1 }
 0x127   :  { %v389_v29 = vadd.f32 %v388_v13, %v3217_v19  ;;  %v550_v14 = vadd.f32 %v549_v20, %v3533_v62  ;;  %v1280_v13 = vld [vmem:[%s4995_s0 + $0x10] sm:$0xff] }
 0x128   :  { %v3597_v12 = vpop.f32.mrf.mxu2 }
 0x129   :  { %v769_v34 = vmul.f32 0.01, %v389_v29  ;;  %2527 = vmatmul.msk.f32.gmra.mxu1 %vm118_vm0, %v3313_v15  ;;  %2573 = vmatmul.msk.f32.gmra.mxu0 %vm1407_vm2, %v1279_v26  ;;  %v738_v16 = vmul.f32 0.01, %v550_v14 }
 0x12b   :  { %v897_v39 = vmax.f32 %v389_v29, %v769_v34  ;;  %v866_v17 = vmax.f32 %v550_v14, %v738_v16  ;;  %v3614_v16 = vpop.f32.mrf.mxu3 }
 0x12c   :  { %5018 = vst [vmem:[#allocation16_spill] sm:$0xff] %v3614_v16 }
 0x12d   :  { %1081 = vmatmul.f32.gmra.mxu2 %v897_v39  ;;  %1926 = vmatmul.f32.gmra.mxu3 %v866_v17 }
 0x12e   :  { %v391_v51 = vpop.f32.mrf.mxu0  ;;  %v552_v4 = vpop.f32.mrf.mxu1 }
 0x12f   :  { %v392_v20 = vadd.f32 %v391_v51, %v3217_v19  ;;  %v553_v52 = vadd.f32 %v552_v4, %v3533_v62  ;;  %v1281_v51 = vld [vmem:[%s4995_s0 + $0x18] sm:$0xff] }
 0x130   :  { %v3609_v15 = vpop.f32.mrf.mxu2 }
 0x131   :  { %v771_v26 = vmul.f32 0.01, %v392_v20  ;;  %2528 = vmatmul.msk.f32.gmra.mxu1 %vm118_vm0, %v3334_v18  ;;  %2574 = vmatmul.msk.f32.gmra.mxu0 %vm1407_vm2, %v1280_v13  ;;  %v740_v29 = vmul.f32 0.01, %v553_v52 }
 0x133   :  { %v899_v14 = vmax.f32 %v392_v20, %v771_v26  ;;  %v868_v34 = vmax.f32 %v553_v52, %v740_v29  ;;  %v3631_v16 = vpop.f32.mrf.mxu3 }
 0x134   :  { %5019 = vst [vmem:[#allocation17_spill] sm:$0xff] %v3631_v16 }
 0x135   :  { %1084 = vmatmul.f32.gmra.mxu2 %v899_v14  ;;  %1929 = vmatmul.f32.gmra.mxu3 %v868_v34  ;;  %v1282_v34 = vld [vmem:[%s4995_s0 + $0x20] sm:$0xff] }
 0x136   :  { %v394_v39 = vpop.f32.mrf.mxu0  ;;  %v555_v17 = vpop.f32.mrf.mxu1 }
 0x137   :  { %v395_v4 = vadd.f32 %v394_v39, %v3217_v19  ;;  %v556_v9 = vadd.f32 %v555_v17, %v3533_v62 }
 0x138   :  { %v3621_v18 = vpop.f32.mrf.mxu2 }
 0x139   :  { %v773_v13 = vmul.f32 0.01, %v395_v4  ;;  %2529 = vmatmul.msk.f32.gmra.mxu1 %vm118_vm0, %v3355_v22  ;;  %2575 = vmatmul.msk.f32.gmra.mxu0 %vm1407_vm2, %v1281_v51  ;;  %v742_v52 = vmul.f32 0.01, %v556_v9 }
 0x13b   :  { %v901_v20 = vmax.f32 %v395_v4, %v773_v13  ;;  %v870_v26 = vmax.f32 %v556_v9, %v742_v52 }
 0x13d   :  { %1087 = vmatmul.f32.gmra.mxu2 %v901_v20  ;;  %1932 = vmatmul.f32.gmra.mxu3 %v870_v26  ;;  %v1283_v20 = vld [vmem:[%s4995_s0 + $0x28] sm:$0xff] }
 0x13e   :  { %v397_v29 = vpop.f32.mrf.mxu0  ;;  %v558_v14 = vpop.f32.mrf.mxu1 }
 0x13f   :  { %v398_v39 = vadd.f32 %v397_v29, %v3217_v19  ;;  %v559_v17 = vadd.f32 %v558_v14, %v3533_v62 }
 0x140   :  { %v3633_v22 = vpop.f32.mrf.mxu2 }
 0x141   :  { %v775_v51 = vmul.f32 0.01, %v398_v39  ;;  %v744_v61 = vmul.f32 0.01, %v559_v17  ;;  %2530 = vmatmul.msk.f32.gmra.mxu1 %vm118_vm0, %v3374_v25  ;;  %2576 = vmatmul.msk.f32.gmra.mxu0 %vm1407_vm2, %v1282_v34 }
 0x143   :  { %v903_v9 = vmax.f32 %v398_v39, %v775_v51  ;;  %v872_v4 = vmax.f32 %v559_v17, %v744_v61  ;;  %v3648_v61 = vpop.f32.mrf.mxu3 }
 0x144   :  { %5020 = vst [vmem:[#allocation18_spill] sm:$0xff] %v3648_v61 }
 0x145   :  { %1090 = vmatmul.f32.gmra.mxu2 %v903_v9  ;;  %1935 = vmatmul.f32.gmra.mxu3 %v872_v4  ;;  %v1284_v9 = vld [vmem:[%s4995_s0 + $0x30] sm:$0xff] }
 0x146   :  { %v400_v13 = vpop.f32.mrf.mxu0  ;;  %v561_v52 = vpop.f32.mrf.mxu1 }
 0x147   :  { %v401_v26 = vadd.f32 %v400_v13, %v3217_v19  ;;  %v562_v29 = vadd.f32 %v561_v52, %v3533_v62 }
 0x148   :  { %v3643_v14 = vpop.f32.mrf.mxu2 }
 0x149   :  { %v777_v16 = vmul.f32 0.01, %v401_v26  ;;  %v746_v25 = vmul.f32 0.01, %v562_v29  ;;  %2531 = vmatmul.msk.f32.gmra.mxu1 %vm118_vm0, %v3395_v28  ;;  %2577 = vmatmul.msk.f32.gmra.mxu0 %vm1407_vm2, %v1283_v20 }
 0x14b   :  { %v905_v34 = vmax.f32 %v401_v26, %v777_v16  ;;  %v874_v39 = vmax.f32 %v562_v29, %v746_v25  ;;  %v3660_v29 = vpop.f32.mrf.mxu3 }
 0x14c   :  { %5021 = vst [vmem:[#allocation19_spill] sm:$0xff] %v3660_v29 }
 0x14d   :  { %1093 = vmatmul.f32.gmra.mxu2 %v905_v34  ;;  %1938 = vmatmul.f32.gmra.mxu3 %v874_v39  ;;  %v1285_v39 = vld [vmem:[%s4995_s0 + $0x38] sm:$0xff] }
 0x14e   :  { %v403_v17 = vpop.f32.mrf.mxu0  ;;  %v564_v51 = vpop.f32.mrf.mxu1 }
 0x14f   :  { %v404_v4 = vadd.f32 %v403_v17, %v3217_v19  ;;  %v565_v13 = vadd.f32 %v564_v51, %v3533_v62 }
 0x150   :  { %v3655_v52 = vpop.f32.mrf.mxu2 }
 0x151   :  { %v779_v28 = vmul.f32 0.01, %v404_v4  ;;  %v748_v20 = vmul.f32 0.01, %v565_v13  ;;  %2532 = vmatmul.msk.f32.gmra.mxu1 %vm118_vm0, %v3416_v31  ;;  %2578 = vmatmul.msk.f32.gmra.mxu0 %vm1407_vm2, %v1284_v9 }
 0x153   :  { %v907_v16 = vmax.f32 %v404_v4, %v779_v28  ;;  %v876_v26 = vmax.f32 %v565_v13, %v748_v20  ;;  %v3672_v28 = vpop.f32.mrf.mxu3 }
 0x154   :  { %5022 = vst [vmem:[#allocation20_spill] sm:$0xff] %v3672_v28 }
 0x155   :  { %1096 = vmatmul.f32.gmra.mxu2 %v907_v16  ;;  %1941 = vmatmul.f32.gmra.mxu3 %v876_v26  ;;  %v1286_v26 = vld [vmem:[%s4995_s0 + $0x40] sm:$0xff] }
 0x156   :  { %v406_v25 = vpop.f32.mrf.mxu0  ;;  %v567_v34 = vpop.f32.mrf.mxu1 }
 0x157   :  { %v407_v17 = vadd.f32 %v406_v25, %v3217_v19  ;;  %v568_v51 = vadd.f32 %v567_v34, %v3533_v62 }
 0x158   :  { %v3667_v61 = vpop.f32.mrf.mxu2 }
 0x159   :  { %v781_v31 = vmul.f32 0.01, %v407_v17  ;;  %v750_v9 = vmul.f32 0.01, %v568_v51  ;;  %2533 = vmatmul.msk.f32.gmra.mxu1 %vm118_vm0, %v3437_v37  ;;  %2579 = vmatmul.msk.f32.gmra.mxu0 %vm1407_vm2, %v1285_v39 }
 0x15b   :  { %v909_v4 = vmax.f32 %v407_v17, %v781_v31  ;;  %v878_v13 = vmax.f32 %v568_v51, %v750_v9 }
 0x15d   :  { %1099 = vmatmul.f32.gmra.mxu2 %v909_v4  ;;  %1944 = vmatmul.f32.gmra.mxu3 %v878_v13  ;;  %v1287_v4 = vld [vmem:[%s4995_s0 + $0x48] sm:$0xff] }
 0x15e   :  { %v409_v20 = vpop.f32.mrf.mxu0  ;;  %v570_v16 = vpop.f32.mrf.mxu1 }
 0x15f   :  { %v410_v25 = vadd.f32 %v409_v20, %v3217_v19  ;;  %v571_v34 = vadd.f32 %v570_v16, %v3533_v62  ;;  %v3689_v16 = vpop.f32.mrf.mxu3 }
 0x160   :  { %v3679_v29 = vpop.f32.mrf.mxu2  ;;  %5023 = vst [vmem:[#allocation21_spill] sm:$0xff] %v3689_v16 }
 0x161   :  { %v783_v37 = vmul.f32 0.01, %v410_v25  ;;  %v752_v39 = vmul.f32 0.01, %v571_v34  ;;  %2534 = vmatmul.msk.f32.gmra.mxu1 %vm118_vm0, %v3458_v44  ;;  %2580 = vmatmul.msk.f32.gmra.mxu0 %vm1407_vm2, %v1286_v26 }
 0x163   :  { %v911_v17 = vmax.f32 %v410_v25, %v783_v37  ;;  %v880_v51 = vmax.f32 %v571_v34, %v752_v39 }
 0x165   :  { %1102 = vmatmul.f32.gmra.mxu2 %v911_v17  ;;  %1947 = vmatmul.f32.gmra.mxu3 %v880_v51  ;;  %v1288_v17 = vld [vmem:[%s4995_s0 + $0x50] sm:$0xff] }
 0x166   :  { %v412_v31 = vpop.f32.mrf.mxu0  ;;  %v573_v9 = vpop.f32.mrf.mxu1 }
 0x167   :  { %v413_v13 = vadd.f32 %v412_v31, %v3217_v19  ;;  %v574_v20 = vadd.f32 %v573_v9, %v3533_v62 }
 0x168   :  { %v3691_v28 = vpop.f32.mrf.mxu2 }
 0x169   :  { %v785_v44 = vmul.f32 0.01, %v413_v13  ;;  %v754_v26 = vmul.f32 0.01, %v574_v20  ;;  %2535 = vmatmul.msk.f32.gmra.mxu1 %vm118_vm0, %v3477_v56  ;;  %2581 = vmatmul.msk.f32.gmra.mxu0 %vm1407_vm2, %v1287_v4  ;;  %v3706_v4 = vpop.f32.mrf.mxu3 }
 0x16a   :  { %5024 = vst [vmem:[#allocation22_spill] sm:$0xff] %v3706_v4 }
 0x16b   :  { %v913_v25 = vmax.f32 %v413_v13, %v785_v44  ;;  %v882_v34 = vmax.f32 %v574_v20, %v754_v26 }
 0x16d   :  { %1105 = vmatmul.f32.gmra.mxu2 %v913_v25  ;;  %1950 = vmatmul.f32.gmra.mxu3 %v882_v34  ;;  %v1289_v25 = vld [vmem:[%s4995_s0 + $0x58] sm:$0xff] }
 0x16e   :  { %v415_v37 = vpop.f32.mrf.mxu0  ;;  %v576_v39 = vpop.f32.mrf.mxu1 }
 0x16f   :  { %v416_v51 = vadd.f32 %v415_v37, %v3217_v19  ;;  %v577_v31 = vadd.f32 %v576_v39, %v3533_v62 }
 0x170   :  { %v3701_v9 = vpop.f32.mrf.mxu2 }
 0x171   :  { %v787_v16 = vmul.f32 0.01, %v416_v51  ;;  %v756_v56 = vmul.f32 0.01, %v577_v31  ;;  %2536 = vmatmul.msk.f32.gmra.mxu1 %vm118_vm0, %v3493_v7  ;;  %2582 = vmatmul.msk.f32.gmra.mxu0 %vm1407_vm2, %v1288_v17 }
 0x173   :  { %v915_v13 = vmax.f32 %v416_v51, %v787_v16  ;;  %v884_v20 = vmax.f32 %v577_v31, %v756_v56  ;;  %v3718_v31 = vpop.f32.mrf.mxu3 }
 0x174   :  { %5025 = vst [vmem:[#allocation23_spill] sm:$0xff] %v3718_v31 }
 0x175   :  { %1108 = vmatmul.f32.gmra.mxu2 %v915_v13  ;;  %1953 = vmatmul.f32.gmra.mxu3 %v884_v20  ;;  %v1290_v20 = vld [vmem:[%s4995_s0 + $0x60] sm:$0xff] }
 0x176   :  { %v418_v44 = vpop.f32.mrf.mxu0  ;;  %v579_v26 = vpop.f32.mrf.mxu1 }
 0x177   :  { %v419_v34 = vadd.f32 %v418_v44, %v3217_v19  ;;  %v580_v37 = vadd.f32 %v579_v26, %v3533_v62 }
 0x178   :  { %v3713_v39 = vpop.f32.mrf.mxu2 }
 0x179   :  { %v789_v7 = vmul.f32 0.01, %v419_v34  ;;  %v758_v17 = vmul.f32 0.01, %v580_v37  ;;  %2537 = vmatmul.msk.f32.gmra.mxu1 %vm118_vm0, %v3509_v33  ;;  %2583 = vmatmul.msk.f32.gmra.mxu0 %vm1407_vm2, %v1289_v25 }
 0x17b   :  { %v917_v16 = vmax.f32 %v419_v34, %v789_v7  ;;  %v886_v51 = vmax.f32 %v580_v37, %v758_v17  ;;  %v3730_v7 = vpop.f32.mrf.mxu3 }
 0x17c   :  { %5026 = vst [vmem:[#allocation24_spill] sm:$0xff] %v3730_v7 }
 0x17d   :  { %1111 = vmatmul.f32.gmra.mxu2 %v917_v16  ;;  %1956 = vmatmul.f32.gmra.mxu3 %v886_v51  ;;  %v1291_v51 = vld [vmem:[%s4995_s0 + $0x68] sm:$0xff] }
 0x17e   :  { %v421_v56 = vpop.f32.mrf.mxu0  ;;  %v582_v13 = vpop.f32.mrf.mxu1 }
 0x17f   :  { %v422_v44 = vadd.f32 %v421_v56, %v3217_v19  ;;  %v583_v26 = vadd.f32 %v582_v13, %v3533_v62 }
 0x180   :  { %v3725_v4 = vpop.f32.mrf.mxu2 }
 0x181   :  { %v791_v33 = vmul.f32 0.01, %v422_v44  ;;  %v760_v25 = vmul.f32 0.01, %v583_v26  ;;  %2538 = vmatmul.msk.f32.gmra.mxu1 %vm118_vm0, %v3525_v50  ;;  %2584 = vmatmul.msk.f32.gmra.mxu0 %vm1407_vm2, %v1290_v20 }
 0x183   :  { %v919_v34 = vmax.f32 %v422_v44, %v791_v33  ;;  %v888_v37 = vmax.f32 %v583_v26, %v760_v25  ;;  %v3745_v33 = vld [vmem:[%s4998_s6] ss:$0 sm:$0xff] }
 0x184   :  { %v3750_v25 = vld [vmem:[%s4999_s8] ss:$0 sm:$0xff] }
 0x185   :  { %1114 = vmatmul.f32.gmra.mxu2 %v919_v34  ;;  %1959 = vmatmul.f32.gmra.mxu3 %v888_v37 }
 0x186   :  { %v424_v17 = vpop.f32.mrf.mxu0  ;;  %v585_v16 = vpop.f32.mrf.mxu1 }
 0x187   :  { %v425_v56 = vadd.f32 %v424_v17, %v3217_v19  ;;  %v586_v13 = vadd.f32 %v585_v16, %v3533_v62 }
 0x188   :  { %v3737_v31 = vpop.f32.mrf.mxu2 }
 0x189   :  { %v793_v50 = vmul.f32 0.01, %v425_v56  ;;  %v762_v20 = vmul.f32 0.01, %v586_v13  ;;  %2539 = vmatmul.msk.f32.gmra.mxu1 %vm118_vm0, %v3542_v23  ;;  %2585 = vmatmul.msk.f32.gmra.mxu0 %vm1407_vm2, %v1291_v51  ;;  %v1292_v23 = vld [vmem:[%s4995_s0 + $0x70] sm:$0xff]  ;;  %v1023_v51 = vadd.f32 %v3745_v33, %v3559_v0 }
 0x18b   :  { %v921_v44 = vmax.f32 %v425_v56, %v793_v50  ;;  %v890_v26 = vmax.f32 %v586_v13, %v762_v20  ;;  %2650 = vtanh.f32 %v1023_v51 }
 0x18d   :  { %1117 = vmatmul.f32.gmra.mxu2 %v921_v44  ;;  %1962 = vmatmul.f32.gmra.mxu3 %v890_v26 }
 0x18e   :  { %v427_v34 = vpop.f32.mrf.mxu0  ;;  %v588_v37 = vpop.f32.mrf.mxu1 }
 0x18f   :  { %v428_v17 = vadd.f32 %v427_v34, %v3217_v19  ;;  %v589_v16 = vadd.f32 %v588_v37, %v3533_v62  ;;  %v3768_v37 = vld [vmem:[%s5000_s9] ss:$0 sm:$0xff] }
 0x190   :  { %v3759_v56 = vpop.f32.mrf.mxu2  ;;  %v1915_v13 = vpop.f32.mrf.mxu3 }
 0x191   :  { %v795_v50 = vmul.f32 0.01, %v428_v17  ;;  %v764_v20 = vmul.f32 0.01, %v589_v16  ;;  %v1916_v44 = vadd.f32 %v3750_v25, %v1915_v13  ;;  %2540 = vmatmul.msk.f32.gmra.mxu1 %vm118_vm0, %v3555_v8  ;;  %2586 = vmatmul.msk.f32.gmra.mxu0 %vm1407_vm2, %v1292_v23  ;;  %v1293_v23 = vld [vmem:[%s4995_s0 + $0x78] sm:$0xff] }
 0x193   :  { %v923_v26 = vmax.f32 %v428_v17, %v795_v50  ;;  %v892_v7 = vmax.f32 %v589_v16, %v764_v20  ;;  %v2107_v34 = vmul.f32 0.01, %v1916_v44  ;;  %v1026_v50 = vadd.f32 %v3745_v33, %v3574_v3 }
 0x195   :  { %v2171_v0 = vmax.f32 %v1916_v44, %v2107_v34  ;;  %1120 = vmatmul.f32.gmra.mxu2 %v923_v26  ;;  %1965 = vmatmul.f32.gmra.mxu3 %v892_v7  ;;  %2652 = vtanh.f32 %v1026_v50 }
 0x196   :  { %v430_v8 = vpop.f32.mrf.mxu0  ;;  %v591_v13 = vpop.f32.mrf.mxu1 }
 0x197   :  { %v2239_v17 = vmul.f32 %v3768_v37, %v2171_v0  ;;  %v431_v16 = vadd.f32 %v430_v8, %v3217_v19  ;;  %v592_v51 = vadd.f32 %v591_v13, %v3533_v62  ;;  %v2651_v0 = vpop.eup %2650  ;;  %v434_v13 = vadd.f32 %v3226_v24, %v3217_v19 }
 0x198   :  { %v3783_v20 = vpop.f32.mrf.mxu2  ;;  %v1918_v44 = vpop.f32.mrf.mxu3  ;;  %v1343_v60 = vmul.f32 0.05, %v2651_v0  ;;  %v437_v0 = vadd.f32 %v3245_v35, %v3217_v19  ;;  %v1295_v35 = vld [vmem:[%s4995_s0 + $0x88] sm:$0xff] }
 0x199   :  { %v2307_v7 = vadd.f32 %v3773_v2, %v2239_v17  ;;  %v797_v26 = vmul.f32 0.01, %v431_v16  ;;  %v766_v34 = vmul.f32 0.01, %v592_v51  ;;  %2541 = vmatmul.msk.f32.gmra.mxu1 %vm118_vm0, %v3568_v42  ;;  %2587 = vmatmul.msk.f32.gmra.mxu0 %vm1407_vm2, %v1293_v23  ;;  %v1919_v8 = vadd.f32 %v3750_v25, %v1918_v44  ;;  %v1294_v44 = vld [vmem:[%s4995_s0 + $0x80] sm:$0xff] }
 0x19a   :  { %v799_v24 = vmul.f32 0.01, %v434_v13 }
 0x19b   :  { %2371 = vst [vmem:[%s5002_s12] sm:$0xff] %v2307_v7  ;;  %v925_v3 = vmax.f32 %v431_v16, %v797_v26  ;;  %v894_v46 = vmax.f32 %v592_v51, %v766_v34  ;;  %v2108_v17 = vmul.f32 0.01, %v1919_v8  ;;  %v1029_v16 = vadd.f32 %v3745_v33, %v3585_v48 }
 0x19c   :  { %v927_v34 = vmax.f32 %v434_v13, %v799_v24 }
 0x19d   :  { %1123 = vmatmul.f32.gmra.mxu2 %v925_v3  ;;  %1968 = vmatmul.f32.gmra.mxu3 %v894_v46  ;;  %v2172_v42 = vmax.f32 %v1919_v8, %v2108_v17  ;;  %2654 = vtanh.f32 %v1029_v16 }
 0x19e   :  { %v594_v59 = vpop.f32.mrf.mxu1  ;;  %v1621_v23 = vpop.f32.mrf.mxu0 }
 0x19f   :  { %v595_v36 = vadd.f32 %v594_v59, %v3533_v62  ;;  %v1622_v10 = vadd.f32 %v1621_v23, %v1343_v60  ;;  %v2240_v51 = vmul.f32 %v3768_v37, %v2172_v42  ;;  %v2778_v59 = vld [vmem:[%s4992_s1 + $0x118] sm:$0xff]  ;;  %v2653_v60 = vpop.eup %2652 }
 0x1a0   :  { %v3802_v50 = vpop.f32.mrf.mxu2  ;;  %v1921_v46 = vpop.f32.mrf.mxu3  ;;  %v1344_v17 = vmul.f32 0.05, %v2653_v60  ;;  %v2779_v60 = vld [vmem:[%s4992_s1 + $0x120] sm:$0xff] }
 0x1a1   :  { %v768_v7 = vmul.f32 0.01, %v595_v36  ;;  %1814 = vst.msk [vmem:[%s5003_s11] sm:$0xff] %vm1813_vm3, %v1622_v10  ;;  %v1922_v26 = vadd.f32 %v3750_v25, %v1921_v46  ;;  %2542 = vmatmul.msk.f32.gmra.mxu1 %vm118_vm0, %v2778_v59  ;;  %2588 = vmatmul.msk.f32.gmra.mxu0 %vm1407_vm2, %v1294_v44  ;;  %v2308_v48 = vadd.f32 %v3773_v2, %v2240_v51  ;;  %v801_v44 = vmul.f32 0.01, %v437_v0 }
 0x1a3   :  { %v896_v8 = vmax.f32 %v595_v36, %v768_v7  ;;  %v2109_v3 = vmul.f32 0.01, %v1922_v26  ;;  %2372 = vst [vmem:[%s5002_s12 + $0x8] sm:$0xff] %v2308_v48  ;;  %v1032_v36 = vadd.f32 %v3745_v33, %v3597_v12  ;;  %v2655_v12 = vpop.eup %2654  ;;  %v929_v48 = vmax.f32 %v437_v0, %v801_v44 }
 0x1a5   :  { %v2173_v10 = vmax.f32 %v1922_v26, %v2109_v3  ;;  %1126 = vmatmul.f32.gmra.mxu2 %v927_v34  ;;  %1971 = vmatmul.f32.gmra.mxu3 %v896_v8  ;;  %v440_v34 = vadd.f32 %v3266_v45, %v3217_v19  ;;  %2656 = vtanh.f32 %v1032_v36  ;;  %v1296_v45 = vld [vmem:[%s4995_s0 + $0x90] sm:$0xff] }
 0x1a6   :  { %v597_v42 = vpop.f32.mrf.mxu1  ;;  %v1624_v23 = vpop.f32.mrf.mxu0 }
 0x1a7   :  { %v2241_v51 = vmul.f32 %v3768_v37, %v2173_v10  ;;  %v598_v13 = vadd.f32 %v597_v42, %v3533_v62  ;;  %v1625_v24 = vadd.f32 %v1624_v23, %v1344_v17  ;;  %v1345_v17 = vmul.f32 0.05, %v2655_v12 }
 0x1a8   :  { %v3827_v16 = vpop.f32.mrf.mxu2  ;;  %v1924_v46 = vpop.f32.mrf.mxu3  ;;  %v443_v12 = vadd.f32 %v3287_v54, %v3217_v19  ;;  %v1297_v54 = vld [vmem:[%s4995_s0 + $0x98] sm:$0xff] }
 0x1a9   :  { %v2309_v7 = vadd.f32 %v3773_v2, %v2241_v51  ;;  %v770_v26 = vmul.f32 0.01, %v598_v13  ;;  %1815 = vst.msk [vmem:[%s5003_s11 + $0x8] sm:$0xff] %vm1813_vm3, %v1625_v24  ;;  %v1925_v59 = vadd.f32 %v3750_v25, %v1924_v46  ;;  %2543 = vmatmul.msk.f32.gmra.mxu1 %vm118_vm0, %v2779_v60  ;;  %2589 = vmatmul.msk.f32.gmra.mxu0 %vm1407_vm2, %v1295_v35  ;;  %v803_v51 = vmul.f32 0.01, %v440_v34 }
 0x1ab   :  { %2373 = vst [vmem:[%s5002_s12 + $0x10] sm:$0xff] %v2309_v7  ;;  %v898_v8 = vmax.f32 %v598_v13, %v770_v26  ;;  %v2110_v3 = vmul.f32 0.01, %v1925_v59  ;;  %v1035_v13 = vadd.f32 %v3745_v33, %v3609_v15  ;;  %v2657_v15 = vpop.eup %2656  ;;  %v931_v60 = vmax.f32 %v440_v34, %v803_v51 }
 0x1ad   :  { %v2174_v10 = vmax.f32 %v1925_v59, %v2110_v3  ;;  %1129 = vmatmul.f32.gmra.mxu2 %v929_v48  ;;  %1974 = vmatmul.f32.gmra.mxu3 %v898_v8  ;;  %v2780_v59 = vld [vmem:[%s4992_s1 + $0x128] sm:$0xff]  ;;  %2658 = vtanh.f32 %v1035_v13 }
 0x1ae   :  { %v600_v42 = vpop.f32.mrf.mxu1  ;;  %v1627_v23 = vpop.f32.mrf.mxu0 }
 0x1af   :  { %v2242_v24 = vmul.f32 %v3768_v37, %v2174_v10  ;;  %v601_v0 = vadd.f32 %v600_v42, %v3533_v62  ;;  %v1628_v44 = vadd.f32 %v1627_v23, %v1345_v17  ;;  %v1346_v10 = vmul.f32 0.05, %v2657_v15 }
 0x1b0   :  { %v3852_v35 = vpop.f32.mrf.mxu2  ;;  %v1927_v36 = vpop.f32.mrf.mxu3  ;;  %v805_v23 = vmul.f32 0.01, %v443_v12 }
 0x1b1   :  { %v2310_v46 = vadd.f32 %v3773_v2, %v2242_v24  ;;  %v772_v7 = vmul.f32 0.01, %v601_v0  ;;  %1816 = vst.msk [vmem:[%s5003_s11 + $0x10] sm:$0xff] %vm1813_vm3, %v1628_v44  ;;  %v1928_v26 = vadd.f32 %v3750_v25, %v1927_v36  ;;  %2544 = vmatmul.msk.f32.gmra.mxu1 %vm118_vm0, %v2780_v59  ;;  %2590 = vmatmul.msk.f32.gmra.mxu0 %vm1407_vm2, %v1296_v45 }
 0x1b2   :  { %v446_v59 = vadd.f32 %v3308_v63, %v3217_v19  ;;  %v1298_v63 = vld [vmem:[%s4995_s0 + $0xa0] sm:$0xff] }
 0x1b3   :  { %2374 = vst [vmem:[%s5002_s12 + $0x18] sm:$0xff] %v2310_v46  ;;  %v900_v48 = vmax.f32 %v601_v0, %v772_v7  ;;  %v2111_v8 = vmul.f32 0.01, %v1928_v26  ;;  %v1038_v0 = vadd.f32 %v3745_v33, %v3621_v18  ;;  %v2781_v7 = vld [vmem:[%s4992_s1 + $0x130] sm:$0xff]  ;;  %v2659_v18 = vpop.eup %2658 }
 0x1b5   :  { %v2175_v3 = vmax.f32 %v1928_v26, %v2111_v8  ;;  %1132 = vmatmul.f32.gmra.mxu2 %v931_v60  ;;  %1977 = vmatmul.f32.gmra.mxu3 %v900_v48  ;;  %v933_v26 = vmax.f32 %v443_v12, %v805_v23  ;;  %2660 = vtanh.f32 %v1038_v0  ;;  %v1347_v8 = vmul.f32 0.05, %v2659_v18 }
 0x1b6   :  { %v603_v17 = vpop.f32.mrf.mxu1  ;;  %v1630_v42 = vpop.f32.mrf.mxu0 }
 0x1b7   :  { %v2243_v24 = vmul.f32 %v3768_v37, %v2175_v3  ;;  %v604_v34 = vadd.f32 %v603_v17, %v3533_v62  ;;  %v1631_v51 = vadd.f32 %v1630_v42, %v1346_v10  ;;  %v807_v17 = vmul.f32 0.01, %v446_v59 }
 0x1b8   :  { %v3877_v44 = vpop.f32.mrf.mxu2  ;;  %v1930_v45 = vpop.f32.mrf.mxu3 }
 0x1b9   :  { %v2311_v13 = vadd.f32 %v3773_v2, %v2243_v24  ;;  %v774_v36 = vmul.f32 0.01, %v604_v34  ;;  %1817 = vst.msk [vmem:[%s5003_s11 + $0x18] sm:$0xff] %vm1813_vm3, %v1631_v51  ;;  %v1931_v46 = vadd.f32 %v3750_v25, %v1930_v45  ;;  %2545 = vmatmul.msk.f32.gmra.mxu1 %vm118_vm0, %v2781_v7  ;;  %2591 = vmatmul.msk.f32.gmra.mxu0 %vm1407_vm2, %v1297_v54 }
 0x1ba   :  { %v1041_v24 = vadd.f32 %v3745_v33, %v3633_v22 }
 0x1bb   :  { %2375 = vst [vmem:[%s5002_s12 + $0x20] sm:$0xff] %v2311_v13  ;;  %v902_v15 = vmax.f32 %v604_v34, %v774_v36  ;;  %v2112_v60 = vmul.f32 0.01, %v1931_v46  ;;  %v2782_v13 = vld [vmem:[%s4992_s1 + $0x138] sm:$0xff]  ;;  %v2661_v22 = vpop.eup %2660  ;;  %v935_v36 = vmax.f32 %v446_v59, %v807_v17  ;;  %v1044_v17 = vadd.f32 %v3745_v33, %v3643_v14 }
 0x1bc   :  { %2662 = vtanh.f32 %v1041_v24 }
 0x1bd   :  { %v2176_v48 = vmax.f32 %v1931_v46, %v2112_v60  ;;  %1135 = vmatmul.f32.gmra.mxu2 %v933_v26  ;;  %1980 = vmatmul.f32.gmra.mxu3 %v902_v15  ;;  %v449_v46 = vadd.f32 %v3329_v11, %v3217_v19  ;;  %v1348_v15 = vmul.f32 0.05, %v2661_v22  ;;  %v1299_v11 = vld [vmem:[%s4995_s0 + $0xa8] sm:$0xff]  ;;  %2664 = vtanh.f32 %v1044_v17 }
 0x1be   :  { %v606_v3 = vpop.f32.mrf.mxu1  ;;  %v1633_v10 = vpop.f32.mrf.mxu0  ;;  %v2784_v17 = vld [vmem:[%s4992_s1 + $0x148] sm:$0xff] }
 0x1bf   :  { %v2244_v42 = vmul.f32 %v3768_v37, %v2176_v48  ;;  %v607_v12 = vadd.f32 %v606_v3, %v3533_v62  ;;  %v1634_v23 = vadd.f32 %v1633_v10, %v1347_v8  ;;  %v809_v8 = vmul.f32 0.01, %v449_v46 }
 0x1c0   :  { %v3902_v34 = vpop.f32.mrf.mxu2  ;;  %v1933_v51 = vpop.f32.mrf.mxu3 }
 0x1c1   :  { %v2312_v54 = vadd.f32 %v3773_v2, %v2244_v42  ;;  %v776_v0 = vmul.f32 0.01, %v607_v12  ;;  %1818 = vst.msk [vmem:[%s5003_s11 + $0x20] sm:$0xff] %vm1813_vm3, %v1634_v23  ;;  %v1934_v45 = vadd.f32 %v3750_v25, %v1933_v51  ;;  %2546 = vmatmul.msk.f32.gmra.mxu1 %vm118_vm0, %v2782_v13  ;;  %2592 = vmatmul.msk.f32.gmra.mxu0 %vm1407_vm2, %v1298_v63  ;;  %v2783_v51 = vld [vmem:[%s4992_s1 + $0x140] sm:$0xff] }
 0x1c2   :  { %v2663_v14 = vpop.eup %2662 }
 0x1c3   :  { %2376 = vst [vmem:[%s5002_s12 + $0x28] sm:$0xff] %v2312_v54  ;;  %v904_v7 = vmax.f32 %v607_v12, %v776_v0  ;;  %v2113_v18 = vmul.f32 0.01, %v1934_v45  ;;  %v937_v54 = vmax.f32 %v449_v46, %v809_v8  ;;  %v452_v0 = vadd.f32 %v3350_v30, %v3217_v19  ;;  %v1300_v30 = vld [vmem:[%s4995_s0 + $0xb0] sm:$0xff] }
 0x1c5   :  { %v2177_v26 = vmax.f32 %v1934_v45, %v2113_v18  ;;  %1138 = vmatmul.f32.gmra.mxu2 %v935_v36  ;;  %1983 = vmatmul.f32.gmra.mxu3 %v904_v7  ;;  %v1349_v36 = vmul.f32 0.05, %v2663_v14 }
 0x1c6   :  { %v609_v60 = vpop.f32.mrf.mxu1  ;;  %v1636_v48 = vpop.f32.mrf.mxu0 }
 0x1c7   :  { %v2245_v3 = vmul.f32 %v3768_v37, %v2177_v26  ;;  %v610_v59 = vadd.f32 %v609_v60, %v3533_v62  ;;  %v1637_v10 = vadd.f32 %v1636_v48, %v1348_v15  ;;  %v811_v26 = vmul.f32 0.01, %v452_v0 }
 0x1c8   :  { %v3927_v42 = vpop.f32.mrf.mxu2  ;;  %v1936_v12 = vpop.f32.mrf.mxu3  ;;  %v1047_v48 = vadd.f32 %v3745_v33, %v3655_v52 }
 0x1c9   :  { %v2313_v23 = vadd.f32 %v3773_v2, %v2245_v3  ;;  %v778_v63 = vmul.f32 0.01, %v610_v59  ;;  %1819 = vst.msk [vmem:[%s5003_s11 + $0x28] sm:$0xff] %vm1813_vm3, %v1637_v10  ;;  %v1937_v24 = vadd.f32 %v3750_v25, %v1936_v12  ;;  %2547 = vmatmul.msk.f32.gmra.mxu1 %vm118_vm0, %v2783_v51  ;;  %2593 = vmatmul.msk.f32.gmra.mxu0 %vm1407_vm2, %v1299_v11  ;;  %v2665_v52 = vpop.eup %2664 }
 0x1ca   :  { %v939_v12 = vmax.f32 %v452_v0, %v811_v26  ;;  %2666 = vtanh.f32 %v1047_v48  ;;  %v1350_v14 = vmul.f32 0.05, %v2665_v52 }
 0x1cb   :  { %2377 = vst [vmem:[%s5002_s12 + $0x30] sm:$0xff] %v2313_v23  ;;  %v906_v45 = vmax.f32 %v610_v59, %v778_v63  ;;  %v2114_v13 = vmul.f32 0.01, %v1937_v24  ;;  %v455_v23 = vadd.f32 %v3369_v41, %v3217_v19  ;;  %v1301_v41 = vld [vmem:[%s4995_s0 + $0xb8] sm:$0xff] }
 0x1cd   :  { %v2178_v22 = vmax.f32 %v1937_v24, %v2114_v13  ;;  %1141 = vmatmul.f32.gmra.mxu2 %v937_v54  ;;  %1986 = vmatmul.f32.gmra.mxu3 %v906_v45  ;;  %v813_v13 = vmul.f32 0.01, %v455_v23 }
 0x1ce   :  { %v612_v7 = vpop.f32.mrf.mxu1  ;;  %v1639_v18 = vpop.f32.mrf.mxu0 }
 0x1cf   :  { %v2246_v15 = vmul.f32 %v3768_v37, %v2178_v22  ;;  %v613_v46 = vadd.f32 %v612_v7, %v3533_v62  ;;  %v1640_v60 = vadd.f32 %v1639_v18, %v1349_v36  ;;  %v1050_v7 = vadd.f32 %v3745_v33, %v3667_v61 }
 0x1d0   :  { %v3952_v8 = vpop.f32.mrf.mxu2  ;;  %v1939_v3 = vpop.f32.mrf.mxu3  ;;  %v941_v48 = vmax.f32 %v455_v23, %v813_v13 }
 0x1d1   :  { %v2314_v59 = vadd.f32 %v3773_v2, %v2246_v15  ;;  %v780_v10 = vmul.f32 0.01, %v613_v46  ;;  %1820 = vst.msk [vmem:[%s5003_s11 + $0x30] sm:$0xff] %vm1813_vm3, %v1640_v60  ;;  %v1940_v11 = vadd.f32 %v3750_v25, %v1939_v3  ;;  %2548 = vmatmul.msk.f32.gmra.mxu1 %vm118_vm0, %v2784_v17  ;;  %2594 = vmatmul.msk.f32.gmra.mxu0 %vm1407_vm2, %v1300_v30  ;;  %v2785_v30 = vld [vmem:[%s4992_s1 + $0x150] sm:$0xff]  ;;  %v2667_v61 = vpop.eup %2666  ;;  %2668 = vtanh.f32 %v1050_v7 }
 0x1d2   :  { %v458_v3 = vadd.f32 %v3390_v53, %v3217_v19  ;;  %v1351_v17 = vmul.f32 0.05, %v2667_v61  ;;  %v1302_v53 = vld [vmem:[%s4995_s0 + $0xc0] sm:$0xff]  ;;  %v461_v7 = vadd.f32 %v3411_v1, %v3217_v19  ;;  %v1303_v1 = vld [vmem:[%s4995_s0 + $0xc8] sm:$0xff] }
 0x1d3   :  { %2378 = vst [vmem:[%s5002_s12 + $0x38] sm:$0xff] %v2314_v59  ;;  %v908_v63 = vmax.f32 %v613_v46, %v780_v10  ;;  %v2115_v24 = vmul.f32 0.01, %v1940_v11 }
 0x1d5   :  { %v2179_v51 = vmax.f32 %v1940_v11, %v2115_v24  ;;  %1144 = vmatmul.f32.gmra.mxu2 %v939_v12  ;;  %1989 = vmatmul.f32.gmra.mxu3 %v908_v63  ;;  %v815_v63 = vmul.f32 0.01, %v458_v3 }
 0x1d6   :  { %v615_v54 = vpop.f32.mrf.mxu1  ;;  %v1642_v45 = vpop.f32.mrf.mxu0 }
 0x1d7   :  { %v2247_v22 = vmul.f32 %v3768_v37, %v2179_v51  ;;  %v616_v0 = vadd.f32 %v615_v54, %v3533_v62  ;;  %v1643_v36 = vadd.f32 %v1642_v45, %v1350_v14  ;;  %v1053_v14 = vadd.f32 %v3745_v33, %v3679_v29  ;;  %v2669_v29 = vpop.eup %2668 }
 0x1d8   :  { %v3977_v18 = vpop.f32.mrf.mxu2  ;;  %v1942_v26 = vpop.f32.mrf.mxu3 }
 0x1d9   :  { %v2315_v15 = vadd.f32 %v3773_v2, %v2247_v22  ;;  %v782_v46 = vmul.f32 0.01, %v616_v0  ;;  %1821 = vst.msk [vmem:[%s5003_s11 + $0x38] sm:$0xff] %vm1813_vm3, %v1643_v36  ;;  %v1943_v60 = vadd.f32 %v3750_v25, %v1942_v26  ;;  %2549 = vmatmul.msk.f32.gmra.mxu1 %vm118_vm0, %v2785_v30  ;;  %2595 = vmatmul.msk.f32.gmra.mxu0 %vm1407_vm2, %v1301_v41  ;;  %v2786_v36 = vld [vmem:[%s4992_s1 + $0x158] sm:$0xff]  ;;  %2670 = vtanh.f32 %v1053_v14 }
 0x1da   :  { %v943_v41 = vmax.f32 %v458_v3, %v815_v63 }
 0x1db   :  { %2379 = vst [vmem:[%s5002_s12 + $0x40] sm:$0xff] %v2315_v15  ;;  %v910_v59 = vmax.f32 %v616_v0, %v782_v46  ;;  %v2116_v10 = vmul.f32 0.01, %v1943_v60 }
 0x1dd   :  { %v2180_v11 = vmax.f32 %v1943_v60, %v2116_v10  ;;  %1147 = vmatmul.f32.gmra.mxu2 %v941_v48  ;;  %1992 = vmatmul.f32.gmra.mxu3 %v910_v59  ;;  %v1352_v60 = vmul.f32 0.05, %v2669_v29  ;;  %v817_v48 = vmul.f32 0.01, %v461_v7 }
 0x1de   :  { %v618_v52 = vpop.f32.mrf.mxu1  ;;  %v1645_v12 = vpop.f32.mrf.mxu0 }
 0x1df   :  { %v2248_v24 = vmul.f32 %v3768_v37, %v2180_v11  ;;  %v619_v23 = vadd.f32 %v618_v52, %v3533_v62  ;;  %v1646_v51 = vadd.f32 %v1645_v12, %v1351_v17  ;;  %v1056_v11 = vadd.f32 %v3745_v33, %v3691_v28  ;;  %v2671_v28 = vpop.eup %2670 }
 0x1e0   :  { %v4002_v54 = vpop.f32.mrf.mxu2  ;;  %v1945_v45 = vpop.f32.mrf.mxu3 }
 0x1e1   :  { %v2316_v13 = vadd.f32 %v3773_v2, %v2248_v24  ;;  %v784_v22 = vmul.f32 0.01, %v619_v23  ;;  %1822 = vst.msk [vmem:[%s5003_s11 + $0x40] sm:$0xff] %vm1813_vm3, %v1646_v51  ;;  %v1946_v0 = vadd.f32 %v3750_v25, %v1945_v45  ;;  %2550 = vmatmul.msk.f32.gmra.mxu1 %vm118_vm0, %v2786_v36  ;;  %2596 = vmatmul.msk.f32.gmra.mxu0 %vm1407_vm2, %v1302_v53  ;;  %2672 = vtanh.f32 %v1056_v11 }
 0x1e2   :  { %v945_v51 = vmax.f32 %v461_v7, %v817_v48  ;;  %v464_v53 = vadd.f32 %v3432_v21, %v3217_v19  ;;  %v1304_v21 = vld [vmem:[%s4995_s0 + $0xd0] sm:$0xff] }
 0x1e3   :  { %2380 = vst [vmem:[%s5002_s12 + $0x48] sm:$0xff] %v2316_v13  ;;  %v912_v26 = vmax.f32 %v619_v23, %v784_v22  ;;  %v2117_v15 = vmul.f32 0.01, %v1946_v0  ;;  %v2787_v23 = vld [vmem:[%s4992_s1 + $0x160] sm:$0xff]  ;;  %v1353_v22 = vmul.f32 0.05, %v2671_v28 }
 0x1e4   :  { %v819_v29 = vmul.f32 0.01, %v464_v53 }
 0x1e5   :  { %v2181_v46 = vmax.f32 %v1946_v0, %v2117_v15  ;;  %1150 = vmatmul.f32.gmra.mxu2 %v943_v41  ;;  %1995 = vmatmul.f32.gmra.mxu3 %v912_v26  ;;  %v1059_v15 = vadd.f32 %v3745_v33, %v3701_v9 }
 0x1e6   :  { %v621_v30 = vpop.f32.mrf.mxu1  ;;  %v1648_v61 = vpop.f32.mrf.mxu0 }
 0x1e7   :  { %v2249_v59 = vmul.f32 %v3768_v37, %v2181_v46  ;;  %v622_v3 = vadd.f32 %v621_v30, %v3533_v62  ;;  %v1649_v10 = vadd.f32 %v1648_v61, %v1352_v60  ;;  %v2673_v9 = vpop.eup %2672  ;;  %2674 = vtanh.f32 %v1059_v15 }
 0x1e8   :  { %v4027_v17 = vpop.f32.mrf.mxu2  ;;  %v1948_v52 = vpop.f32.mrf.mxu3 }
 0x1e9   :  { %v2317_v12 = vadd.f32 %v3773_v2, %v2249_v59  ;;  %v786_v63 = vmul.f32 0.01, %v622_v3  ;;  %1823 = vst.msk [vmem:[%s5003_s11 + $0x48] sm:$0xff] %vm1813_vm3, %v1649_v10  ;;  %v1949_v24 = vadd.f32 %v3750_v25, %v1948_v52  ;;  %2551 = vmatmul.msk.f32.gmra.mxu1 %vm118_vm0, %v2787_v23  ;;  %2597 = vmatmul.msk.f32.gmra.mxu0 %vm1407_vm2, %v1303_v1  ;;  %v2788_v59 = vld [vmem:[%s4992_s1 + $0x168] sm:$0xff] }
 0x1ea   :  { %v467_v10 = vadd.f32 %v3453_v40, %v3217_v19  ;;  %v1305_v40 = vld [vmem:[%s4995_s0 + $0xd8] sm:$0xff] }
 0x1eb   :  { %2381 = vst [vmem:[%s5002_s12 + $0x50] sm:$0xff] %v2317_v12  ;;  %v914_v14 = vmax.f32 %v622_v3, %v786_v63  ;;  %v2118_v45 = vmul.f32 0.01, %v1949_v24  ;;  %v947_v3 = vmax.f32 %v464_v53, %v819_v29  ;;  %v1354_v12 = vmul.f32 0.05, %v2673_v9  ;;  %v2789_v29 = vld [vmem:[%s4992_s1 + $0x170] sm:$0xff] }
 0x1ec   :  { %v821_v23 = vmul.f32 0.01, %v467_v10 }
 0x1ed   :  { %v2182_v13 = vmax.f32 %v1949_v24, %v2118_v45  ;;  %1153 = vmatmul.f32.gmra.mxu2 %v945_v51  ;;  %1998 = vmatmul.f32.gmra.mxu3 %v914_v14  ;;  %v1062_v14 = vadd.f32 %v3745_v33, %v3713_v39  ;;  %v2675_v39 = vpop.eup %2674 }
 0x1ee   :  { %v624_v0 = vpop.f32.mrf.mxu1  ;;  %v1651_v36 = vpop.f32.mrf.mxu0 }
 0x1ef   :  { %v2250_v41 = vmul.f32 %v3768_v37, %v2182_v13  ;;  %v625_v7 = vadd.f32 %v624_v0, %v3533_v62  ;;  %v1652_v26 = vadd.f32 %v1651_v36, %v1353_v22  ;;  %2676 = vtanh.f32 %v1062_v14 }
 0x1f0   :  { %v4052_v46 = vpop.f32.mrf.mxu2  ;;  %v1951_v60 = vpop.f32.mrf.mxu3 }
 0x1f1   :  { %v2318_v30 = vadd.f32 %v3773_v2, %v2250_v41  ;;  %v788_v61 = vmul.f32 0.01, %v625_v7  ;;  %1824 = vst.msk [vmem:[%s5003_s11 + $0x50] sm:$0xff] %vm1813_vm3, %v1652_v26  ;;  %v1952_v48 = vadd.f32 %v3750_v25, %v1951_v60  ;;  %2552 = vmatmul.msk.f32.gmra.mxu1 %vm118_vm0, %v2788_v59  ;;  %2598 = vmatmul.msk.f32.gmra.mxu0 %vm1407_vm2, %v1304_v21  ;;  %v1355_v60 = vmul.f32 0.05, %v2675_v39 }
 0x1f2   :  { %v949_v41 = vmax.f32 %v467_v10, %v821_v23  ;;  %v1065_v10 = vadd.f32 %v3745_v33, %v3725_v4 }
 0x1f3   :  { %2382 = vst [vmem:[%s5002_s12 + $0x58] sm:$0xff] %v2318_v30  ;;  %v916_v1 = vmax.f32 %v625_v7, %v788_v61  ;;  %v2119_v11 = vmul.f32 0.01, %v1952_v48  ;;  %v470_v7 = vadd.f32 %v3472_v55, %v3217_v19  ;;  %v1306_v55 = vld [vmem:[%s4995_s0 + $0xe0] sm:$0xff] }
 0x1f4   :  { %2678 = vtanh.f32 %v1065_v10 }
 0x1f5   :  { %v2183_v52 = vmax.f32 %v1952_v48, %v2119_v11  ;;  %1156 = vmatmul.f32.gmra.mxu2 %v947_v3  ;;  %2001 = vmatmul.f32.gmra.mxu3 %v916_v1  ;;  %v823_v48 = vmul.f32 0.01, %v470_v7  ;;  %v2677_v4 = vpop.eup %2676 }
 0x1f6   :  { %v627_v63 = vpop.f32.mrf.mxu1  ;;  %v1654_v24 = vpop.f32.mrf.mxu0  ;;  %v1356_v14 = vmul.f32 0.05, %v2677_v4  ;;  %v1071_v4 = vadd.f32 %v3745_v33, %v3759_v56 }
 0x1f7   :  { %v2251_v28 = vmul.f32 %v3768_v37, %v2183_v52  ;;  %v628_v51 = vadd.f32 %v627_v63, %v3533_v62  ;;  %v1655_v53 = vadd.f32 %v1654_v24, %v1354_v12  ;;  %v2790_v24 = vld [vmem:[%s4992_s1 + $0x178] sm:$0xff]  ;;  %v951_v23 = vmax.f32 %v470_v7, %v823_v48 }
 0x1f8   :  { %v4077_v45 = vpop.f32.mrf.mxu2  ;;  %v1954_v13 = vpop.f32.mrf.mxu3  ;;  %v476_v48 = vadd.f32 %v3504_v32, %v3217_v19  ;;  %v1308_v32 = vld [vmem:[%s4995_s0 + $0xf0] sm:$0xff] }
 0x1f9   :  { %v2319_v22 = vadd.f32 %v3773_v2, %v2251_v28  ;;  %v790_v0 = vmul.f32 0.01, %v628_v51  ;;  %1825 = vst.msk [vmem:[%s5003_s11 + $0x58] sm:$0xff] %vm1813_vm3, %v1655_v53  ;;  %v1955_v36 = vadd.f32 %v3750_v25, %v1954_v13  ;;  %2553 = vmatmul.msk.f32.gmra.mxu1 %vm118_vm0, %v2789_v29  ;;  %2599 = vmatmul.msk.f32.gmra.mxu0 %vm1407_vm2, %v1305_v40 }
 0x1fa   :  { %v473_v28 = vadd.f32 %v3488_v6, %v3217_v19  ;;  %v1307_v6 = vld [vmem:[%s4995_s0 + $0xe8] sm:$0xff] }
 0x1fb   :  { %2383 = vst [vmem:[%s5002_s12 + $0x60] sm:$0xff] %v2319_v22  ;;  %v918_v26 = vmax.f32 %v628_v51, %v790_v0  ;;  %v2120_v21 = vmul.f32 0.01, %v1955_v36 }
 0x1fc   :  { %v825_v0 = vmul.f32 0.01, %v473_v28 }
 0x1fd   :  { %v2184_v15 = vmax.f32 %v1955_v36, %v2120_v21  ;;  %1159 = vmatmul.f32.gmra.mxu2 %v949_v41  ;;  %2004 = vmatmul.f32.gmra.mxu3 %v918_v26  ;;  %v1068_v41 = vadd.f32 %v3745_v33, %v3737_v31  ;;  %v2679_v31 = vpop.eup %2678 }
 0x1fe   :  { %v630_v30 = vpop.f32.mrf.mxu1  ;;  %v1657_v61 = vpop.f32.mrf.mxu0 }
 0x1ff   :  { %v2252_v59 = vmul.f32 %v3768_v37, %v2184_v15  ;;  %v631_v9 = vadd.f32 %v630_v30, %v3533_v62  ;;  %v1658_v3 = vadd.f32 %v1657_v61, %v1355_v60  ;;  %v2791_v30 = vld [vmem:[%s4992_s1 + $0x180] sm:$0xff]  ;;  %v953_v61 = vmax.f32 %v473_v28, %v825_v0 }
 0x200   :  { %v4102_v1 = vpop.f32.mrf.mxu2  ;;  %v1957_v11 = vpop.f32.mrf.mxu3  ;;  %2680 = vtanh.f32 %v1068_v41 }
 0x201   :  { %v2320_v52 = vadd.f32 %v3773_v2, %v2252_v59  ;;  %v792_v12 = vmul.f32 0.01, %v631_v9  ;;  %1826 = vst.msk [vmem:[%s5003_s11 + $0x60] sm:$0xff] %vm1813_vm3, %v1658_v3  ;;  %v1958_v63 = vadd.f32 %v3750_v25, %v1957_v11  ;;  %2554 = vmatmul.msk.f32.gmra.mxu1 %vm118_vm0, %v2790_v24  ;;  %2600 = vmatmul.msk.f32.gmra.mxu0 %vm1407_vm2, %v1306_v55  ;;  %v1357_v55 = vmul.f32 0.05, %v2679_v31 }
 0x202   :  { %2682 = vtanh.f32 %v1071_v4 }
 0x203   :  { %2384 = vst [vmem:[%s5002_s12 + $0x68] sm:$0xff] %v2320_v52  ;;  %v920_v51 = vmax.f32 %v631_v9, %v792_v12  ;;  %v2121_v53 = vmul.f32 0.01, %v1958_v63  ;;  %v827_v52 = vmul.f32 0.01, %v476_v48 }
 0x205   :  { %v2185_v40 = vmax.f32 %v1958_v63, %v2121_v53  ;;  %1162 = vmatmul.f32.gmra.mxu2 %v951_v23  ;;  %2007 = vmatmul.f32.gmra.mxu3 %v920_v51 }
 0x206   :  { %v633_v13 = vpop.f32.mrf.mxu1  ;;  %v1660_v22 = vpop.f32.mrf.mxu0 }
 0x207   :  { %v2253_v36 = vmul.f32 %v3768_v37, %v2185_v40  ;;  %v634_v29 = vadd.f32 %v633_v13, %v3533_v62  ;;  %v1661_v39 = vadd.f32 %v1660_v22, %v1356_v14  ;;  %v2792_v14 = vld [vmem:[%s4992_s1 + $0x188] sm:$0xff]  ;;  %v2681_v56 = vpop.eup %2680  ;;  %v955_v13 = vmax.f32 %v476_v48, %v827_v52 }
 0x208   :  { %v4127_v7 = vpop.f32.mrf.mxu2  ;;  %v1960_v26 = vpop.f32.mrf.mxu3  ;;  %v479_v22 = vadd.f32 %v3520_v49, %v3217_v19  ;;  %v1309_v49 = vld [vmem:[%s4995_s0 + $0xf8] sm:$0xff] }
 0x209   :  { %v2321_v21 = vadd.f32 %v3773_v2, %v2253_v36  ;;  %v794_v15 = vmul.f32 0.01, %v634_v29  ;;  %1827 = vst.msk [vmem:[%s5003_s11 + $0x68] sm:$0xff] %vm1813_vm3, %v1661_v39  ;;  %v1961_v60 = vadd.f32 %v3750_v25, %v1960_v26  ;;  %2555 = vmatmul.msk.f32.gmra.mxu1 %vm118_vm0, %v2791_v30  ;;  %2601 = vmatmul.msk.f32.gmra.mxu0 %vm1407_vm2, %v1307_v6  ;;  %v1358_v39 = vmul.f32 0.05, %v2681_v56 }
 0x20a   :  { %v829_v26 = vmul.f32 0.01, %v479_v22  ;;  %v1077_v56 = vadd.f32 %v3745_v33, %v3802_v50  ;;  %v485_v50 = vadd.f32 %v3274_v47, %v3217_v19  ;;  %v1311_v47 = vld [vmem:[%s4995_s0 + $0x108] sm:$0xff] }
 0x20b   :  { %2385 = vst [vmem:[%s5002_s12 + $0x70] sm:$0xff] %v2321_v21  ;;  %v922_v59 = vmax.f32 %v634_v29, %v794_v15  ;;  %v2122_v9 = vmul.f32 0.01, %v1961_v60 }
 0x20d   :  { %v2186_v3 = vmax.f32 %v1961_v60, %v2122_v9  ;;  %1165 = vmatmul.f32.gmra.mxu2 %v953_v61  ;;  %2010 = vmatmul.f32.gmra.mxu3 %v922_v59  ;;  %v1074_v61 = vadd.f32 %v3745_v33, %v3783_v20  ;;  %v482_v20 = vadd.f32 %v3253_v38, %v3217_v19 }
 0x20e   :  { %v636_v10 = vpop.f32.mrf.mxu1  ;;  %v1663_v11 = vpop.f32.mrf.mxu0 }
 0x20f   :  { %v2254_v12 = vmul.f32 %v3768_v37, %v2186_v3  ;;  %v637_v63 = vadd.f32 %v636_v10, %v3533_v62  ;;  %v1664_v24 = vadd.f32 %v1663_v11, %v1357_v55  ;;  %v2793_v3 = vld [vmem:[%s4992_s1 + $0x190] sm:$0xff]  ;;  %v2683_v55 = vpop.eup %2682  ;;  %v957_v10 = vmax.f32 %v479_v22, %v829_v26 }
 0x210   :  { %v4152_v23 = vpop.f32.mrf.mxu2  ;;  %v1963_v28 = vpop.f32.mrf.mxu3  ;;  %2684 = vtanh.f32 %v1074_v61  ;;  %v831_v4 = vmul.f32 0.01, %v482_v20 }
 0x211   :  { %v2322_v51 = vadd.f32 %v3773_v2, %v2254_v12  ;;  %v796_v53 = vmul.f32 0.01, %v637_v63  ;;  %1828 = vst.msk [vmem:[%s5003_s11 + $0x70] sm:$0xff] %vm1813_vm3, %v1664_v24  ;;  %v1964_v40 = vadd.f32 %v3750_v25, %v1963_v28  ;;  %2556 = vmatmul.msk.f32.gmra.mxu1 %vm118_vm0, %v2792_v14  ;;  %2602 = vmatmul.msk.f32.gmra.mxu0 %vm1407_vm2, %v1308_v32  ;;  %2686 = vtanh.f32 %v1077_v56 }
 0x212   :  { %v959_v33 = vmax.f32 %v482_v20, %v831_v4 }
 0x213   :  { %2386 = vst [vmem:[%s5002_s12 + $0x78] sm:$0xff] %v2322_v51  ;;  %v924_v0 = vmax.f32 %v637_v63, %v796_v53  ;;  %v2123_v36 = vmul.f32 0.01, %v1964_v40  ;;  %v1359_v63 = vmul.f32 0.05, %v2683_v55  ;;  %v1310_v53 = vld [vmem:[%s4995_s0 + $0x100] sm:$0xff] }
 0x214   :  { %v4238_v55 = vld [vmem:[%s4999_s8] ss:$0 sm:$0xff] }
 0x215   :  { %v2187_v29 = vmax.f32 %v1964_v40, %v2123_v36  ;;  %1168 = vmatmul.f32.gmra.mxu2 %v955_v13  ;;  %2013 = vmatmul.f32.gmra.mxu3 %v924_v0  ;;  %v2794_v36 = vld [vmem:[%s4992_s1 + $0x198] sm:$0xff] }
 0x216   :  { %v639_v6 = vpop.f32.mrf.mxu1  ;;  %v1666_v41 = vpop.f32.mrf.mxu0 }
 0x217   :  { %v2255_v21 = vmul.f32 %v3768_v37, %v2187_v29  ;;  %v640_v15 = vadd.f32 %v639_v6, %v3533_v62  ;;  %v1667_v60 = vadd.f32 %v1666_v41, %v1358_v39  ;;  %v2685_v29 = vpop.eup %2684 }
 0x218   :  { %v4175_v30 = vpop.f32.mrf.mxu2  ;;  %v1966_v31 = vpop.f32.mrf.mxu3  ;;  %v1360_v26 = vmul.f32 0.05, %v2685_v29 }
 0x219   :  { %v2323_v48 = vadd.f32 %v3773_v2, %v2255_v21  ;;  %v798_v59 = vmul.f32 0.01, %v640_v15  ;;  %1829 = vst.msk [vmem:[%s5003_s11 + $0x78] sm:$0xff] %vm1813_vm3, %v1667_v60  ;;  %v1967_v9 = vadd.f32 %v3750_v25, %v1966_v31  ;;  %2557 = vmatmul.msk.f32.gmra.mxu1 %vm118_vm0, %v2793_v3  ;;  %2603 = vmatmul.msk.f32.gmra.mxu0 %vm1407_vm2, %v1309_v49  ;;  %v833_v21 = vmul.f32 0.01, %v485_v50 }
 0x21b   :  { %2387 = vst [vmem:[%s5002_s12 + $0x80] sm:$0xff] %v2323_v48  ;;  %v926_v11 = vmax.f32 %v640_v15, %v798_v59  ;;  %v2124_v52 = vmul.f32 0.01, %v1967_v9  ;;  %v4230_v59 = vld [vmem:[%s4998_s6] ss:$0 sm:$0xff] }
 0x21d   :  { %v2188_v12 = vmax.f32 %v1967_v9, %v2124_v52  ;;  %1171 = vmatmul.f32.gmra.mxu2 %v957_v10  ;;  %2016 = vmatmul.f32.gmra.mxu3 %v926_v11  ;;  %v1080_v9 = vadd.f32 %v4230_v59, %v3827_v16  ;;  %v2797_v10 = vld [vmem:[%s4992_s1 + $0x1a0] sm:$0xff]  ;;  %v961_v16 = vmax.f32 %v485_v50, %v833_v21  ;;  %v2800_v50 = vld [vmem:[%s4992_s1 + $0x1a8] sm:$0xff] }
 0x21e   :  { %v642_v24 = vpop.f32.mrf.mxu1  ;;  %v1669_v32 = vpop.f32.mrf.mxu0  ;;  %v488_v11 = vadd.f32 %v3299_v57, %v3217_v19 }
 0x21f   :  { %v2256_v28 = vmul.f32 %v3768_v37, %v2188_v12  ;;  %v643_v51 = vadd.f32 %v642_v24, %v3533_v62  ;;  %v1670_v38 = vadd.f32 %v1669_v32, %v1359_v63  ;;  %2688 = vtanh.f32 %v1080_v9 }
 0x220   :  { %v4200_v40 = vpop.f32.mrf.mxu2  ;;  %v1969_v14 = vpop.f32.mrf.mxu3  ;;  %v835_v4 = vmul.f32 0.01, %v488_v11 }
 0x221   :  { %v2324_v13 = vadd.f32 %v3773_v2, %v2256_v28  ;;  %v800_v22 = vmul.f32 0.01, %v643_v51  ;;  %1830 = vst.msk [vmem:[%s5003_s11 + $0x80] sm:$0xff] %vm1813_vm3, %v1670_v38  ;;  %v1970_v0 = vadd.f32 %v3750_v25, %v1969_v14  ;;  %2558 = vmatmul.msk.f32.gmra.mxu1 %vm118_vm0, %v2794_v36  ;;  %2604 = vmatmul.msk.f32.gmra.mxu0 %vm1407_vm2, %v1310_v53  ;;  %v4258_v28 = vld [vmem:[%s5000_s9] ss:$0 sm:$0xff]  ;;  %v1312_v53 = vld [vmem:[%s4995_s0 + $0x110] sm:$0xff] }
 0x223   :  { %2388 = vst [vmem:[%s5002_s12 + $0x88] sm:$0xff] %v2324_v13  ;;  %v928_v39 = vmax.f32 %v643_v51, %v800_v22  ;;  %v2125_v6 = vmul.f32 0.01, %v1970_v0  ;;  %v1083_v22 = vadd.f32 %v4230_v59, %v3852_v35 }
 0x225   :  { %v2189_v25 = vmax.f32 %v1970_v0, %v2125_v6  ;;  %1174 = vmatmul.f32.gmra.mxu2 %v959_v33  ;;  %2019 = vmatmul.f32.gmra.mxu3 %v928_v39  ;;  %v4272_v0 = vld [vmem:[%s5001_s10] ss:$0 sm:$0xff]  ;;  %v963_v39 = vmax.f32 %v488_v11, %v835_v4  ;;  %v491_v6 = vadd.f32 %v3320_v5, %v3217_v19  ;;  %2690 = vtanh.f32 %v1083_v22  ;;  %v1313_v5 = vld [vmem:[%s4995_s0 + $0x118] sm:$0xff] }
 0x226   :  { %v645_v41 = vpop.f32.mrf.mxu1  ;;  %v1672_v49 = vpop.f32.mrf.mxu0 }
 0x227   :  { %v2257_v15 = vmul.f32 %v3768_v37, %v2189_v25  ;;  %v646_v60 = vadd.f32 %v645_v41, %v3533_v62  ;;  %v1673_v31 = vadd.f32 %v1672_v49, %v1360_v26 }
 0x228   :  { %v4225_v61 = vpop.f32.mrf.mxu2  ;;  %v1972_v48 = vpop.f32.mrf.mxu3 }
 0x229   :  { %v2325_v37 = vadd.f32 %v3773_v2, %v2257_v15  ;;  %v802_v3 = vmul.f32 0.01, %v646_v60  ;;  %v1973_v20 = vadd.f32 %v4238_v55, %v1972_v48  ;;  %2559 = vmatmul.msk.f32.gmra.mxu1 %vm118_vm0, %v2797_v10  ;;  %1831 = vst.msk [vmem:[%s5003_s11 + $0x88] sm:$0xff] %vm1813_vm3, %v1673_v31  ;;  %2605 = vmatmul.msk.f32.gmra.mxu0 %vm1407_vm2, %v1311_v47  ;;  %v2687_v2 = vpop.eup %2686 }
 0x22a   :  { %v1361_v32 = vmul.f32 0.05, %v2687_v2  ;;  %v2689_v35 = vpop.eup %2688 }
 0x22b   :  { %2389 = vst [vmem:[%s5002_s12 + $0x90] sm:$0xff] %v2325_v37  ;;  %v930_v52 = vmax.f32 %v646_v60, %v802_v3  ;;  %v2126_v12 = vmul.f32 0.01, %v1973_v20  ;;  %v1362_v15 = vmul.f32 0.05, %v2689_v35  ;;  %v1086_v3 = vadd.f32 %v4230_v59, %v3877_v44  ;;  %v2691_v11 = vpop.eup %2690  ;;  %v2802_v35 = vld [vmem:[%s4992_s1 + $0x1b8] sm:$0xff] }
 0x22c   :  { %v837_v60 = vmul.f32 0.01, %v491_v6  ;;  %v1363_v4 = vmul.f32 0.05, %v2691_v11 }
 0x22d   :  { %v2190_v63 = vmax.f32 %v1973_v20, %v2126_v12  ;;  %1177 = vmatmul.f32.gmra.mxu2 %v961_v16  ;;  %2022 = vmatmul.f32.gmra.mxu3 %v930_v52  ;;  %v2801_v16 = vld [vmem:[%s4992_s1 + $0x1b0] sm:$0xff]  ;;  %v494_v52 = vadd.f32 %v3347_v27, %v3217_v19  ;;  %2692 = vtanh.f32 %v1086_v3  ;;  %v1314_v27 = vld [vmem:[%s4995_s0 + $0x120] sm:$0xff]  ;;  %v1092_v3 = vadd.f32 %v4230_v59, %v3927_v42 }
 0x22e   :  { %v648_v24 = vpop.f32.mrf.mxu1  ;;  %v1675_v38 = vpop.f32.mrf.mxu0  ;;  %v965_v44 = vmax.f32 %v491_v6, %v837_v60  ;;  %v497_v6 = vadd.f32 %v3377_v43, %v3217_v19  ;;  %v1315_v43 = vld [vmem:[%s4995_s0 + $0x128] sm:$0xff] }
 0x22f   :  { %v2258_v57 = vmul.f32 %v4258_v28, %v2190_v63  ;;  %v649_v51 = vadd.f32 %v648_v24, %v3533_v62  ;;  %v1676_v14 = vadd.f32 %v1675_v38, %v1361_v32 }
 0x230   :  { %v4265_v56 = vpop.f32.mrf.mxu2  ;;  %v1975_v13 = vpop.f32.mrf.mxu3  ;;  %v841_v60 = vmul.f32 0.01, %v497_v6 }
 0x231   :  { %v2326_v36 = vadd.f32 %v4272_v0, %v2258_v57  ;;  %v804_v29 = vmul.f32 0.01, %v649_v51  ;;  %v1976_v33 = vadd.f32 %v4238_v55, %v1975_v13  ;;  %2560 = vmatmul.msk.f32.gmra.mxu1 %vm118_vm0, %v2800_v50  ;;  %1832 = vst.msk [vmem:[%s5003_s11 + $0x90] sm:$0xff] %vm1813_vm3, %v1676_v14  ;;  %2606 = vmatmul.msk.f32.gmra.mxu0 %vm1407_vm2, %v1312_v53  ;;  %v839_v57 = vmul.f32 0.01, %v494_v52 }
 0x232   :  { %v969_v42 = vmax.f32 %v497_v6, %v841_v60 }
 0x233   :  { %2390 = vst [vmem:[%s5002_s12 + $0x98] sm:$0xff] %v2326_v36  ;;  %v932_v25 = vmax.f32 %v649_v51, %v804_v29  ;;  %v2127_v41 = vmul.f32 0.01, %v1976_v33  ;;  %v1089_v36 = vadd.f32 %v4230_v59, %v3902_v34  ;;  %v967_v34 = vmax.f32 %v494_v52, %v839_v57 }
 0x235   :  { %v2191_v26 = vmax.f32 %v1976_v33, %v2127_v41  ;;  %1180 = vmatmul.f32.gmra.mxu2 %v963_v39  ;;  %2025 = vmatmul.f32.gmra.mxu3 %v932_v25  ;;  %v2693_v39 = vpop.eup %2692  ;;  %2694 = vtanh.f32 %v1089_v36 }
 0x236   :  { %v651_v21 = vpop.f32.mrf.mxu1  ;;  %v1678_v31 = vpop.f32.mrf.mxu0  ;;  %2696 = vtanh.f32 %v1092_v3  ;;  %v1098_v3 = vadd.f32 %v4230_v59, %v3977_v18 }
 0x237   :  { %v2259_v49 = vmul.f32 %v4258_v28, %v2191_v26  ;;  %v652_v47 = vadd.f32 %v651_v21, %v3533_v62  ;;  %v1679_v48 = vadd.f32 %v1678_v31, %v1362_v15  ;;  %v1364_v15 = vmul.f32 0.05, %v2693_v39  ;;  %v5027_v39 = vld [vmem:[#allocation2_spill] sm:$0xff] }
 0x238   :  { %v4295_v9 = vpop.f32.mrf.mxu2  ;;  %v1978_v37 = vpop.f32.mrf.mxu3 }
 0x239   :  { %v2327_v20 = vadd.f32 %v4272_v0, %v2259_v49  ;;  %v806_v10 = vmul.f32 0.01, %v652_v47  ;;  %v1979_v2 = vadd.f32 %v4238_v55, %v1978_v37  ;;  %2561 = vmatmul.msk.f32.gmra.mxu1 %vm118_vm0, %v2801_v16  ;;  %1833 = vst.msk [vmem:[%s5003_s11 + $0x98] sm:$0xff] %vm1813_vm3, %v1679_v48  ;;  %2607 = vmatmul.msk.f32.gmra.mxu0 %vm1407_vm2, %v1313_v5  ;;  %v2803_v16 = vld [vmem:[%s4992_s1 + $0x1c0] sm:$0xff] }
 0x23b   :  { %2391 = vst [vmem:[%s5002_s12 + $0xa0] sm:$0xff] %v2327_v20  ;;  %v934_v12 = vmax.f32 %v652_v47, %v806_v10  ;;  %v2128_v63 = vmul.f32 0.01, %v1979_v2  ;;  %v2695_v11 = vpop.eup %2694 }
 0x23d   :  { %v2192_v24 = vmax.f32 %v1979_v2, %v2128_v63  ;;  %1183 = vmatmul.f32.gmra.mxu2 %v965_v44  ;;  %2028 = vmatmul.f32.gmra.mxu3 %v934_v12  ;;  %v500_v44 = vadd.f32 %v3402_v58, %v3217_v19  ;;  %v1316_v58 = vld [vmem:[%s4995_s0 + $0x130] sm:$0xff] }
 0x23e   :  { %v654_v32 = vpop.f32.mrf.mxu1  ;;  %v1681_v53 = vpop.f32.mrf.mxu0 }
 0x23f   :  { %v2260_v51 = vmul.f32 %v4258_v28, %v2192_v24  ;;  %v655_v38 = vadd.f32 %v654_v32, %v3533_v62  ;;  %v1682_v14 = vadd.f32 %v1681_v53, %v1363_v4  ;;  %v1365_v32 = vmul.f32 0.05, %v2695_v11 }
 0x240   :  { %v4320_v13 = vpop.f32.mrf.mxu2  ;;  %v1981_v22 = vpop.f32.mrf.mxu3  ;;  %v843_v4 = vmul.f32 0.01, %v500_v44 }
 0x241   :  { %v2328_v29 = vadd.f32 %v4272_v0, %v2260_v51  ;;  %v808_v33 = vmul.f32 0.01, %v655_v38  ;;  %v1982_v50 = vadd.f32 %v4238_v55, %v1981_v22  ;;  %2562 = vmatmul.msk.f32.gmra.mxu1 %vm118_vm0, %v2802_v35  ;;  %1834 = vst.msk [vmem:[%s5003_s11 + $0xa0] sm:$0xff] %vm1813_vm3, %v1682_v14  ;;  %2608 = vmatmul.msk.f32.gmra.mxu0 %vm1407_vm2, %v1314_v27  ;;  %v2697_v35 = vpop.eup %2696 }
 0x242   :  { %v1095_v22 = vadd.f32 %v4230_v59, %v3952_v8  ;;  %v971_v8 = vmax.f32 %v500_v44, %v843_v4 }
 0x243   :  { %2392 = vst [vmem:[%s5002_s12 + $0xa8] sm:$0xff] %v2328_v29  ;;  %v936_v25 = vmax.f32 %v655_v38, %v808_v33  ;;  %v2129_v41 = vmul.f32 0.01, %v1982_v50 }
 0x244   :  { %2698 = vtanh.f32 %v1095_v22 }
 0x245   :  { %v2193_v26 = vmax.f32 %v1982_v50, %v2129_v41  ;;  %1186 = vmatmul.f32.gmra.mxu2 %v967_v34  ;;  %2031 = vmatmul.f32.gmra.mxu3 %v936_v25  ;;  %v2804_v50 = vld [vmem:[%s4992_s1 + $0x1c8] sm:$0xff]  ;;  %v503_v34 = vadd.f32 %v5027_v39, %v3217_v19  ;;  %2700 = vtanh.f32 %v1098_v3  ;;  %v5029_v39 = vld [vmem:[#allocation4_spill] sm:$0xff] }
 0x246   :  { %v657_v21 = vpop.f32.mrf.mxu1  ;;  %v1684_v31 = vpop.f32.mrf.mxu0 }
 0x247   :  { %v2261_v49 = vmul.f32 %v4258_v28, %v2193_v26  ;;  %v658_v47 = vadd.f32 %v657_v21, %v3533_v62  ;;  %v1685_v5 = vadd.f32 %v1684_v31, %v1364_v15  ;;  %v1366_v21 = vmul.f32 0.05, %v2697_v35  ;;  %v1317_v31 = vld [vmem:[%s4995_s0 + $0x138] sm:$0xff] }
 0x248   :  { %v4345_v48 = vpop.f32.mrf.mxu2  ;;  %v1984_v37 = vpop.f32.mrf.mxu3  ;;  %v845_v15 = vmul.f32 0.01, %v503_v34  ;;  %v2806_v35 = vld [vmem:[%s4992_s1 + $0x1d8] sm:$0xff] }
 0x249   :  { %v2329_v20 = vadd.f32 %v4272_v0, %v2261_v49  ;;  %v810_v10 = vmul.f32 0.01, %v658_v47  ;;  %v1985_v2 = vadd.f32 %v4238_v55, %v1984_v37  ;;  %2563 = vmatmul.msk.f32.gmra.mxu1 %vm118_vm0, %v2803_v16  ;;  %1835 = vst.msk [vmem:[%s5003_s11 + $0xa8] sm:$0xff] %vm1813_vm3, %v1685_v5  ;;  %2609 = vmatmul.msk.f32.gmra.mxu0 %vm1407_vm2, %v1315_v43  ;;  %v2805_v16 = vld [vmem:[%s4992_s1 + $0x1d0] sm:$0xff] }
 0x24a   :  { %v2699_v11 = vpop.eup %2698  ;;  %v973_v18 = vmax.f32 %v503_v34, %v845_v15  ;;  %v509_v34 = vadd.f32 %v5029_v39, %v3217_v19  ;;  %v5031_v39 = vld [vmem:[#allocation9_spill] sm:$0xff] }
 0x24b   :  { %2393 = vst [vmem:[%s5002_s12 + $0xb0] sm:$0xff] %v2329_v20  ;;  %v938_v52 = vmax.f32 %v658_v47, %v810_v10  ;;  %v2130_v12 = vmul.f32 0.01, %v1985_v2 }
 0x24c   :  { %v849_v15 = vmul.f32 0.01, %v509_v34 }
 0x24d   :  { %v2194_v63 = vmax.f32 %v1985_v2, %v2130_v12  ;;  %1189 = vmatmul.f32.gmra.mxu2 %v969_v42  ;;  %2034 = vmatmul.f32.gmra.mxu3 %v938_v52  ;;  %v5028_v42 = vld [vmem:[#allocation3_spill] sm:$0xff] }
 0x24e   :  { %v660_v24 = vpop.f32.mrf.mxu1  ;;  %v1687_v38 = vpop.f32.mrf.mxu0  ;;  %v506_v44 = vadd.f32 %v5028_v42, %v3217_v19  ;;  %v5030_v42 = vld [vmem:[#allocation7_spill] sm:$0xff] }
 0x24f   :  { %v2262_v57 = vmul.f32 %v4258_v28, %v2194_v63  ;;  %v661_v51 = vadd.f32 %v660_v24, %v3533_v62  ;;  %v1688_v53 = vadd.f32 %v1687_v38, %v1365_v32  ;;  %v1367_v32 = vmul.f32 0.05, %v2699_v11  ;;  %v2807_v11 = vld [vmem:[%s4992_s1 + $0x1e0] sm:$0xff] }
 0x250   :  { %v4370_v27 = vpop.f32.mrf.mxu2  ;;  %v1987_v14 = vpop.f32.mrf.mxu3  ;;  %v847_v4 = vmul.f32 0.01, %v506_v44 }
 0x251   :  { %v2330_v36 = vadd.f32 %v4272_v0, %v2262_v57  ;;  %v812_v29 = vmul.f32 0.01, %v661_v51  ;;  %v1988_v33 = vadd.f32 %v4238_v55, %v1987_v14  ;;  %2564 = vmatmul.msk.f32.gmra.mxu1 %vm118_vm0, %v2804_v50  ;;  %1836 = vst.msk [vmem:[%s5003_s11 + $0xb0] sm:$0xff] %vm1813_vm3, %v1688_v53  ;;  %2610 = vmatmul.msk.f32.gmra.mxu0 %vm1407_vm2, %v1316_v58  ;;  %v1318_v58 = vld [vmem:[%s4995_s0 + $0x140] sm:$0xff] }
 0x253   :  { %2394 = vst [vmem:[%s5002_s12 + $0xb8] sm:$0xff] %v2330_v36  ;;  %v940_v6 = vmax.f32 %v661_v51, %v812_v29  ;;  %v2131_v25 = vmul.f32 0.01, %v1988_v33  ;;  %v1101_v36 = vadd.f32 %v4230_v59, %v4002_v54  ;;  %v975_v54 = vmax.f32 %v506_v44, %v847_v4 }
 0x254   :  { %v512_v44 = vadd.f32 %v5030_v42, %v3217_v19  ;;  %v5032_v42 = vld [vmem:[#allocation11_spill] sm:$0xff] }
 0x255   :  { %v2195_v41 = vmax.f32 %v1988_v33, %v2131_v25  ;;  %1192 = vmatmul.f32.gmra.mxu2 %v971_v8  ;;  %2037 = vmatmul.f32.gmra.mxu3 %v940_v6  ;;  %v2701_v8 = vpop.eup %2700  ;;  %2702 = vtanh.f32 %v1101_v36 }
 0x256   :  { %v663_v26 = vpop.f32.mrf.mxu1  ;;  %v1690_v47 = vpop.f32.mrf.mxu0  ;;  %v851_v4 = vmul.f32 0.01, %v512_v44 }
 0x257   :  { %v2263_v60 = vmul.f32 %v4258_v28, %v2195_v41  ;;  %v664_v49 = vadd.f32 %v663_v26, %v3533_v62  ;;  %v1691_v43 = vadd.f32 %v1690_v47, %v1366_v21  ;;  %v1368_v21 = vmul.f32 0.05, %v2701_v8  ;;  %v2808_v8 = vld [vmem:[%s4992_s1 + $0x1e8] sm:$0xff] }
 0x258   :  { %v4395_v5 = vpop.f32.mrf.mxu2  ;;  %v1990_v37 = vpop.f32.mrf.mxu3 }
 0x259   :  { %v2331_v20 = vadd.f32 %v4272_v0, %v2263_v60  ;;  %v814_v10 = vmul.f32 0.01, %v664_v49  ;;  %v1991_v2 = vadd.f32 %v4238_v55, %v1990_v37  ;;  %2565 = vmatmul.msk.f32.gmra.mxu1 %vm118_vm0, %v2805_v16  ;;  %1837 = vst.msk [vmem:[%s5003_s11 + $0xb8] sm:$0xff] %vm1813_vm3, %v1691_v43  ;;  %2611 = vmatmul.msk.f32.gmra.mxu0 %vm1407_vm2, %v1317_v31  ;;  %v1319_v31 = vld [vmem:[%s4995_s0 + $0x148] sm:$0xff] }
 0x25b   :  { %2395 = vst [vmem:[%s5002_s12 + $0xc0] sm:$0xff] %v2331_v20  ;;  %v942_v52 = vmax.f32 %v664_v49, %v814_v10  ;;  %v2132_v12 = vmul.f32 0.01, %v1991_v2  ;;  %v1104_v20 = vadd.f32 %v4230_v59, %v4027_v17  ;;  %v977_v17 = vmax.f32 %v509_v34, %v849_v15 }
 0x25c   :  { %v515_v34 = vadd.f32 %v5031_v39, %v3217_v19 }
 0x25d   :  { %v2196_v63 = vmax.f32 %v1991_v2, %v2132_v12  ;;  %1195 = vmatmul.f32.gmra.mxu2 %v973_v18  ;;  %2040 = vmatmul.f32.gmra.mxu3 %v942_v52  ;;  %v2703_v18 = vpop.eup %2702  ;;  %2704 = vtanh.f32 %v1104_v20 }
 0x25e   :  { %v666_v24 = vpop.f32.mrf.mxu1  ;;  %v1693_v38 = vpop.f32.mrf.mxu0  ;;  %v853_v15 = vmul.f32 0.01, %v515_v34 }
 0x25f   :  { %v2264_v57 = vmul.f32 %v4258_v28, %v2196_v63  ;;  %v667_v51 = vadd.f32 %v666_v24, %v3533_v62  ;;  %v1694_v53 = vadd.f32 %v1693_v38, %v1367_v32  ;;  %v1369_v32 = vmul.f32 0.05, %v2703_v18  ;;  %v2809_v18 = vld [vmem:[%s4992_s1 + $0x1f0] sm:$0xff] }
 0x260   :  { %v4420_v14 = vpop.f32.mrf.mxu2  ;;  %v1993_v22 = vpop.f32.mrf.mxu3 }
 0x261   :  { %v2332_v29 = vadd.f32 %v4272_v0, %v2264_v57  ;;  %v816_v33 = vmul.f32 0.01, %v667_v51  ;;  %v1994_v50 = vadd.f32 %v4238_v55, %v1993_v22  ;;  %2566 = vmatmul.msk.f32.gmra.mxu1 %vm118_vm0, %v2806_v35  ;;  %1838 = vst.msk [vmem:[%s5003_s11 + $0xc0] sm:$0xff] %vm1813_vm3, %v1694_v53  ;;  %2612 = vmatmul.msk.f32.gmra.mxu0 %vm1407_vm2, %v1318_v58  ;;  %v1320_v58 = vld [vmem:[%s4995_s0 + $0x150] sm:$0xff] }
 0x263   :  { %2396 = vst [vmem:[%s5002_s12 + $0xc8] sm:$0xff] %v2332_v29  ;;  %v944_v6 = vmax.f32 %v667_v51, %v816_v33  ;;  %v2133_v25 = vmul.f32 0.01, %v1994_v50  ;;  %v1107_v29 = vadd.f32 %v4230_v59, %v4052_v46  ;;  %v979_v46 = vmax.f32 %v512_v44, %v851_v4 }
 0x264   :  { %v518_v44 = vadd.f32 %v5032_v42, %v3217_v19  ;;  %v1322_v19 = vld [vmem:[%s4995_s0 + $0x160] sm:$0xff] }
 0x265   :  { %v2197_v41 = vmax.f32 %v1994_v50, %v2133_v25  ;;  %1198 = vmatmul.f32.gmra.mxu2 %v975_v54  ;;  %2043 = vmatmul.f32.gmra.mxu3 %v944_v6  ;;  %v2705_v54 = vpop.eup %2704  ;;  %2706 = vtanh.f32 %v1107_v29  ;;  %v1113_v29 = vadd.f32 %v4230_v59, %v4102_v1 }
 0x266   :  { %v669_v26 = vpop.f32.mrf.mxu1  ;;  %v1696_v47 = vpop.f32.mrf.mxu0  ;;  %v855_v4 = vmul.f32 0.01, %v518_v44 }
 0x267   :  { %v2265_v60 = vmul.f32 %v4258_v28, %v2197_v41  ;;  %v670_v49 = vadd.f32 %v669_v26, %v3533_v62  ;;  %v1697_v43 = vadd.f32 %v1696_v47, %v1368_v21  ;;  %v1370_v21 = vmul.f32 0.05, %v2705_v54 }
 0x268   :  { %v4445_v37 = vpop.f32.mrf.mxu2  ;;  %v1996_v3 = vpop.f32.mrf.mxu3  ;;  %v983_v1 = vmax.f32 %v518_v44, %v855_v4 }
 0x269   :  { %v2333_v10 = vadd.f32 %v4272_v0, %v2265_v60  ;;  %v818_v2 = vmul.f32 0.01, %v670_v49  ;;  %v1997_v16 = vadd.f32 %v4238_v55, %v1996_v3  ;;  %2567 = vmatmul.msk.f32.gmra.mxu1 %vm118_vm0, %v2807_v11  ;;  %1839 = vst.msk [vmem:[%s5003_s11 + $0xc8] sm:$0xff] %vm1813_vm3, %v1697_v43  ;;  %2613 = vmatmul.msk.f32.gmra.mxu0 %vm1407_vm2, %v1319_v31  ;;  %v1321_v31 = vld [vmem:[%s4995_s0 + $0x158] sm:$0xff] }
 0x26b   :  { %2397 = vst [vmem:[%s5002_s12 + $0xd0] sm:$0xff] %v2333_v10  ;;  %v946_v52 = vmax.f32 %v670_v49, %v818_v2  ;;  %v2134_v12 = vmul.f32 0.01, %v1997_v16  ;;  %v1110_v10 = vadd.f32 %v4230_v59, %v4077_v45  ;;  %v981_v45 = vmax.f32 %v515_v34, %v853_v15 }
 0x26c   :  { %v1116_v15 = vadd.f32 %v4230_v59, %v4127_v7 }
 0x26d   :  { %v2198_v63 = vmax.f32 %v1997_v16, %v2134_v12  ;;  %1201 = vmatmul.f32.gmra.mxu2 %v977_v17  ;;  %2046 = vmatmul.f32.gmra.mxu3 %v946_v52  ;;  %v2707_v17 = vpop.eup %2706  ;;  %2708 = vtanh.f32 %v1110_v10 }
 0x26e   :  { %v672_v24 = vpop.f32.mrf.mxu1  ;;  %v1699_v38 = vpop.f32.mrf.mxu0  ;;  %2710 = vtanh.f32 %v1113_v29 }
 0x26f   :  { %v2266_v57 = vmul.f32 %v4258_v28, %v2198_v63  ;;  %v673_v51 = vadd.f32 %v672_v24, %v3533_v62  ;;  %v1700_v53 = vadd.f32 %v1699_v38, %v1369_v32  ;;  %v1371_v32 = vmul.f32 0.05, %v2707_v17 }
 0x270   :  { %v4470_v22 = vpop.f32.mrf.mxu2  ;;  %v1999_v36 = vpop.f32.mrf.mxu3 }
 0x271   :  { %v2334_v33 = vadd.f32 %v4272_v0, %v2266_v57  ;;  %v820_v50 = vmul.f32 0.01, %v673_v51  ;;  %v2000_v35 = vadd.f32 %v4238_v55, %v1999_v36  ;;  %2568 = vmatmul.msk.f32.gmra.mxu1 %vm118_vm0, %v2808_v8  ;;  %1840 = vst.msk [vmem:[%s5003_s11 + $0xd0] sm:$0xff] %vm1813_vm3, %v1700_v53  ;;  %2614 = vmatmul.msk.f32.gmra.mxu0 %vm1407_vm2, %v1320_v58  ;;  %v2810_v8 = vld [vmem:[%s4992_s1 + $0x1f8] sm:$0xff] }
 0x273   :  { %2398 = vst [vmem:[%s5002_s12 + $0xd8] sm:$0xff] %v2334_v33  ;;  %v948_v6 = vmax.f32 %v673_v51, %v820_v50  ;;  %v2135_v25 = vmul.f32 0.01, %v2000_v35  ;;  %v2709_v54 = vpop.eup %2708 }
 0x274   :  { %v2711_v7 = vpop.eup %2710 }
 0x275   :  { %v2199_v41 = vmax.f32 %v2000_v35, %v2135_v25  ;;  %1204 = vmatmul.f32.gmra.mxu2 %v979_v46  ;;  %2049 = vmatmul.f32.gmra.mxu3 %v948_v6  ;;  %v1372_v25 = vmul.f32 0.05, %v2709_v54 }
 0x276   :  { %v675_v26 = vpop.f32.mrf.mxu1  ;;  %v1702_v47 = vpop.f32.mrf.mxu0 }
 0x277   :  { %v2267_v60 = vmul.f32 %v4258_v28, %v2199_v41  ;;  %v676_v49 = vadd.f32 %v675_v26, %v3533_v62  ;;  %v1703_v43 = vadd.f32 %v1702_v47, %v1370_v21 }
 0x278   :  { %v4495_v3 = vpop.f32.mrf.mxu2  ;;  %v2002_v20 = vpop.f32.mrf.mxu3 }
 0x279   :  { %v2335_v2 = vadd.f32 %v4272_v0, %v2267_v60  ;;  %v822_v16 = vmul.f32 0.01, %v676_v49  ;;  %v2003_v11 = vadd.f32 %v4238_v55, %v2002_v20  ;;  %2569 = vmatmul.msk.f32.gmra.mxu1 %vm118_vm0, %v2809_v18  ;;  %1841 = vst.msk [vmem:[%s5003_s11 + $0xd8] sm:$0xff] %vm1813_vm3, %v1703_v43  ;;  %2615 = vmatmul.msk.f32.gmra.mxu0 %vm1407_vm2, %v1321_v31 }
 0x27b   :  { %2399 = vst [vmem:[%s5002_s12 + $0xe0] sm:$0xff] %v2335_v2  ;;  %v950_v52 = vmax.f32 %v676_v49, %v822_v16  ;;  %v2136_v12 = vmul.f32 0.01, %v2003_v11  ;;  %v1323_v2 = vld [vmem:[%s4995_s0 + $0x168] sm:$0xff] }
 0x27d   :  { %v2200_v63 = vmax.f32 %v2003_v11, %v2136_v12  ;;  %1207 = vmatmul.f32.gmra.mxu2 %v981_v45  ;;  %2052 = vmatmul.f32.gmra.mxu3 %v950_v52  ;;  %v1373_v45 = vmul.f32 0.05, %v2711_v7  ;;  %v1119_v12 = vadd.f32 %v4230_v59, %v4152_v23  ;;  %v1324_v23 = vld [vmem:[%s4995_s0 + $0x170] sm:$0xff] }
 0x27e   :  { %v678_v24 = vpop.f32.mrf.mxu1  ;;  %v1705_v38 = vpop.f32.mrf.mxu0 }
 0x27f   :  { %v2268_v57 = vmul.f32 %v4258_v28, %v2200_v63  ;;  %v679_v51 = vadd.f32 %v678_v24, %v3533_v62  ;;  %v1706_v58 = vadd.f32 %v1705_v38, %v1371_v32 }
 0x280   :  { %v4520_v53 = vpop.f32.mrf.mxu2  ;;  %v2005_v36 = vpop.f32.mrf.mxu3 }
 0x281   :  { %v2336_v33 = vadd.f32 %v4272_v0, %v2268_v57  ;;  %v824_v50 = vmul.f32 0.01, %v679_v51  ;;  %v2006_v35 = vadd.f32 %v4238_v55, %v2005_v36  ;;  %2570 = vmatmul.msk.f32.gmra.mxu1 %vm118_vm0, %v2810_v8  ;;  %1842 = vst.msk [vmem:[%s5003_s11 + $0xe0] sm:$0xff] %vm1813_vm3, %v1706_v58  ;;  %2616 = vmatmul.msk.f32.gmra.mxu0 %vm1407_vm2, %v1322_v19 }
 0x283   :  { %2400 = vst [vmem:[%s5002_s12 + $0xe8] sm:$0xff] %v2336_v33  ;;  %v952_v46 = vmax.f32 %v679_v51, %v824_v50  ;;  %v2137_v39 = vmul.f32 0.01, %v2006_v35  ;;  %v5033_v50 = vld [vmem:[#allocation5_spill] sm:$0xff] }
 0x285   :  { %v2201_v34 = vmax.f32 %v2006_v35, %v2137_v39  ;;  %1210 = vmatmul.f32.gmra.mxu2 %v983_v1  ;;  %2055 = vmatmul.f32.gmra.mxu3 %v952_v46 }
 0x286   :  { %v681_v6 = vpop.f32.mrf.mxu1  ;;  %v1708_v21 = vpop.f32.mrf.mxu0 }
 0x287   :  { %v2269_v41 = vmul.f32 %v4258_v28, %v2201_v34  ;;  %v682_v26 = vadd.f32 %v681_v6, %v3533_v62  ;;  %v1709_v60 = vadd.f32 %v1708_v21, %v1372_v25  ;;  %v1122_v6 = vadd.f32 %v4230_v59, %v4175_v30 }
 0x288   :  { %v1163_v49 = vpop.f32.mrf.mxu2  ;;  %v2008_v47 = vpop.f32.mrf.mxu3 }
 0x289   :  { %v2337_v31 = vadd.f32 %v4272_v0, %v2269_v41  ;;  %v826_v43 = vmul.f32 0.01, %v682_v26  ;;  %v1164_v20 = vadd.f32 %v4230_v59, %v1163_v49  ;;  %v2009_v10 = vadd.f32 %v4238_v55, %v2008_v47  ;;  %1843 = vst.msk [vmem:[%s5003_s11 + $0xe8] sm:$0xff] %vm1813_vm3, %v1709_v60 }
 0x28b   :  { %2401 = vst [vmem:[%s5002_s12 + $0xf0] sm:$0xff] %v2337_v31  ;;  %v954_v16 = vmax.f32 %v682_v26, %v826_v43  ;;  %2712 = vtanh.f32 %v1164_v20  ;;  %v2138_v11 = vmul.f32 0.01, %v2009_v10 }
 0x28c   :  { %2714 = vtanh.f32 %v1116_v15 }
 0x28d   :  { %v2202_v18 = vmax.f32 %v2009_v10, %v2138_v11  ;;  %2617 = vmatmul.msk.f32.vlgmr.msra.gmra.mxu2 %vm1407_vm2, %v1323_v2  ;;  %2058 = vmatmul.f32.gmra.mxu3 %v954_v16  ;;  %v5034_v10 = vld [vmem:[#allocation6_spill] sm:$0xff] }
 0x28e   :  { %v684_v17 = vpop.f32.mrf.mxu1  ;;  %v1711_v52 = vpop.f32.mrf.mxu0 }
 0x28f   :  { %v2270_v42 = vmul.f32 %v4258_v28, %v2202_v18  ;;  %v685_v44 = vadd.f32 %v684_v17, %v3533_v62  ;;  %v1712_v63 = vadd.f32 %v1711_v52, %v1373_v45 }
 0x290   :  { %v1166_v24 = vpop.f32.mrf.mxu2  ;;  %v2011_v32 = vpop.f32.mrf.mxu3 }
 0x291   :  { %v2713_v4 = vpop.eup %2712  ;;  %v2338_v57 = vadd.f32 %v4272_v0, %v2270_v42  ;;  %v828_v51 = vmul.f32 0.01, %v685_v44  ;;  %v1167_v38 = vadd.f32 %v4230_v59, %v1166_v24  ;;  %v2012_v19 = vadd.f32 %v4238_v55, %v2011_v32  ;;  %1844 = vst.msk [vmem:[%s5003_s11 + $0xf0] sm:$0xff] %vm1813_vm3, %v1712_v63 }
 0x292   :  { %v1390_v58 = vmul.f32 0.05, %v2713_v4  ;;  %v2715_v36 = vpop.eup %2714  ;;  %v1125_v42 = vadd.f32 %v4230_v59, %v4200_v40 }
 0x293   :  { %2402 = vst [vmem:[%s5002_s12 + $0xf8] sm:$0xff] %v2338_v57  ;;  %v956_v29 = vmax.f32 %v685_v44, %v828_v51  ;;  %2716 = vtanh.f32 %v1167_v38  ;;  %v2139_v33 = vmul.f32 0.01, %v2012_v19  ;;  %v1374_v1 = vmul.f32 0.05, %v2715_v36 }
 0x294   :  { %v1763_v35 = vadd.f32 %v5033_v50, %v1390_v58  ;;  %2718 = vtanh.f32 %v1119_v12  ;;  %v5035_v58 = vld [vmem:[#allocation8_spill] sm:$0xff] }
 0x295   :  { %v2203_v8 = vmax.f32 %v2012_v19, %v2139_v33  ;;  %2618 = vmatmul.msk.f32.gmra.mxu2 %vm1407_vm2, %v1324_v23  ;;  %2061 = vmatmul.f32.gmra.mxu3 %v956_v29 }
 0x296   :  { %1861 = vst.msk [vmem:[%s5003_s11 + $0x178] sm:$0xff] %vm1813_vm3, %v1763_v35  ;;  %v687_v54 = vpop.f32.mrf.mxu1  ;;  %v1714_v34 = vpop.f32.mrf.mxu0 }
 0x297   :  { %v2271_v46 = vmul.f32 %v4258_v28, %v2203_v8  ;;  %v688_v39 = vadd.f32 %v687_v54, %v3533_v62  ;;  %v1715_v25 = vadd.f32 %v1714_v34, %v1374_v1  ;;  %v1128_v54 = vadd.f32 %v4230_v59, %v4225_v61 }
 0x298   :  { %v1169_v41 = vpop.f32.mrf.mxu2  ;;  %v2014_v26 = vpop.f32.mrf.mxu3 }
 0x299   :  { %v2717_v21 = vpop.eup %2716  ;;  %v2339_v15 = vadd.f32 %v4272_v0, %v2271_v46  ;;  %v830_v60 = vmul.f32 0.01, %v688_v39  ;;  %v1170_v49 = vadd.f32 %v4230_v59, %v1169_v41  ;;  %v2015_v47 = vadd.f32 %v4238_v55, %v2014_v26  ;;  %1845 = vst.msk [vmem:[%s5003_s11 + $0xf8] sm:$0xff] %vm1813_vm3, %v1715_v25 }
 0x29a   :  { %v1391_v31 = vmul.f32 0.05, %v2717_v21  ;;  %v2719_v43 = vpop.eup %2718 }
 0x29b   :  { %2403 = vst [vmem:[%s5002_s12 + $0x100] sm:$0xff] %v2339_v15  ;;  %v958_v30 = vmax.f32 %v688_v39, %v830_v60  ;;  %2720 = vtanh.f32 %v1170_v49  ;;  %v2140_v20 = vmul.f32 0.01, %v2015_v47  ;;  %v1375_v11 = vmul.f32 0.05, %v2719_v43  ;;  %v5036_v49 = vld [vmem:[#allocation10_spill] sm:$0xff] }
 0x29c   :  { %v1766_v2 = vadd.f32 %v5034_v10, %v1391_v31  ;;  %2722 = vtanh.f32 %v1122_v6 }
 0x29d   :  { %v2204_v7 = vmax.f32 %v2015_v47, %v2140_v20  ;;  %2064 = vmatmul.f32.gmra.mxu3 %v958_v30 }
 0x29e   :  { %1862 = vst.msk [vmem:[%s5003_s11 + $0x180] sm:$0xff] %vm1813_vm3, %v1766_v2  ;;  %v690_v16 = vpop.f32.mrf.mxu1  ;;  %v1717_v45 = vpop.f32.mrf.mxu0 }
 0x29f   :  { %v2272_v18 = vmul.f32 %v4258_v28, %v2204_v7  ;;  %v691_v17 = vadd.f32 %v690_v16, %v3533_v62  ;;  %v1718_v44 = vadd.f32 %v1717_v45, %v1375_v11  ;;  %v1131_v7 = vadd.f32 %v4230_v59, %v4265_v56 }
 0x2a0   :  { %v1172_v52 = vpop.f32.mrf.mxu2  ;;  %v2017_v12 = vpop.f32.mrf.mxu3 }
 0x2a1   :  { %v2721_v63 = vpop.eup %2720  ;;  %v2340_v24 = vadd.f32 %v4272_v0, %v2272_v18  ;;  %v832_v32 = vmul.f32 0.01, %v691_v17  ;;  %v1173_v4 = vadd.f32 %v4230_v59, %v1172_v52  ;;  %v2018_v57 = vadd.f32 %v4238_v55, %v2017_v12  ;;  %1846 = vst.msk [vmem:[%s5003_s11 + $0x100] sm:$0xff] %vm1813_vm3, %v1718_v44 }
 0x2a2   :  { %v1392_v51 = vmul.f32 0.05, %v2721_v63  ;;  %v2723_v38 = vpop.eup %2722 }
 0x2a3   :  { %2404 = vst [vmem:[%s5002_s12 + $0x108] sm:$0xff] %v2340_v24  ;;  %v960_v40 = vmax.f32 %v691_v17, %v832_v32  ;;  %2724 = vtanh.f32 %v1173_v4  ;;  %v2141_v19 = vmul.f32 0.01, %v2018_v57  ;;  %v1376_v33 = vmul.f32 0.05, %v2723_v38  ;;  %v5037_v32 = vld [vmem:[#allocation12_spill] sm:$0xff] }
 0x2a4   :  { %v1769_v23 = vadd.f32 %v5035_v58, %v1392_v51  ;;  %2726 = vtanh.f32 %v1125_v42 }
 0x2a5   :  { %v2205_v36 = vmax.f32 %v2018_v57, %v2141_v19  ;;  %2067 = vmatmul.f32.gmra.mxu3 %v960_v40 }
 0x2a6   :  { %1863 = vst.msk [vmem:[%s5003_s11 + $0x188] sm:$0xff] %vm1813_vm3, %v1769_v23  ;;  %v693_v29 = vpop.f32.mrf.mxu1  ;;  %v1720_v8 = vpop.f32.mrf.mxu0  ;;  %v1134_v23 = vadd.f32 %v4230_v59, %v4295_v9 }
 0x2a7   :  { %v2273_v50 = vmul.f32 %v4258_v28, %v2205_v36  ;;  %v694_v35 = vadd.f32 %v693_v29, %v3533_v62  ;;  %v1721_v1 = vadd.f32 %v1720_v8, %v1376_v33 }
 0x2a8   :  { %v1175_v46 = vpop.f32.mrf.mxu2  ;;  %v2020_v39 = vpop.f32.mrf.mxu3 }
 0x2a9   :  { %v2725_v34 = vpop.eup %2724  ;;  %v2341_v6 = vadd.f32 %v4272_v0, %v2273_v50  ;;  %v834_v25 = vmul.f32 0.01, %v694_v35  ;;  %v1176_v41 = vadd.f32 %v4230_v59, %v1175_v46  ;;  %v2021_v26 = vadd.f32 %v4238_v55, %v2020_v39  ;;  %1847 = vst.msk [vmem:[%s5003_s11 + $0x108] sm:$0xff] %vm1813_vm3, %v1721_v1 }
 0x2aa   :  { %v1393_v21 = vmul.f32 0.05, %v2725_v34  ;;  %v2727_v15 = vpop.eup %2726 }
 0x2ab   :  { %2405 = vst [vmem:[%s5002_s12 + $0x110] sm:$0xff] %v2341_v6  ;;  %v962_v61 = vmax.f32 %v694_v35, %v834_v25  ;;  %2728 = vtanh.f32 %v1176_v41  ;;  %v2142_v60 = vmul.f32 0.01, %v2021_v26  ;;  %v1377_v30 = vmul.f32 0.05, %v2727_v15  ;;  %v5038_v6 = vld [vmem:[#allocation13_spill] sm:$0xff] }
 0x2ac   :  { %v1772_v47 = vadd.f32 %v5036_v49, %v1393_v21  ;;  %2730 = vtanh.f32 %v1128_v54  ;;  %v1137_v49 = vadd.f32 %v4230_v59, %v4320_v13 }
 0x2ad   :  { %v2206_v31 = vmax.f32 %v2021_v26, %v2142_v60  ;;  %2070 = vmatmul.f32.gmra.mxu3 %v962_v61 }
 0x2ae   :  { %1864 = vst.msk [vmem:[%s5003_s11 + $0x190] sm:$0xff] %vm1813_vm3, %v1772_v47  ;;  %v696_v43 = vpop.f32.mrf.mxu1  ;;  %v1723_v2 = vpop.f32.mrf.mxu0 }
 0x2af   :  { %v2274_v20 = vmul.f32 %v4258_v28, %v2206_v31  ;;  %v697_v10 = vadd.f32 %v696_v43, %v3533_v62  ;;  %v1724_v16 = vadd.f32 %v1723_v2, %v1377_v30 }
 0x2b0   :  { %v1178_v11 = vpop.f32.mrf.mxu2  ;;  %v2023_v18 = vpop.f32.mrf.mxu3 }
 0x2b1   :  { %v2729_v17 = vpop.eup %2728  ;;  %v2342_v45 = vadd.f32 %v4272_v0, %v2274_v20  ;;  %v836_v42 = vmul.f32 0.01, %v697_v10  ;;  %v1179_v44 = vadd.f32 %v4230_v59, %v1178_v11  ;;  %v2024_v52 = vadd.f32 %v4238_v55, %v2023_v18  ;;  %1848 = vst.msk [vmem:[%s5003_s11 + $0x110] sm:$0xff] %vm1813_vm3, %v1724_v16 }
 0x2b2   :  { %v1394_v12 = vmul.f32 0.05, %v2729_v17  ;;  %v2731_v63 = vpop.eup %2730  ;;  %v5039_v17 = vld [vmem:[#allocation14_spill] sm:$0xff] }
 0x2b3   :  { %2406 = vst [vmem:[%s5002_s12 + $0x118] sm:$0xff] %v2342_v45  ;;  %v964_v56 = vmax.f32 %v697_v10, %v836_v42  ;;  %2732 = vtanh.f32 %v1179_v44  ;;  %v2143_v24 = vmul.f32 0.01, %v2024_v52  ;;  %v1378_v38 = vmul.f32 0.05, %v2731_v63 }
 0x2b4   :  { %v1775_v4 = vadd.f32 %v5037_v32, %v1394_v12  ;;  %2734 = vtanh.f32 %v1131_v7  ;;  %v4698_v63 = vld [vmem:[%s4998_s6] ss:$0 sm:$0xff] }
 0x2b5   :  { %v2207_v57 = vmax.f32 %v2024_v52, %v2143_v24  ;;  %2073 = vmatmul.f32.gmra.mxu3 %v964_v56  ;;  %v1140_v56 = vadd.f32 %v4698_v63, %v4345_v48 }
 0x2b6   :  { %1865 = vst.msk [vmem:[%s5003_s11 + $0x198] sm:$0xff] %vm1813_vm3, %v1775_v4  ;;  %v699_v51 = vpop.f32.mrf.mxu1  ;;  %v1726_v58 = vpop.f32.mrf.mxu0 }
 0x2b7   :  { %v2275_v40 = vmul.f32 %v4258_v28, %v2207_v57  ;;  %v700_v19 = vadd.f32 %v699_v51, %v3533_v62  ;;  %v1727_v36 = vadd.f32 %v1726_v58, %v1378_v38 }
 0x2b8   :  { %v1181_v29 = vpop.f32.mrf.mxu2  ;;  %v2026_v33 = vpop.f32.mrf.mxu3 }
 0x2b9   :  { %v2733_v50 = vpop.eup %2732  ;;  %v2343_v35 = vadd.f32 %v4272_v0, %v2275_v40  ;;  %v838_v8 = vmul.f32 0.01, %v700_v19  ;;  %v1182_v54 = vadd.f32 %v4230_v59, %v1181_v29  ;;  %v2027_v1 = vadd.f32 %v4238_v55, %v2026_v33  ;;  %1849 = vst.msk [vmem:[%s5003_s11 + $0x118] sm:$0xff] %vm1813_vm3, %v1727_v36  ;;  %v4707_v40 = vld [vmem:[%s4999_s8] ss:$0 sm:$0xff]  ;;  %v5040_v36 = vld [vmem:[#allocation15_spill] sm:$0xff] }
 0x2ba   :  { %v1395_v46 = vmul.f32 0.05, %v2733_v50  ;;  %v2735_v39 = vpop.eup %2734 }
 0x2bb   :  { %2407 = vst [vmem:[%s5002_s12 + $0x120] sm:$0xff] %v2343_v35  ;;  %v966_v9 = vmax.f32 %v700_v19, %v838_v8  ;;  %2736 = vtanh.f32 %v1182_v54  ;;  %v2144_v34 = vmul.f32 0.01, %v2027_v1  ;;  %v1379_v21 = vmul.f32 0.05, %v2735_v39 }
 0x2bc   :  { %v1778_v25 = vadd.f32 %v5038_v6, %v1395_v46  ;;  %2738 = vtanh.f32 %v1134_v23  ;;  %v4725_v8 = vld [vmem:[%s5000_s9] ss:$0 sm:$0xff]  ;;  %v1143_v39 = vadd.f32 %v4698_v63, %v4370_v27 }
 0x2bd   :  { %v2208_v41 = vmax.f32 %v2027_v1, %v2144_v34  ;;  %2076 = vmatmul.f32.gmra.mxu3 %v966_v9 }
 0x2be   :  { %1866 = vst.msk [vmem:[%s5003_s11 + $0x1a0] sm:$0xff] %vm1813_vm3, %v1778_v25  ;;  %v702_v26 = vpop.f32.mrf.mxu1  ;;  %v1729_v60 = vpop.f32.mrf.mxu0 }
 0x2bf   :  { %v2276_v15 = vmul.f32 %v4258_v28, %v2208_v41  ;;  %v703_v61 = vadd.f32 %v702_v26, %v3533_v62  ;;  %v1730_v47 = vadd.f32 %v1729_v60, %v1379_v21  ;;  %v4734_v41 = vld [vmem:[%s5001_s10] ss:$0 sm:$0xff] }
 0x2c0   :  { %v1184_v31 = vpop.f32.mrf.mxu2  ;;  %v2029_v43 = vpop.f32.mrf.mxu3 }
 0x2c1   :  { %v2737_v30 = vpop.eup %2736  ;;  %v2344_v20 = vadd.f32 %v4272_v0, %v2276_v15  ;;  %v840_v10 = vmul.f32 0.01, %v703_v61  ;;  %v1185_v2 = vadd.f32 %v4230_v59, %v1184_v31  ;;  %v2030_v7 = vadd.f32 %v4238_v55, %v2029_v43  ;;  %1850 = vst.msk [vmem:[%s5003_s11 + $0x120] sm:$0xff] %vm1813_vm3, %v1730_v47  ;;  %v5041_v31 = vld [vmem:[#allocation16_spill] sm:$0xff] }
 0x2c2   :  { %v1396_v16 = vmul.f32 0.05, %v2737_v30  ;;  %v2739_v11 = vpop.eup %2738 }
 0x2c3   :  { %2408 = vst [vmem:[%s5002_s12 + $0x128] sm:$0xff] %v2344_v20  ;;  %v968_v13 = vmax.f32 %v703_v61, %v840_v10  ;;  %2740 = vtanh.f32 %v1185_v2  ;;  %v2145_v18 = vmul.f32 0.01, %v2030_v7  ;;  %v1380_v42 = vmul.f32 0.05, %v2739_v11 }
 0x2c4   :  { %v1781_v45 = vadd.f32 %v5039_v17, %v1396_v16  ;;  %2742 = vtanh.f32 %v1137_v49  ;;  %v1146_v11 = vadd.f32 %v4698_v63, %v4395_v5 }
 0x2c5   :  { %v2209_v59 = vmax.f32 %v2030_v7, %v2145_v18  ;;  %2079 = vmatmul.f32.gmra.mxu3 %v968_v13 }
 0x2c6   :  { %1867 = vst.msk [vmem:[%s5003_s11 + $0x1a8] sm:$0xff] %vm1813_vm3, %v1781_v45  ;;  %v705_v55 = vpop.f32.mrf.mxu1  ;;  %v1732_v12 = vpop.f32.mrf.mxu0 }
 0x2c7   :  { %v2277_v44 = vmul.f32 %v4258_v28, %v2209_v59  ;;  %v706_v52 = vadd.f32 %v705_v55, %v3533_v62  ;;  %v1733_v24 = vadd.f32 %v1732_v12, %v1380_v42 }
 0x2c8   :  { %v1187_v32 = vpop.f32.mrf.mxu2  ;;  %v2032_v4 = vpop.f32.mrf.mxu3 }
 0x2c9   :  { %v2741_v57 = vpop.eup %2740  ;;  %v2345_v51 = vadd.f32 %v4272_v0, %v2277_v44  ;;  %v842_v38 = vmul.f32 0.01, %v706_v52  ;;  %v1188_v28 = vadd.f32 %v4698_v63, %v1187_v32  ;;  %v2033_v19 = vadd.f32 %v4707_v40, %v2032_v4  ;;  %1851 = vst.msk [vmem:[%s5003_s11 + $0x128] sm:$0xff] %vm1813_vm3, %v1733_v24  ;;  %v5042_v24 = vld [vmem:[#allocation17_spill] sm:$0xff] }
 0x2ca   :  { %v1397_v58 = vmul.f32 0.05, %v2741_v57  ;;  %v2743_v48 = vpop.eup %2742 }
 0x2cb   :  { %2409 = vst [vmem:[%s5002_s12 + $0x130] sm:$0xff] %v2345_v51  ;;  %v970_v0 = vmax.f32 %v706_v52, %v842_v38  ;;  %2744 = vtanh.f32 %v1188_v28  ;;  %v2146_v23 = vmul.f32 0.01, %v2033_v19  ;;  %v1381_v35 = vmul.f32 0.05, %v2743_v48 }
 0x2cc   :  { %v1784_v29 = vadd.f32 %v5040_v36, %v1397_v58  ;;  %2746 = vtanh.f32 %v1140_v56  ;;  %v1149_v58 = vadd.f32 %v4698_v63, %v4420_v14 }
 0x2cd   :  { %v2210_v33 = vmax.f32 %v2033_v19, %v2146_v23  ;;  %2082 = vmatmul.f32.gmra.mxu3 %v970_v0 }
 0x2ce   :  { %1868 = vst.msk [vmem:[%s5003_s11 + $0x1b0] sm:$0xff] %vm1813_vm3, %v1784_v29  ;;  %v708_v50 = vpop.f32.mrf.mxu1  ;;  %v1735_v46 = vpop.f32.mrf.mxu0 }
 0x2cf   :  { %v2278_v54 = vmul.f32 %v4725_v8, %v2210_v33  ;;  %v709_v1 = vadd.f32 %v708_v50, %v3533_v62  ;;  %v1736_v9 = vadd.f32 %v1735_v46, %v1381_v35 }
 0x2d0   :  { %v1190_v34 = vpop.f32.mrf.mxu2  ;;  %v2035_v6 = vpop.f32.mrf.mxu3 }
 0x2d1   :  { %v2745_v25 = vpop.eup %2744  ;;  %v2346_v26 = vadd.f32 %v4734_v41, %v2278_v54  ;;  %v844_v21 = vmul.f32 0.01, %v709_v1  ;;  %v1191_v15 = vadd.f32 %v4698_v63, %v1190_v34  ;;  %v2036_v61 = vadd.f32 %v4707_v40, %v2035_v6  ;;  %1852 = vst.msk [vmem:[%s5003_s11 + $0x130] sm:$0xff] %vm1813_vm3, %v1736_v9 }
 0x2d2   :  { %v1398_v60 = vmul.f32 0.05, %v2745_v25  ;;  %v2747_v27 = vpop.eup %2746 }
 0x2d3   :  { %2410 = vst [vmem:[%s5002_s12 + $0x138] sm:$0xff] %v2346_v26  ;;  %v972_v49 = vmax.f32 %v709_v1, %v844_v21  ;;  %2748 = vtanh.f32 %v1191_v15  ;;  %v2147_v47 = vmul.f32 0.01, %v2036_v61  ;;  %v1382_v10 = vmul.f32 0.05, %v2747_v27 }
 0x2d4   :  { %v1787_v43 = vadd.f32 %v5041_v31, %v1398_v60  ;;  %2750 = vtanh.f32 %v1143_v39  ;;  %v5043_v39 = vld [vmem:[#allocation18_spill] sm:$0xff] }
 0x2d5   :  { %v2211_v30 = vmax.f32 %v2036_v61, %v2147_v47  ;;  %2085 = vmatmul.f32.gmra.mxu3 %v972_v49  ;;  %v1152_v61 = vadd.f32 %v4698_v63, %v4445_v37 }
 0x2d6   :  { %1869 = vst.msk [vmem:[%s5003_s11 + $0x1b8] sm:$0xff] %vm1813_vm3, %v1787_v43  ;;  %v711_v20 = vpop.f32.mrf.mxu1  ;;  %v1738_v16 = vpop.f32.mrf.mxu0 }
 0x2d7   :  { %v2279_v2 = vmul.f32 %v4725_v8, %v2211_v30  ;;  %v712_v7 = vadd.f32 %v711_v20, %v3533_v62  ;;  %v1739_v13 = vadd.f32 %v1738_v16, %v1382_v10  ;;  %v5044_v16 = vld [vmem:[#allocation19_spill] sm:$0xff] }
 0x2d8   :  { %v1193_v18 = vpop.f32.mrf.mxu2  ;;  %v2038_v17 = vpop.f32.mrf.mxu3 }
 0x2d9   :  { %v2749_v45 = vpop.eup %2748  ;;  %v2347_v59 = vadd.f32 %v4734_v41, %v2279_v2  ;;  %v846_v55 = vmul.f32 0.01, %v712_v7  ;;  %v1194_v42 = vadd.f32 %v4698_v63, %v1193_v18  ;;  %v2039_v44 = vadd.f32 %v4707_v40, %v2038_v17  ;;  %1853 = vst.msk [vmem:[%s5003_s11 + $0x138] sm:$0xff] %vm1813_vm3, %v1739_v13 }
 0x2da   :  { %v1399_v52 = vmul.f32 0.05, %v2749_v45  ;;  %v2751_v12 = vpop.eup %2750 }
 0x2db   :  { %2411 = vst [vmem:[%s5002_s12 + $0x140] sm:$0xff] %v2347_v59  ;;  %v974_v5 = vmax.f32 %v712_v7, %v846_v55  ;;  %2752 = vtanh.f32 %v1194_v42  ;;  %v2148_v56 = vmul.f32 0.01, %v2039_v44  ;;  %v1383_v51 = vmul.f32 0.05, %v2751_v12 }
 0x2dc   :  { %v1790_v32 = vadd.f32 %v5042_v24, %v1399_v52  ;;  %2754 = vtanh.f32 %v1146_v11  ;;  %v1155_v42 = vadd.f32 %v4698_v63, %v4470_v22 }
 0x2dd   :  { %v2212_v4 = vmax.f32 %v2039_v44, %v2148_v56  ;;  %2088 = vmatmul.f32.gmra.mxu3 %v974_v5 }
 0x2de   :  { %1870 = vst.msk [vmem:[%s5003_s11 + $0x1c0] sm:$0xff] %vm1813_vm3, %v1790_v32  ;;  %v714_v57 = vpop.f32.mrf.mxu1  ;;  %v1741_v19 = vpop.f32.mrf.mxu0 }
 0x2df   :  { %v2280_v38 = vmul.f32 %v4725_v8, %v2212_v4  ;;  %v715_v28 = vadd.f32 %v714_v57, %v3533_v62  ;;  %v1742_v48 = vadd.f32 %v1741_v19, %v1383_v51 }
 0x2e0   :  { %v1196_v0 = vpop.f32.mrf.mxu2  ;;  %v2041_v23 = vpop.f32.mrf.mxu3 }
 0x2e1   :  { %v2753_v36 = vpop.eup %2752  ;;  %v2348_v29 = vadd.f32 %v4734_v41, %v2280_v38  ;;  %v848_v33 = vmul.f32 0.01, %v715_v28  ;;  %v1197_v50 = vadd.f32 %v4698_v63, %v1196_v0  ;;  %v2042_v35 = vadd.f32 %v4707_v40, %v2041_v23  ;;  %1854 = vst.msk [vmem:[%s5003_s11 + $0x140] sm:$0xff] %vm1813_vm3, %v1742_v48 }
 0x2e2   :  { %v1400_v54 = vmul.f32 0.05, %v2753_v36  ;;  %v2755_v1 = vpop.eup %2754 }
 0x2e3   :  { %2412 = vst [vmem:[%s5002_s12 + $0x148] sm:$0xff] %v2348_v29  ;;  %v976_v14 = vmax.f32 %v715_v28, %v848_v33  ;;  %2756 = vtanh.f32 %v1197_v50  ;;  %v2149_v46 = vmul.f32 0.01, %v2042_v35  ;;  %v1384_v25 = vmul.f32 0.05, %v2755_v1  ;;  %v5045_v28 = vld [vmem:[#allocation20_spill] sm:$0xff] }
 0x2e4   :  { %v1793_v9 = vadd.f32 %v5043_v39, %v1400_v54  ;;  %2758 = vtanh.f32 %v1149_v58 }
 0x2e5   :  { %v2213_v34 = vmax.f32 %v2042_v35, %v2149_v46  ;;  %2091 = vmatmul.f32.gmra.mxu3 %v976_v14 }
 0x2e6   :  { %1871 = vst.msk [vmem:[%s5003_s11 + $0x1c8] sm:$0xff] %vm1813_vm3, %v1793_v9  ;;  %v717_v6 = vpop.f32.mrf.mxu1  ;;  %v1744_v15 = vpop.f32.mrf.mxu0 }
 0x2e7   :  { %v2281_v26 = vmul.f32 %v4725_v8, %v2213_v34  ;;  %v718_v21 = vadd.f32 %v717_v6, %v3533_v62  ;;  %v1745_v60 = vadd.f32 %v1744_v15, %v1384_v25 }
 0x2e8   :  { %v1199_v27 = vpop.f32.mrf.mxu2  ;;  %v2044_v49 = vpop.f32.mrf.mxu3 }
 0x2e9   :  { %v2757_v47 = vpop.eup %2756  ;;  %v2349_v31 = vadd.f32 %v4734_v41, %v2281_v26  ;;  %v850_v43 = vmul.f32 0.01, %v718_v21  ;;  %v1200_v30 = vadd.f32 %v4698_v63, %v1199_v27  ;;  %v2045_v20 = vadd.f32 %v4707_v40, %v2044_v49  ;;  %1855 = vst.msk [vmem:[%s5003_s11 + $0x148] sm:$0xff] %vm1813_vm3, %v1745_v60  ;;  %v5046_v26 = vld [vmem:[#allocation21_spill] sm:$0xff] }
 0x2ea   :  { %v1401_v10 = vmul.f32 0.05, %v2757_v47  ;;  %v2759_v2 = vpop.eup %2758 }
 0x2eb   :  { %2413 = vst [vmem:[%s5002_s12 + $0x150] sm:$0xff] %v2349_v31  ;;  %v978_v37 = vmax.f32 %v718_v21, %v850_v43  ;;  %2760 = vtanh.f32 %v1200_v30  ;;  %v2150_v7 = vmul.f32 0.01, %v2045_v20  ;;  %v1385_v17 = vmul.f32 0.05, %v2759_v2 }
 0x2ec   :  { %v1796_v11 = vadd.f32 %v5044_v16, %v1401_v10  ;;  %2762 = vtanh.f32 %v1152_v61  ;;  %v1158_v16 = vadd.f32 %v4698_v63, %v4495_v3 }
 0x2ed   :  { %v2214_v13 = vmax.f32 %v2045_v20, %v2150_v7  ;;  %2094 = vmatmul.f32.gmra.mxu3 %v978_v37 }
 0x2ee   :  { %1872 = vst.msk [vmem:[%s5003_s11 + $0x1d0] sm:$0xff] %vm1813_vm3, %v1796_v11  ;;  %v720_v18 = vpop.f32.mrf.mxu1  ;;  %v1747_v55 = vpop.f32.mrf.mxu0 }
 0x2ef   :  { %v2282_v45 = vmul.f32 %v4725_v8, %v2214_v13  ;;  %v721_v59 = vadd.f32 %v720_v18, %v3533_v62  ;;  %v1748_v44 = vadd.f32 %v1747_v55, %v1385_v17  ;;  %v5047_v18 = vld [vmem:[#allocation22_spill] sm:$0xff] }
 0x2f0   :  { %v1202_v52 = vpop.f32.mrf.mxu2  ;;  %v2047_v12 = vpop.f32.mrf.mxu3 }
 0x2f1   :  { %v2761_v5 = vpop.eup %2760  ;;  %v2350_v56 = vadd.f32 %v4734_v41, %v2282_v45  ;;  %v852_v24 = vmul.f32 0.01, %v721_v59  ;;  %v1203_v32 = vadd.f32 %v4698_v63, %v1202_v52  ;;  %v2048_v4 = vadd.f32 %v4707_v40, %v2047_v12  ;;  %1856 = vst.msk [vmem:[%s5003_s11 + $0x150] sm:$0xff] %vm1813_vm3, %v1748_v44 }
 0x2f2   :  { %v1402_v57 = vmul.f32 0.05, %v2761_v5  ;;  %v2763_v51 = vpop.eup %2762  ;;  %v1161_v5 = vadd.f32 %v4698_v63, %v4520_v53 }
 0x2f3   :  { %2414 = vst [vmem:[%s5002_s12 + $0x158] sm:$0xff] %v2350_v56  ;;  %v980_v22 = vmax.f32 %v721_v59, %v852_v24  ;;  %2764 = vtanh.f32 %v1203_v32  ;;  %v2151_v38 = vmul.f32 0.01, %v2048_v4  ;;  %v1386_v0 = vmul.f32 0.05, %v2763_v51 }
 0x2f4   :  { %v1799_v19 = vadd.f32 %v5045_v28, %v1402_v57  ;;  %2766 = vtanh.f32 %v1155_v42 }
 0x2f5   :  { %v2215_v58 = vmax.f32 %v2048_v4, %v2151_v38  ;;  %2097 = vmatmul.f32.gmra.mxu3 %v980_v22  ;;  %v5048_v4 = vld [vmem:[#allocation23_spill] sm:$0xff] }
 0x2f6   :  { %1873 = vst.msk [vmem:[%s5003_s11 + $0x1d8] sm:$0xff] %vm1813_vm3, %v1799_v19  ;;  %v723_v48 = vpop.f32.mrf.mxu1  ;;  %v1750_v29 = vpop.f32.mrf.mxu0 }
 0x2f7   :  { %v2283_v23 = vmul.f32 %v4725_v8, %v2215_v58  ;;  %v724_v36 = vadd.f32 %v723_v48, %v3533_v62  ;;  %v1751_v33 = vadd.f32 %v1750_v29, %v1386_v0  ;;  %v5049_v29 = vld [vmem:[#allocation24_spill] sm:$0xff] }
 0x2f8   :  { %v1205_v50 = vpop.f32.mrf.mxu2  ;;  %v2050_v35 = vpop.f32.mrf.mxu3 }
 0x2f9   :  { %v2765_v54 = vpop.eup %2764  ;;  %v2351_v1 = vadd.f32 %v4734_v41, %v2283_v23  ;;  %v854_v14 = vmul.f32 0.01, %v724_v36  ;;  %v1206_v46 = vadd.f32 %v4698_v63, %v1205_v50  ;;  %v2051_v39 = vadd.f32 %v4707_v40, %v2050_v35  ;;  %1857 = vst.msk [vmem:[%s5003_s11 + $0x158] sm:$0xff] %vm1813_vm3, %v1751_v33 }
 0x2fa   :  { %v1403_v9 = vmul.f32 0.05, %v2765_v54  ;;  %v2767_v34 = vpop.eup %2766 }
 0x2fb   :  { %2415 = vst [vmem:[%s5002_s12 + $0x160] sm:$0xff] %v2351_v1  ;;  %v982_v6 = vmax.f32 %v724_v36, %v854_v14  ;;  %2768 = vtanh.f32 %v1206_v46  ;;  %v2152_v25 = vmul.f32 0.01, %v2051_v39  ;;  %v1387_v60 = vmul.f32 0.05, %v2767_v34 }
 0x2fc   :  { %v1802_v21 = vadd.f32 %v5046_v26, %v1403_v9 }
 0x2fd   :  { %v2216_v15 = vmax.f32 %v2051_v39, %v2152_v25  ;;  %2100 = vmatmul.f32.gmra.mxu3 %v982_v6 }
 0x2fe   :  { %1874 = vst.msk [vmem:[%s5003_s11 + $0x1e0] sm:$0xff] %vm1813_vm3, %v1802_v21  ;;  %v726_v61 = vpop.f32.mrf.mxu1  ;;  %v1753_v47 = vpop.f32.mrf.mxu0 }
 0x2ff   :  { %v2284_v27 = vmul.f32 %v4725_v8, %v2216_v15  ;;  %v727_v49 = vadd.f32 %v726_v61, %v3533_v62  ;;  %v1754_v31 = vadd.f32 %v1753_v47, %v1387_v60 }
 0x300   :  { %v1208_v43 = vpop.f32.mrf.mxu2  ;;  %v2053_v30 = vpop.f32.mrf.mxu3 }
 0x301   :  { %v2769_v20 = vpop.eup %2768  ;;  %v2352_v10 = vadd.f32 %v4734_v41, %v2284_v27  ;;  %v856_v2 = vmul.f32 0.01, %v727_v49  ;;  %v1209_v37 = vadd.f32 %v4698_v63, %v1208_v43  ;;  %v2054_v7 = vadd.f32 %v4707_v40, %v2053_v30  ;;  %1858 = vst.msk [vmem:[%s5003_s11 + $0x160] sm:$0xff] %vm1813_vm3, %v1754_v31 }
 0x302   :  { %v1404_v11 = vmul.f32 0.05, %v2769_v20 }
 0x303   :  { %2416 = vst [vmem:[%s5002_s12 + $0x168] sm:$0xff] %v2352_v10  ;;  %v984_v62 = vmax.f32 %v727_v49, %v856_v2  ;;  %2770 = vtanh.f32 %v1209_v37  ;;  %v2153_v13 = vmul.f32 0.01, %v2054_v7 }
 0x304   :  { %v1805_v17 = vadd.f32 %v5047_v18, %v1404_v11  ;;  %2772 = vtanh.f32 %v1158_v16 }
 0x305   :  { %v2217_v45 = vmax.f32 %v2054_v7, %v2153_v13  ;;  %2103 = vmatmul.f32.gmra.mxu3 %v984_v62 }
 0x306   :  { %1875 = vst.msk [vmem:[%s5003_s11 + $0x1e8] sm:$0xff] %vm1813_vm3, %v1805_v17 }
 0x307   :  { %v2285_v3 = vmul.f32 %v4725_v8, %v2217_v45 }
 0x308   :  { %v1211_v59 = vpop.f32.mrf.mxu2  ;;  %v2056_v55 = vpop.f32.mrf.mxu3 }
 0x309   :  { %v2771_v42 = vpop.eup %2770  ;;  %v2353_v44 = vadd.f32 %v4734_v41, %v2285_v3  ;;  %v1212_v52 = vadd.f32 %v4698_v63, %v1211_v59  ;;  %v2057_v12 = vadd.f32 %v4707_v40, %v2056_v55 }
 0x30a   :  { %v1405_v56 = vmul.f32 0.05, %v2771_v42  ;;  %v2773_v32 = vpop.eup %2772 }
 0x30b   :  { %2417 = vst [vmem:[%s5002_s12 + $0x170] sm:$0xff] %v2353_v44  ;;  %2774 = vtanh.f32 %v1212_v52  ;;  %v2154_v24 = vmul.f32 0.01, %v2057_v12  ;;  %v1388_v53 = vmul.f32 0.05, %v2773_v32 }
 0x30c   :  { %v1808_v57 = vadd.f32 %v5048_v4, %v1405_v56  ;;  %2776 = vtanh.f32 %v1161_v5 }
 0x30d   :  { %v2218_v51 = vmax.f32 %v2057_v12, %v2154_v24 }
 0x30e   :  { %1876 = vst.msk [vmem:[%s5003_s11 + $0x1f0] sm:$0xff] %vm1813_vm3, %v1808_v57 }
 0x30f   :  { %v2286_v22 = vmul.f32 %v4725_v8, %v2218_v51 }
 0x310   :  { %v1756_v63 = vpop.f32.mrf.mxu2  ;;  %v2059_v38 = vpop.f32.mrf.mxu3 }
 0x311   :  { %v2775_v28 = vpop.eup %2774  ;;  %v2354_v19 = vadd.f32 %v4734_v41, %v2286_v22  ;;  %v1757_v58 = vadd.f32 %v1756_v63, %v1388_v53  ;;  %v2060_v48 = vadd.f32 %v4707_v40, %v2059_v38 }
 0x312   :  { %v1406_v0 = vmul.f32 0.05, %v2775_v28  ;;  %v2777_v36 = vpop.eup %2776 }
 0x313   :  { %2418 = vst [vmem:[%s5002_s12 + $0x178] sm:$0xff] %v2354_v19  ;;  %v2155_v23 = vmul.f32 0.01, %v2060_v48  ;;  %v1389_v54 = vmul.f32 0.05, %v2777_v36 }
 0x314   :  { %v1811_v33 = vadd.f32 %v5049_v29, %v1406_v0  ;;  %1859 = vst.msk [vmem:[%s5003_s11 + $0x168] sm:$0xff] %vm1813_vm3, %v1757_v58 }
 0x315   :  { %v2219_v50 = vmax.f32 %v2060_v48, %v2155_v23 }
 0x316   :  { %1877 = vst.msk [vmem:[%s5003_s11 + $0x1f8] sm:$0xff] %vm1813_vm3, %v1811_v33 }
 0x317   :  { %v2287_v35 = vmul.f32 %v4725_v8, %v2219_v50 }
 0x318   :  { %v1759_v1 = vpop.f32.mrf.mxu2  ;;  %v2062_v14 = vpop.f32.mrf.mxu3 }
 0x319   :  { %v2355_v46 = vadd.f32 %v4734_v41, %v2287_v35  ;;  %v1760_v39 = vadd.f32 %v1759_v1, %v1389_v54  ;;  %v2063_v9 = vadd.f32 %v4707_v40, %v2062_v14 }
 0x31b   :  { %2419 = vst [vmem:[%s5002_s12 + $0x180] sm:$0xff] %v2355_v46  ;;  %v2156_v34 = vmul.f32 0.01, %v2063_v9 }
 0x31c   :  { %1860 = vst.msk [vmem:[%s5003_s11 + $0x170] sm:$0xff] %vm1813_vm3, %v1760_v39 }
 0x31d   :  { %v2220_v6 = vmax.f32 %v2063_v9, %v2156_v34 }
 0x31f   :  { %v2288_v25 = vmul.f32 %v4725_v8, %v2220_v6 }
 0x320   :  { %v2065_v26 = vpop.f32.mrf.mxu3 }
 0x321   :  { %v2356_v21 = vadd.f32 %v4734_v41, %v2288_v25  ;;  %v2066_v15 = vadd.f32 %v4707_v40, %v2065_v26 }
 0x323   :  { %2420 = vst [vmem:[%s5002_s12 + $0x188] sm:$0xff] %v2356_v21  ;;  %v2157_v61 = vmul.f32 0.01, %v2066_v15 }
 0x325   :  { %v2221_v60 = vmax.f32 %v2066_v15, %v2157_v61 }
 0x327   :  { %v2289_v27 = vmul.f32 %v4725_v8, %v2221_v60 }
 0x328   :  { %v2068_v49 = vpop.f32.mrf.mxu3 }
 0x329   :  { %v2357_v47 = vadd.f32 %v4734_v41, %v2289_v27  ;;  %v2069_v31 = vadd.f32 %v4707_v40, %v2068_v49 }
 0x32b   :  { %2421 = vst [vmem:[%s5002_s12 + $0x190] sm:$0xff] %v2357_v47  ;;  %v2158_v43 = vmul.f32 0.01, %v2069_v31 }
 0x32d   :  { %v2222_v30 = vmax.f32 %v2069_v31, %v2158_v43 }
 0x32f   :  { %v2290_v20 = vmul.f32 %v4725_v8, %v2222_v30 }
 0x330   :  { %v2071_v10 = vpop.f32.mrf.mxu3 }
 0x331   :  { %v2358_v2 = vadd.f32 %v4734_v41, %v2290_v20  ;;  %v2072_v37 = vadd.f32 %v4707_v40, %v2071_v10 }
 0x333   :  { %2422 = vst [vmem:[%s5002_s12 + $0x198] sm:$0xff] %v2358_v2  ;;  %v2159_v7 = vmul.f32 0.01, %v2072_v37 }
 0x335   :  { %v2223_v16 = vmax.f32 %v2072_v37, %v2159_v7 }
 0x337   :  { %v2291_v11 = vmul.f32 %v4725_v8, %v2223_v16 }
 0x338   :  { %v2074_v62 = vpop.f32.mrf.mxu3 }
 0x339   :  { %v2359_v13 = vadd.f32 %v4734_v41, %v2291_v11  ;;  %v2075_v18 = vadd.f32 %v4707_v40, %v2074_v62 }
 0x33b   :  { %2423 = vst [vmem:[%s5002_s12 + $0x1a0] sm:$0xff] %v2359_v13  ;;  %v2160_v17 = vmul.f32 0.01, %v2075_v18 }
 0x33d   :  { %v2224_v45 = vmax.f32 %v2075_v18, %v2160_v17 }
 0x33f   :  { %v2292_v3 = vmul.f32 %v4725_v8, %v2224_v45 }
 0x340   :  { %v2077_v59 = vpop.f32.mrf.mxu3 }
 0x341   :  { %v2360_v55 = vadd.f32 %v4734_v41, %v2292_v3  ;;  %v2078_v42 = vadd.f32 %v4707_v40, %v2077_v59 }
 0x343   :  { %2424 = vst [vmem:[%s5002_s12 + $0x1a8] sm:$0xff] %v2360_v55  ;;  %v2161_v44 = vmul.f32 0.01, %v2078_v42 }
 0x345   :  { %v2225_v52 = vmax.f32 %v2078_v42, %v2161_v44 }
 0x347   :  { %v2293_v12 = vmul.f32 %v4725_v8, %v2225_v52 }
 0x348   :  { %v2080_v5 = vpop.f32.mrf.mxu3 }
 0x349   :  { %v2361_v56 = vadd.f32 %v4734_v41, %v2293_v12  ;;  %v2081_v24 = vadd.f32 %v4707_v40, %v2080_v5 }
 0x34b   :  { %2425 = vst [vmem:[%s5002_s12 + $0x1b0] sm:$0xff] %v2361_v56  ;;  %v2162_v32 = vmul.f32 0.01, %v2081_v24 }
 0x34d   :  { %v2226_v4 = vmax.f32 %v2081_v24, %v2162_v32 }
 0x34f   :  { %v2294_v57 = vmul.f32 %v4725_v8, %v2226_v4 }
 0x350   :  { %v2083_v51 = vpop.f32.mrf.mxu3 }
 0x351   :  { %v2362_v22 = vadd.f32 %v4734_v41, %v2294_v57  ;;  %v2084_v53 = vadd.f32 %v4707_v40, %v2083_v51 }
 0x353   :  { %2426 = vst [vmem:[%s5002_s12 + $0x1b8] sm:$0xff] %v2362_v22  ;;  %v2163_v63 = vmul.f32 0.01, %v2084_v53 }
 0x355   :  { %v2227_v38 = vmax.f32 %v2084_v53, %v2163_v63 }
 0x357   :  { %v2295_v28 = vmul.f32 %v4725_v8, %v2227_v38 }
 0x358   :  { %v2086_v19 = vpop.f32.mrf.mxu3 }
 0x359   :  { %v2363_v58 = vadd.f32 %v4734_v41, %v2295_v28  ;;  %v2087_v48 = vadd.f32 %v4707_v40, %v2086_v19 }
 0x35b   :  { %2427 = vst [vmem:[%s5002_s12 + $0x1c0] sm:$0xff] %v2363_v58  ;;  %v2164_v0 = vmul.f32 0.01, %v2087_v48 }
 0x35d   :  { %v2228_v23 = vmax.f32 %v2087_v48, %v2164_v0 }
 0x35f   :  { %v2296_v36 = vmul.f32 %v4725_v8, %v2228_v23 }
 0x360   :  { %v2089_v29 = vpop.f32.mrf.mxu3 }
 0x361   :  { %v2364_v33 = vadd.f32 %v4734_v41, %v2296_v36  ;;  %v2090_v50 = vadd.f32 %v4707_v40, %v2089_v29 }
 0x363   :  { %2428 = vst [vmem:[%s5002_s12 + $0x1c8] sm:$0xff] %v2364_v33  ;;  %v2165_v35 = vmul.f32 0.01, %v2090_v50 }
 0x365   :  { %v2229_v54 = vmax.f32 %v2090_v50, %v2165_v35 }
 0x367   :  { %v2297_v1 = vmul.f32 %v4725_v8, %v2229_v54 }
 0x368   :  { %v2092_v14 = vpop.f32.mrf.mxu3 }
 0x369   :  { %v2365_v46 = vadd.f32 %v4734_v41, %v2297_v1  ;;  %v2093_v39 = vadd.f32 %v4707_v40, %v2092_v14 }
 0x36b   :  { %2429 = vst [vmem:[%s5002_s12 + $0x1d0] sm:$0xff] %v2365_v46  ;;  %v2166_v9 = vmul.f32 0.01, %v2093_v39 }
 0x36d   :  { %v2230_v34 = vmax.f32 %v2093_v39, %v2166_v9 }
 0x36f   :  { %v2298_v6 = vmul.f32 %v4725_v8, %v2230_v34 }
 0x370   :  { %v2095_v25 = vpop.f32.mrf.mxu3 }
 0x371   :  { %v2366_v26 = vadd.f32 %v4734_v41, %v2298_v6  ;;  %v2096_v21 = vadd.f32 %v4707_v40, %v2095_v25 }
 0x373   :  { %2430 = vst [vmem:[%s5002_s12 + $0x1d8] sm:$0xff] %v2366_v26  ;;  %v2167_v15 = vmul.f32 0.01, %v2096_v21 }
 0x375   :  { %v2231_v61 = vmax.f32 %v2096_v21, %v2167_v15 }
 0x377   :  { %v2299_v60 = vmul.f32 %v4725_v8, %v2231_v61 }
 0x378   :  { %v2098_v27 = vpop.f32.mrf.mxu3 }
 0x379   :  { %v2367_v49 = vadd.f32 %v4734_v41, %v2299_v60  ;;  %v2099_v47 = vadd.f32 %v4707_v40, %v2098_v27 }
 0x37b   :  { %2431 = vst [vmem:[%s5002_s12 + $0x1e0] sm:$0xff] %v2367_v49  ;;  %v2168_v31 = vmul.f32 0.01, %v2099_v47 }
 0x37d   :  { %v2232_v43 = vmax.f32 %v2099_v47, %v2168_v31 }
 0x37f   :  { %v2300_v30 = vmul.f32 %v4725_v8, %v2232_v43 }
 0x380   :  { %v2101_v20 = vpop.f32.mrf.mxu3 }
 0x381   :  { %v2368_v10 = vadd.f32 %v4734_v41, %v2300_v30  ;;  %v2102_v2 = vadd.f32 %v4707_v40, %v2101_v20 }
 0x383   :  { %2432 = vst [vmem:[%s5002_s12 + $0x1e8] sm:$0xff] %v2368_v10  ;;  %v2169_v37 = vmul.f32 0.01, %v2102_v2 }
 0x385   :  { %v2233_v7 = vmax.f32 %v2102_v2, %v2169_v37 }
 0x387   :  { %v2301_v16 = vmul.f32 %v4725_v8, %v2233_v7 }
 0x388   :  { %v2104_v11 = vpop.f32.mrf.mxu3 }
 0x389   :  { %v2369_v62 = vadd.f32 %v4734_v41, %v2301_v16  ;;  %v2105_v13 = vadd.f32 %v4707_v40, %v2104_v11 }
 0x38b   :  { %2433 = vst [vmem:[%s5002_s12 + $0x1f0] sm:$0xff] %v2369_v62  ;;  %v2170_v18 = vmul.f32 0.01, %v2105_v13 }
 0x38d   :  { %v2234_v17 = vmax.f32 %v2105_v13, %v2170_v18 }
 0x38f   :  { %v2302_v45 = vmul.f32 %v4725_v8, %v2234_v17 }
 0x391   :  { %v2370_v3 = vadd.f32 %v4734_v41, %v2302_v45 }
 0x393   :  { %2434 = vst [vmem:[%s5002_s12 + $0x1f8] sm:$0xff] %v2370_v3 }

</bundles_post_ra>
